<compile_context>
chip_gen: v7x
topology: tpu7x:2x2x1
jax: 0.10.0
libtpu: 0.0.40
codegen_flags: <defaults>
</compile_context>

<pallas_src>
import functools

import jax
import jax.numpy as jnp
from jax.experimental import pallas as pl
from jax.experimental.pallas import tpu as pltpu

LANE = 128     # channel dims are padded to a multiple of the 128-wide lane dim


def _round_up(x, m):
    return ((x + m - 1) // m) * m


def _pick_tile_h(H):
    """Largest output-row tile <= 32 that divides H (full image for small H)."""
    if H <= 32:
        return H
    for th in range(32, 7, -1):
        if H % th == 0:
            return th
    return H


# ------------------------------- fused kernel -------------------------------

def _basic_block_kernel(x_ref, w1_ref, w2_ref, b1_ref, b2_ref, o_ref,
                        xf_ref, mf_ref, acc1_ref, acc2_ref, *, W, TH, Cp, Pp):
    """One (batch, row-tile) step of the fused BasicBlock.

    x_ref  : (1, H+4, W+2, Cp) bf16  zero-padded input (2-row / 1-col halo, padded channels)
    w1_ref : (3, 3*Cp, Pp)     bf16  conv1 weight, dh-major, dw folded into K, bn1 scale in
    w2_ref : (3, 3*Pp, Pp)     bf16  conv2 weight, same layout, bn2 scale folded in
    b1_ref : (1, Pp)           f32   folded bn1 bias
    b2_ref : (1, Pp)           f32   folded bn2 bias
    o_ref  : (1, TH, W, Pp)    bf16  output row tile (lane-dense full-block store)
    xf_ref : (TH+4, W, 3*Cp)   bf16  scratch: dw-folded conv1 LHS
    mf_ref : (TH+2, W, 3*Pp)   bf16  scratch: dw-folded conv2 LHS (conv1 output + zero pad)
    acc1_ref: ((TH+2)*W, Pp)   f32   conv1 accumulator
    acc2_ref: (TH*W, Pp)       f32   conv2 accumulator
    """
    t = pl.program_id(1)
    n_tiles = pl.num_programs(1)
    row0 = pl.multiple_of(t * TH, TH)          # first output row of this tile

    # ---- stage dw-folded conv1 LHS: xf[m, c, dw*Cp:(dw+1)*Cp] = x[row0+m, c+dw, :] ----
    for dw in range(3):
        xf_ref[:, :, dw * Cp:(dw + 1) * Cp] = x_ref[0, pl.ds(row0, TH + 4), dw:dw + W, :]

    # ---- conv1 (+ bn1 scale folded in): 3 MXU matmuls with K = 3*Cp ----
    for dh in range(3):
        lhs = xf_ref[dh:dh + TH + 2].reshape((TH + 2) * W, 3 * Cp)
        part = jnp.dot(lhs, w1_ref[dh], preferred_element_type=jnp.float32)
        if dh == 0:
            acc1_ref[...] = part
        else:
            acc1_ref[...] += part

    # ---- bn1 bias + relu; stage dw-folded conv2 LHS (bf16) ----
    mid = jnp.maximum(acc1_ref[...] + b1_ref[...], 0.0)
    mf_ref[:, :, Pp:2 * Pp] = mid.astype(jnp.bfloat16).reshape(TH + 2, W, Pp)
    # dw=0 tap = mid shifted right by one column; dw=2 tap = shifted left by one column.
    mf_ref[:, 1:W, 0:Pp] = mf_ref[:, 0:W - 1, Pp:2 * Pp]
    mf_ref[:, 0:W - 1, 2 * Pp:3 * Pp] = mf_ref[:, 1:W, Pp:2 * Pp]

    # conv2's zero-pad columns are never written by the interior stores above: zero them
    # once per image (must be per-n / per-core, so gate on t, not on n).
    @pl.when(t == 0)
    def _zero_pad_cols():
        mf_ref[:, 0:1, 0:Pp] = jnp.zeros((TH + 2, 1, Pp), jnp.bfloat16)
        mf_ref[:, W - 1:W, 2 * Pp:3 * Pp] = jnp.zeros((TH + 2, 1, Pp), jnp.bfloat16)

    # Halo rows outside the image are conv2 zero padding; they ARE overwritten every tile,
    # so re-zero them on the boundary tiles (after the staging stores).
    @pl.when(t == 0)
    def _zero_top():
        mf_ref[0:1, :, :] = jnp.zeros((1, W, 3 * Pp), jnp.bfloat16)

    @pl.when(t == n_tiles - 1)
    def _zero_bottom():
        mf_ref[TH + 1:TH + 2, :, :] = jnp.zeros((1, W, 3 * Pp), jnp.bfloat16)

    # ---- conv2 (+ bn2 scale folded in): 3 MXU matmuls with K = 3*Pp ----
    for dh in range(3):
        lhs = mf_ref[dh:dh + TH].reshape(TH * W, 3 * Pp)
        part = jnp.dot(lhs, w2_ref[dh], preferred_element_type=jnp.float32)
        if dh == 0:
            acc2_ref[...] = part
        else:
            acc2_ref[...] += part

    # ---- bn2 bias + residual + relu, lane-dense full-block bf16 store ----
    identity = x_ref[0, pl.ds(row0 + 2, TH), 1:1 + W, :]               # (TH, W, Cp) bf16
    out = acc2_ref[...] + b2_ref[...] + identity.reshape(TH * W, Cp)
    o_ref[0] = jnp.maximum(out, 0.0).reshape(TH, W, Pp).astype(o_ref.dtype)


# ------------------------------ JAX wrapper ---------------------------------

def _fold_bn(gamma, beta, mean, var, eps=1e-5):
    scale = gamma / jnp.sqrt(var + eps)
    bias = beta - mean * scale
    return scale, bias


def _prep_weight_folded(w_oihw, scale, cin_p, cout_p):
    """(Cout,Cin,3,3) torch conv weight -> (3, 3*cin_p, cout_p) bf16, dw folded into K."""
    cout, cin, _, _ = w_oihw.shape
    w = w_oihw * scale[:, None, None, None]                 # conv(x, w)*s == conv(x, w*s)
    w = jnp.transpose(w, (2, 3, 1, 0))                      # (dh, dw, Ci, Co)
    w = jnp.pad(w, ((0, 0), (0, 0), (0, cin_p - cin), (0, cout_p - cout)))
    return w.reshape(3, 3 * cin_p, cout_p).astype(jnp.bfloat16)


@jax.jit
def basic_block_forward(x_nchw, params):
    """BasicBlock forward (stride=1, downsample=None), inference-mode BatchNorm."""
    (w1, g1, b1, m1, v1, w2, g2, b2, m2, v2) = params
    N, C, H, W = x_nchw.shape
    P = w1.shape[0]
    assert P == C and w2.shape == (P, P, 3, 3), (
        "residual path requires inplanes == planes (stride=1, no downsample)")

    Cp = _round_up(C, LANE)            # lane-dense channels
    Pp = _round_up(P, LANE)
    TH = _pick_tile_h(H)               # large row tile: amortizes halo recompute & overhead
    nH = H // TH

    # ---- one-time layout plumbing (outside the hot kernel).  When chaining blocks, keep
    # activations NHWC bf16 padded end-to-end and skip this transpose/pad + post-kernel cast.
    x_nhwc = jnp.transpose(x_nchw, (0, 2, 3, 1))
    xp = jnp.pad(x_nhwc, ((0, 0), (2, 2), (1, 1), (0, Cp - C))).astype(jnp.bfloat16)

    s1, bias1 = _fold_bn(g1, b1, m1, v1)
    s2, bias2 = _fold_bn(g2, b2, m2, v2)
    w1f = _prep_weight_folded(w1, s1, Cp, Pp)
    w2f = _prep_weight_folded(w2, s2, Pp, Pp)
    bias1 = jnp.pad(bias1, (0, Pp - P)).reshape(1, Pp).astype(jnp.float32)
    bias2 = jnp.pad(bias2, (0, Pp - P)).reshape(1, Pp).astype(jnp.float32)

    kernel = functools.partial(_basic_block_kernel, W=W, TH=TH, Cp=Cp, Pp=Pp)

    out = pl.pallas_call(
        kernel,
        out_shape=jax.ShapeDtypeStruct((N, H, W, Pp), jnp.bfloat16),
        grid=(N, nH),
        in_specs=[
            pl.BlockSpec((1, H + 4, W + 2, Cp), lambda n, t: (n, 0, 0, 0)),  # resident per n
            pl.BlockSpec((3, 3 * Cp, Pp), lambda n, t: (0, 0, 0)),           # weights resident
            pl.BlockSpec((3, 3 * Pp, Pp), lambda n, t: (0, 0, 0)),
            pl.BlockSpec((1, Pp), lambda n, t: (0, 0)),
            pl.BlockSpec((1, Pp), lambda n, t: (0, 0)),
        ],
        out_specs=pl.BlockSpec((1, TH, W, Pp), lambda n, t: (n, t, 0, 0)),
        scratch_shapes=[
            pltpu.VMEM((TH + 4, W, 3 * Cp), jnp.bfloat16),   # dw-folded conv1 LHS
            pltpu.VMEM((TH + 2, W, 3 * Pp), jnp.bfloat16),   # dw-folded conv2 LHS
            pltpu.VMEM(((TH + 2) * W, Pp), jnp.float32),     # conv1 accumulator
            pltpu.VMEM((TH * W, Pp), jnp.float32),           # conv2 accumulator
        ],
        compiler_params=pltpu.CompilerParams(
            # Megacore (v7x) may split only over n; t must stay on one core so the resident
            # input block is not duplicated and the once-per-image pad zeroing stays valid.
            dimension_semantics=("parallel", "arbitrary"),
            vmem_limit_bytes=48 * 1024 * 1024,               # inside v7x's 64 MiB VMEM
        ),
    )(xp, w1f, w2f, bias1, bias2)

    out = out[..., :P].astype(jnp.float32)
    return jnp.transpose(out, (0, 3, 1, 2))


# --------------------------- pure-JAX reference ----------------------------

def _ref_forward(x_nchw, params):
    (w1, g1, b1, m1, v1, w2, g2, b2, m2, v2) = params

    def conv(x, w):
        return jax.lax.conv_general_dilated(
            x, w, window_strides=(1, 1), padding="SAME",
            dimension_numbers=("NCHW", "OIHW", "NCHW"),
            precision=jax.lax.Precision.HIGHEST)

    def bn(x, g, b, m, v, eps=1e-5):
        s = (g / jnp.sqrt(v + eps))[None, :, None, None]
        return (x - m[None, :, None, None]) * s + b[None, :, None, None]

    out = jax.nn.relu(bn(conv(x_nchw, w1), g1, b1, m1, v1))
    out = bn(conv(out, w2), g2, b2, m2, v2)
    out = out + x_nchw
    return jax.nn.relu(out)


# --------------------------------- main ------------------------------------

if __name__ == "__main__":
    key = jax.random.PRNGKey(0)
    N, C, H, W = 2, 4, 16, 16          # inplanes = planes = 4, stride = 1
    P = C                              # expansion = 1, no downsample

    ks = jax.random.split(key, 11)
    x = jax.random.normal(ks[0], (N, C, H, W), jnp.float32)

    w1 = 0.2 * jax.random.normal(ks[1], (P, C, 3, 3), jnp.float32)
    g1 = 0.5 + jax.random.uniform(ks[2], (P,), jnp.float32)
    b1 = 0.1 * jax.random.normal(ks[3], (P,), jnp.float32)
    m1 = 0.1 * jax.random.normal(ks[4], (P,), jnp.float32)
    v1 = 0.5 + jax.random.uniform(ks[5], (P,), jnp.float32)

    w2 = 0.2 * jax.random.normal(ks[6], (P, P, 3, 3), jnp.float32)
    g2 = 0.5 + jax.random.uniform(ks[7], (P,), jnp.float32)
    b2 = 0.1 * jax.random.normal(ks[8], (P,), jnp.float32)
    m2 = 0.1 * jax.random.normal(ks[9], (P,), jnp.float32)
    v2 = 0.5 + jax.random.uniform(ks[10], (P,), jnp.float32)

    params = (w1, g1, b1, m1, v1, w2, g2, b2, m2, v2)

    out = jax.block_until_ready(basic_block_forward(x, params))
    ref = _ref_forward(x, params)

    assert out.shape == (N, P, H, W)
    # bf16 activations / MXU operands + bf16 output store -> compare to exact-f32 loosely.
    max_err = float(jnp.max(jnp.abs(out - ref)))
    rel_l2 = float(jnp.sqrt(jnp.sum((out - ref) ** 2) / jnp.sum(ref ** 2)))
    assert rel_l2 < 5e-2 and max_err < 5e-1, (rel_l2, max_err)

    print("KERNEL_OK")
</pallas_src>

<mosaic_0001>
module attributes {stable_mosaic.version = 11 : i64} {
  func.func @_basic_block_kernel(%arg0: i32, %arg1: i32, %arg2: memref<1x20x18x128xbf16, #tpu.memory_space<vmem>>, %arg3: memref<3x384x128xbf16, #tpu.memory_space<vmem>>, %arg4: memref<3x384x128xbf16, #tpu.memory_space<vmem>>, %arg5: memref<1x128xf32, #tpu.memory_space<vmem>>, %arg6: memref<1x128xf32, #tpu.memory_space<vmem>>, %arg7: memref<1x16x16x128xbf16, #tpu.memory_space<vmem>>, %arg8: memref<20x16x384xbf16, #tpu.memory_space<vmem>>, %arg9: memref<18x16x384xbf16, #tpu.memory_space<vmem>>, %arg10: memref<288x128xf32, #tpu.memory_space<vmem>>, %arg11: memref<256x128xf32, #tpu.memory_space<vmem>>) attributes {dimension_semantics = [#tpu.dimension_semantics<parallel>, #tpu.dimension_semantics<arbitrary>], iteration_bounds = array<i64: 2, 1>, scalar_prefetch = 0 : i64, scratch_operands = 4 : i64, tpu.core_type = #tpu.core_type<tc>, window_params = [{transform_indices = @transform_0, window_bounds = array<i64: 1, 20, 18, 128>}, {pipeline_mode = #tpu.pipeline_mode<synchronous>, transform_indices = @transform_1, window_bounds = array<i64: 3, 384, 128>}, {pipeline_mode = #tpu.pipeline_mode<synchronous>, transform_indices = @transform_2, window_bounds = array<i64: 3, 384, 128>}, {pipeline_mode = #tpu.pipeline_mode<synchronous>, transform_indices = @transform_3, window_bounds = array<i64: 1, 128>}, {pipeline_mode = #tpu.pipeline_mode<synchronous>, transform_indices = @transform_4, window_bounds = array<i64: 1, 128>}, {transform_indices = @transform_5, window_bounds = array<i64: 1, 16, 16, 128>}]} {
    %c16_i32 = arith.constant 16 : i32
    %0 = arith.muli %arg1, %c16_i32 : i32
    %1 = tpu.assume_multiple %0, 16 : i32
    %c0 = arith.constant 0 : index
    %2 = arith.index_cast %1 : i32 to index
    %c0_0 = arith.constant 0 : index
    %c0_1 = arith.constant 0 : index
    %3 = vector.load %arg2[%c0, %2, %c0_0, %c0_1] : memref<1x20x18x128xbf16, #tpu.memory_space<vmem>>, vector<1x20x16x128xbf16>
    %4 = vector.shape_cast %3 : vector<1x20x16x128xbf16> to vector<20x16x128xbf16>
    %c0_2 = arith.constant 0 : index
    %c0_3 = arith.constant 0 : index
    %c0_4 = arith.constant 0 : index
    %5 = vector.load %arg8[%c0_2, %c0_3, %c0_4] : memref<20x16x384xbf16, #tpu.memory_space<vmem>>, vector<20x16x128xbf16>
    tpu.vector_store %arg8[%c0_2, %c0_3, %c0_4], %4 {strides = array<i32>} : memref<20x16x384xbf16, #tpu.memory_space<vmem>>, vector<20x16x128xbf16>,
    %c0_5 = arith.constant 0 : index
    %6 = arith.index_cast %1 : i32 to index
    %c1 = arith.constant 1 : index
    %c0_6 = arith.constant 0 : index
    %7 = vector.load %arg2[%c0_5, %6, %c1, %c0_6] : memref<1x20x18x128xbf16, #tpu.memory_space<vmem>>, vector<1x20x16x128xbf16>
    %8 = vector.shape_cast %7 : vector<1x20x16x128xbf16> to vector<20x16x128xbf16>
    %c0_7 = arith.constant 0 : index
    %c0_8 = arith.constant 0 : index
    %c128 = arith.constant 128 : index
    %9 = vector.load %arg8[%c0_7, %c0_8, %c128] : memref<20x16x384xbf16, #tpu.memory_space<vmem>>, vector<20x16x128xbf16>
    tpu.vector_store %arg8[%c0_7, %c0_8, %c128], %8 {strides = array<i32>} : memref<20x16x384xbf16, #tpu.memory_space<vmem>>, vector<20x16x128xbf16>,
    %c0_9 = arith.constant 0 : index
    %10 = arith.index_cast %1 : i32 to index
    %c2 = arith.constant 2 : index
    %c0_10 = arith.constant 0 : index
    %11 = vector.load %arg2[%c0_9, %10, %c2, %c0_10] : memref<1x20x18x128xbf16, #tpu.memory_space<vmem>>, vector<1x20x16x128xbf16>
    %12 = vector.shape_cast %11 : vector<1x20x16x128xbf16> to vector<20x16x128xbf16>
    %c0_11 = arith.constant 0 : index
    %c0_12 = arith.constant 0 : index
    %c256 = arith.constant 256 : index
    %13 = vector.load %arg8[%c0_11, %c0_12, %c256] : memref<20x16x384xbf16, #tpu.memory_space<vmem>>, vector<20x16x128xbf16>
    tpu.vector_store %arg8[%c0_11, %c0_12, %c256], %12 {strides = array<i32>} : memref<20x16x384xbf16, #tpu.memory_space<vmem>>, vector<20x16x128xbf16>,
    %c0_13 = arith.constant 0 : index
    %c0_14 = arith.constant 0 : index
    %c0_15 = arith.constant 0 : index
    %14 = vector.load %arg8[%c0_13, %c0_14, %c0_15] : memref<20x16x384xbf16, #tpu.memory_space<vmem>>, vector<18x16x384xbf16>
    %15 = vector.shape_cast %14 : vector<18x16x384xbf16> to vector<288x384xbf16>
    %c0_16 = arith.constant 0 : index
    %c0_17 = arith.constant 0 : index
    %c0_18 = arith.constant 0 : index
    %16 = vector.load %arg3[%c0_16, %c0_17, %c0_18] : memref<3x384x128xbf16, #tpu.memory_space<vmem>>, vector<1x384x128xbf16>
    %17 = vector.shape_cast %16 : vector<1x384x128xbf16> to vector<384x128xbf16>
    %cst = arith.constant dense<0.000000e+00> : vector<288x128xf32>
    %18 = tpu.matmul %15, %17, %cst {dimension_numbers = #tpu.dot_dimension_numbers<[1], [0], [0], [1], [0, 0, 1, 1], [], []>} : vector<288x384xbf16>, vector<384x128xbf16>, vector<288x128xf32> -> vector<288x128xf32>
    %c0_19 = arith.constant 0 : index
    %c0_20 = arith.constant 0 : index
    %19 = vector.load %arg10[%c0_19, %c0_20] : memref<288x128xf32, #tpu.memory_space<vmem>>, vector<288x128xf32>
    tpu.vector_store %arg10[%c0_19, %c0_20], %18 {strides = array<i32>} : memref<288x128xf32, #tpu.memory_space<vmem>>, vector<288x128xf32>,
    %c1_21 = arith.constant 1 : index
    %c0_22 = arith.constant 0 : index
    %c0_23 = arith.constant 0 : index
    %20 = vector.load %arg8[%c1_21, %c0_22, %c0_23] : memref<20x16x384xbf16, #tpu.memory_space<vmem>>, vector<18x16x384xbf16>
    %21 = vector.shape_cast %20 : vector<18x16x384xbf16> to vector<288x384xbf16>
    %c1_24 = arith.constant 1 : index
    %c0_25 = arith.constant 0 : index
    %c0_26 = arith.constant 0 : index
    %22 = vector.load %arg3[%c1_24, %c0_25, %c0_26] : memref<3x384x128xbf16, #tpu.memory_space<vmem>>, vector<1x384x128xbf16>
    %23 = vector.shape_cast %22 : vector<1x384x128xbf16> to vector<384x128xbf16>
    %cst_27 = arith.constant dense<0.000000e+00> : vector<288x128xf32>
    %24 = tpu.matmul %21, %23, %cst_27 {dimension_numbers = #tpu.dot_dimension_numbers<[1], [0], [0], [1], [0, 0, 1, 1], [], []>} : vector<288x384xbf16>, vector<384x128xbf16>, vector<288x128xf32> -> vector<288x128xf32>
    %c0_28 = arith.constant 0 : index
    %c0_29 = arith.constant 0 : index
    %25 = vector.load %arg10[%c0_28, %c0_29] : memref<288x128xf32, #tpu.memory_space<vmem>>, vector<288x128xf32>
    %26 = arith.addf %25, %24 : vector<288x128xf32>
    %c0_30 = arith.constant 0 : index
    %c0_31 = arith.constant 0 : index
    %27 = vector.load %arg10[%c0_30, %c0_31] : memref<288x128xf32, #tpu.memory_space<vmem>>, vector<288x128xf32>
    tpu.vector_store %arg10[%c0_30, %c0_31], %26 {strides = array<i32>} : memref<288x128xf32, #tpu.memory_space<vmem>>, vector<288x128xf32>,
    %c2_32 = arith.constant 2 : index
    %c0_33 = arith.constant 0 : index
    %c0_34 = arith.constant 0 : index
    %28 = vector.load %arg8[%c2_32, %c0_33, %c0_34] : memref<20x16x384xbf16, #tpu.memory_space<vmem>>, vector<18x16x384xbf16>
    %29 = vector.shape_cast %28 : vector<18x16x384xbf16> to vector<288x384xbf16>
    %c2_35 = arith.constant 2 : index
    %c0_36 = arith.constant 0 : index
    %c0_37 = arith.constant 0 : index
    %30 = vector.load %arg3[%c2_35, %c0_36, %c0_37] : memref<3x384x128xbf16, #tpu.memory_space<vmem>>, vector<1x384x128xbf16>
    %31 = vector.shape_cast %30 : vector<1x384x128xbf16> to vector<384x128xbf16>
    %cst_38 = arith.constant dense<0.000000e+00> : vector<288x128xf32>
    %32 = tpu.matmul %29, %31, %cst_38 {dimension_numbers = #tpu.dot_dimension_numbers<[1], [0], [0], [1], [0, 0, 1, 1], [], []>} : vector<288x384xbf16>, vector<384x128xbf16>, vector<288x128xf32> -> vector<288x128xf32>
    %c0_39 = arith.constant 0 : index
    %c0_40 = arith.constant 0 : index
    %33 = vector.load %arg10[%c0_39, %c0_40] : memref<288x128xf32, #tpu.memory_space<vmem>>, vector<288x128xf32>
    %34 = arith.addf %33, %32 : vector<288x128xf32>
    %c0_41 = arith.constant 0 : index
    %c0_42 = arith.constant 0 : index
    %35 = vector.load %arg10[%c0_41, %c0_42] : memref<288x128xf32, #tpu.memory_space<vmem>>, vector<288x128xf32>
    tpu.vector_store %arg10[%c0_41, %c0_42], %34 {strides = array<i32>} : memref<288x128xf32, #tpu.memory_space<vmem>>, vector<288x128xf32>,
    %c0_43 = arith.constant 0 : index
    %c0_44 = arith.constant 0 : index
    %36 = vector.load %arg10[%c0_43, %c0_44] : memref<288x128xf32, #tpu.memory_space<vmem>>, vector<288x128xf32>
    %c0_45 = arith.constant 0 : index
    %c0_46 = arith.constant 0 : index
    %37 = vector.load %arg5[%c0_45, %c0_46] : memref<1x128xf32, #tpu.memory_space<vmem>>, vector<1x128xf32>
    %38 = vector.broadcast %37 : vector<1x128xf32> to vector<288x128xf32>
    %39 = arith.addf %36, %38 : vector<288x128xf32>
    %cst_47 = arith.constant 0.000000e+00 : f32
    %40 = vector.broadcast %cst_47 : f32 to vector<288x128xf32>
    %41 = arith.maximumf %39, %40 : vector<288x128xf32>
    %42 = arith.truncf %41 : vector<288x128xf32> to vector<288x128xbf16>
    %43 = vector.shape_cast %42 : vector<288x128xbf16> to vector<18x16x128xbf16>
    %c0_48 = arith.constant 0 : index
    %c0_49 = arith.constant 0 : index
    %c128_50 = arith.constant 128 : index
    %44 = vector.load %arg9[%c0_48, %c0_49, %c128_50] : memref<18x16x384xbf16, #tpu.memory_space<vmem>>, vector<18x16x128xbf16>
    tpu.vector_store %arg9[%c0_48, %c0_49, %c128_50], %43 {strides = array<i32>} : memref<18x16x384xbf16, #tpu.memory_space<vmem>>, vector<18x16x128xbf16>,
    %c0_51 = arith.constant 0 : index
    %c0_52 = arith.constant 0 : index
    %c128_53 = arith.constant 128 : index
    %45 = vector.load %arg9[%c0_51, %c0_52, %c128_53] : memref<18x16x384xbf16, #tpu.memory_space<vmem>>, vector<18x15x128xbf16>
    %c0_54 = arith.constant 0 : index
    %c1_55 = arith.constant 1 : index
    %c0_56 = arith.constant 0 : index
    %46 = vector.load %arg9[%c0_54, %c1_55, %c0_56] : memref<18x16x384xbf16, #tpu.memory_space<vmem>>, vector<18x15x128xbf16>
    tpu.vector_store %arg9[%c0_54, %c1_55, %c0_56], %45 {strides = array<i32>} : memref<18x16x384xbf16, #tpu.memory_space<vmem>>, vector<18x15x128xbf16>,
    %c0_57 = arith.constant 0 : index
    %c1_58 = arith.constant 1 : index
    %c128_59 = arith.constant 128 : index
    %47 = vector.load %arg9[%c0_57, %c1_58, %c128_59] : memref<18x16x384xbf16, #tpu.memory_space<vmem>>, vector<18x15x128xbf16>
    %c0_60 = arith.constant 0 : index
    %c0_61 = arith.constant 0 : index
    %c256_62 = arith.constant 256 : index
    %48 = vector.load %arg9[%c0_60, %c0_61, %c256_62] : memref<18x16x384xbf16, #tpu.memory_space<vmem>>, vector<18x15x128xbf16>
    tpu.vector_store %arg9[%c0_60, %c0_61, %c256_62], %47 {strides = array<i32>} : memref<18x16x384xbf16, #tpu.memory_space<vmem>>, vector<18x15x128xbf16>,
    %c0_i32 = arith.constant 0 : i32
    %49 = arith.cmpi eq, %arg1, %c0_i32 : i32
    %50 = arith.extui %49 : i1 to i32
    %c0_i32_63 = arith.constant 0 : i32
    %51 = arith.cmpi ne, %50, %c0_i32_63 : i32
    scf.if %51 {
      %cst_111 = arith.constant 0.000000e+00 : bf16
      %98 = vector.broadcast %cst_111 : bf16 to vector<18x1x128xbf16>
      %c0_112 = arith.constant 0 : index
      %c0_113 = arith.constant 0 : index
      %c0_114 = arith.constant 0 : index
      %99 = vector.load %arg9[%c0_112, %c0_113, %c0_114] : memref<18x16x384xbf16, #tpu.memory_space<vmem>>, vector<18x1x128xbf16>
      tpu.vector_store %arg9[%c0_112, %c0_113, %c0_114], %98 {strides = array<i32>} : memref<18x16x384xbf16, #tpu.memory_space<vmem>>, vector<18x1x128xbf16>,
      %cst_115 = arith.constant 0.000000e+00 : bf16
      %100 = vector.broadcast %cst_115 : bf16 to vector<18x1x128xbf16>
      %c0_116 = arith.constant 0 : index
      %c15 = arith.constant 15 : index
      %c256_117 = arith.constant 256 : index
      %101 = vector.load %arg9[%c0_116, %c15, %c256_117] : memref<18x16x384xbf16, #tpu.memory_space<vmem>>, vector<18x1x128xbf16>
      tpu.vector_store %arg9[%c0_116, %c15, %c256_117], %100 {strides = array<i32>} : memref<18x16x384xbf16, #tpu.memory_space<vmem>>, vector<18x1x128xbf16>,
    } else {
    }
    %c0_i32_64 = arith.constant 0 : i32
    %52 = arith.cmpi eq, %arg1, %c0_i32_64 : i32
    %53 = arith.extui %52 : i1 to i32
    %c0_i32_65 = arith.constant 0 : i32
    %54 = arith.cmpi ne, %53, %c0_i32_65 : i32
    scf.if %54 {
      %cst_111 = arith.constant 0.000000e+00 : bf16
      %98 = vector.broadcast %cst_111 : bf16 to vector<1x16x384xbf16>
      %c0_112 = arith.constant 0 : index
      %c0_113 = arith.constant 0 : index
      %c0_114 = arith.constant 0 : index
      %99 = vector.load %arg9[%c0_112, %c0_113, %c0_114] : memref<18x16x384xbf16, #tpu.memory_space<vmem>>, vector<1x16x384xbf16>
      tpu.vector_store %arg9[%c0_112, %c0_113, %c0_114], %98 {strides = array<i32>} : memref<18x16x384xbf16, #tpu.memory_space<vmem>>, vector<1x16x384xbf16>,
    } else {
    }
    %c0_i32_66 = arith.constant 0 : i32
    %55 = arith.cmpi eq, %arg1, %c0_i32_66 : i32
    %56 = arith.extui %55 : i1 to i32
    %c0_i32_67 = arith.constant 0 : i32
    %57 = arith.cmpi ne, %56, %c0_i32_67 : i32
    scf.if %57 {
      %cst_111 = arith.constant 0.000000e+00 : bf16
      %98 = vector.broadcast %cst_111 : bf16 to vector<1x16x384xbf16>
      %c17 = arith.constant 17 : index
      %c0_112 = arith.constant 0 : index
      %c0_113 = arith.constant 0 : index
      %99 = vector.load %arg9[%c17, %c0_112, %c0_113] : memref<18x16x384xbf16, #tpu.memory_space<vmem>>, vector<1x16x384xbf16>
      tpu.vector_store %arg9[%c17, %c0_112, %c0_113], %98 {strides = array<i32>} : memref<18x16x384xbf16, #tpu.memory_space<vmem>>, vector<1x16x384xbf16>,
    } else {
    }
    %c0_68 = arith.constant 0 : index
    %c0_69 = arith.constant 0 : index
    %c0_70 = arith.constant 0 : index
    %58 = vector.load %arg9[%c0_68, %c0_69, %c0_70] : memref<18x16x384xbf16, #tpu.memory_space<vmem>>, vector<16x16x384xbf16>
    %59 = vector.shape_cast %58 : vector<16x16x384xbf16> to vector<256x384xbf16>
    %c0_71 = arith.constant 0 : index
    %c0_72 = arith.constant 0 : index
    %c0_73 = arith.constant 0 : index
    %60 = vector.load %arg4[%c0_71, %c0_72, %c0_73] : memref<3x384x128xbf16, #tpu.memory_space<vmem>>, vector<1x384x128xbf16>
    %61 = vector.shape_cast %60 : vector<1x384x128xbf16> to vector<384x128xbf16>
    %cst_74 = arith.constant dense<0.000000e+00> : vector<256x128xf32>
    %62 = tpu.matmul %59, %61, %cst_74 {dimension_numbers = #tpu.dot_dimension_numbers<[1], [0], [0], [1], [0, 0, 1, 1], [], []>} : vector<256x384xbf16>, vector<384x128xbf16>, vector<256x128xf32> -> vector<256x128xf32>
    %c0_75 = arith.constant 0 : index
    %c0_76 = arith.constant 0 : index
    %63 = vector.load %arg11[%c0_75, %c0_76] : memref<256x128xf32, #tpu.memory_space<vmem>>, vector<256x128xf32>
    tpu.vector_store %arg11[%c0_75, %c0_76], %62 {strides = array<i32>} : memref<256x128xf32, #tpu.memory_space<vmem>>, vector<256x128xf32>,
    %c1_77 = arith.constant 1 : index
    %c0_78 = arith.constant 0 : index
    %c0_79 = arith.constant 0 : index
    %64 = vector.load %arg9[%c1_77, %c0_78, %c0_79] : memref<18x16x384xbf16, #tpu.memory_space<vmem>>, vector<16x16x384xbf16>
    %65 = vector.shape_cast %64 : vector<16x16x384xbf16> to vector<256x384xbf16>
    %c1_80 = arith.constant 1 : index
    %c0_81 = arith.constant 0 : index
    %c0_82 = arith.constant 0 : index
    %66 = vector.load %arg4[%c1_80, %c0_81, %c0_82] : memref<3x384x128xbf16, #tpu.memory_space<vmem>>, vector<1x384x128xbf16>
    %67 = vector.shape_cast %66 : vector<1x384x128xbf16> to vector<384x128xbf16>
    %cst_83 = arith.constant dense<0.000000e+00> : vector<256x128xf32>
    %68 = tpu.matmul %65, %67, %cst_83 {dimension_numbers = #tpu.dot_dimension_numbers<[1], [0], [0], [1], [0, 0, 1, 1], [], []>} : vector<256x384xbf16>, vector<384x128xbf16>, vector<256x128xf32> -> vector<256x128xf32>
    %c0_84 = arith.constant 0 : index
    %c0_85 = arith.constant 0 : index
    %69 = vector.load %arg11[%c0_84, %c0_85] : memref<256x128xf32, #tpu.memory_space<vmem>>, vector<256x128xf32>
    %70 = arith.addf %69, %68 : vector<256x128xf32>
    %c0_86 = arith.constant 0 : index
    %c0_87 = arith.constant 0 : index
    %71 = vector.load %arg11[%c0_86, %c0_87] : memref<256x128xf32, #tpu.memory_space<vmem>>, vector<256x128xf32>
    tpu.vector_store %arg11[%c0_86, %c0_87], %70 {strides = array<i32>} : memref<256x128xf32, #tpu.memory_space<vmem>>, vector<256x128xf32>,
    %c2_88 = arith.constant 2 : index
    %c0_89 = arith.constant 0 : index
    %c0_90 = arith.constant 0 : index
    %72 = vector.load %arg9[%c2_88, %c0_89, %c0_90] : memref<18x16x384xbf16, #tpu.memory_space<vmem>>, vector<16x16x384xbf16>
    %73 = vector.shape_cast %72 : vector<16x16x384xbf16> to vector<256x384xbf16>
    %c2_91 = arith.constant 2 : index
    %c0_92 = arith.constant 0 : index
    %c0_93 = arith.constant 0 : index
    %74 = vector.load %arg4[%c2_91, %c0_92, %c0_93] : memref<3x384x128xbf16, #tpu.memory_space<vmem>>, vector<1x384x128xbf16>
    %75 = vector.shape_cast %74 : vector<1x384x128xbf16> to vector<384x128xbf16>
    %cst_94 = arith.constant dense<0.000000e+00> : vector<256x128xf32>
    %76 = tpu.matmul %73, %75, %cst_94 {dimension_numbers = #tpu.dot_dimension_numbers<[1], [0], [0], [1], [0, 0, 1, 1], [], []>} : vector<256x384xbf16>, vector<384x128xbf16>, vector<256x128xf32> -> vector<256x128xf32>
    %c0_95 = arith.constant 0 : index
    %c0_96 = arith.constant 0 : index
    %77 = vector.load %arg11[%c0_95, %c0_96] : memref<256x128xf32, #tpu.memory_space<vmem>>, vector<256x128xf32>
    %78 = arith.addf %77, %76 : vector<256x128xf32>
    %c0_97 = arith.constant 0 : index
    %c0_98 = arith.constant 0 : index
    %79 = vector.load %arg11[%c0_97, %c0_98] : memref<256x128xf32, #tpu.memory_space<vmem>>, vector<256x128xf32>
    tpu.vector_store %arg11[%c0_97, %c0_98], %78 {strides = array<i32>} : memref<256x128xf32, #tpu.memory_space<vmem>>, vector<256x128xf32>,
    %c2_i32 = arith.constant 2 : i32
    %80 = arith.addi %1, %c2_i32 : i32
    %c0_99 = arith.constant 0 : index
    %81 = arith.index_cast %80 : i32 to index
    %c1_100 = arith.constant 1 : index
    %c0_101 = arith.constant 0 : index
    %82 = vector.load %arg2[%c0_99, %81, %c1_100, %c0_101] : memref<1x20x18x128xbf16, #tpu.memory_space<vmem>>, vector<1x16x16x128xbf16>
    %83 = vector.shape_cast %82 : vector<1x16x16x128xbf16> to vector<16x16x128xbf16>
    %c0_102 = arith.constant 0 : index
    %c0_103 = arith.constant 0 : index
    %84 = vector.load %arg11[%c0_102, %c0_103] : memref<256x128xf32, #tpu.memory_space<vmem>>, vector<256x128xf32>
    %c0_104 = arith.constant 0 : index
    %c0_105 = arith.constant 0 : index
    %85 = vector.load %arg6[%c0_104, %c0_105] : memref<1x128xf32, #tpu.memory_space<vmem>>, vector<1x128xf32>
    %86 = vector.broadcast %85 : vector<1x128xf32> to vector<256x128xf32>
    %87 = arith.addf %84, %86 : vector<256x128xf32>
    %88 = vector.shape_cast %83 : vector<16x16x128xbf16> to vector<256x128xbf16>
    %89 = arith.extf %88 : vector<256x128xbf16> to vector<256x128xf32>
    %90 = arith.addf %87, %89 : vector<256x128xf32>
    %cst_106 = arith.constant 0.000000e+00 : f32
    %91 = vector.broadcast %cst_106 : f32 to vector<256x128xf32>
    %92 = arith.maximumf %90, %91 : vector<256x128xf32>
    %93 = vector.shape_cast %92 : vector<256x128xf32> to vector<16x16x128xf32>
    %94 = arith.truncf %93 : vector<16x16x128xf32> to vector<16x16x128xbf16>
    %c0_107 = arith.constant 0 : index
    %c0_108 = arith.constant 0 : index
    %c0_109 = arith.constant 0 : index
    %c0_110 = arith.constant 0 : index
    %95 = vector.load %arg7[%c0_107, %c0_108, %c0_109, %c0_110] : memref<1x16x16x128xbf16, #tpu.memory_space<vmem>>, vector<1x16x16x128xbf16>
    %96 = vector.shape_cast %95 : vector<1x16x16x128xbf16> to vector<16x16x128xbf16>
    %97 = vector.shape_cast %94 : vector<16x16x128xbf16> to vector<1x16x16x128xbf16>
    tpu.vector_store %arg7[%c0_107, %c0_108, %c0_109, %c0_110], %97 {strides = array<i32>} : memref<1x16x16x128xbf16, #tpu.memory_space<vmem>>, vector<1x16x16x128xbf16>,
    return
  }
  func.func @transform_0(%arg0: i32, %arg1: i32) -> (i32, i32, i32, i32) {
    %c0_i32 = arith.constant 0 : i32
    %c0_i32_0 = arith.constant 0 : i32
    %c0_i32_1 = arith.constant 0 : i32
    %c0_i32_2 = arith.constant 0 : i32
    return %arg0, %c0_i32, %c0_i32_0, %c0_i32_1 : i32, i32, i32, i32
  }
  func.func @transform_1(%arg0: i32, %arg1: i32) -> (i32, i32, i32) {
    %c0_i32 = arith.constant 0 : i32
    %c0_i32_0 = arith.constant 0 : i32
    %c0_i32_1 = arith.constant 0 : i32
    %c0_i32_2 = arith.constant 0 : i32
    return %c0_i32, %c0_i32_0, %c0_i32_1 : i32, i32, i32
  }
  func.func @transform_2(%arg0: i32, %arg1: i32) -> (i32, i32, i32) {
    %c0_i32 = arith.constant 0 : i32
    %c0_i32_0 = arith.constant 0 : i32
    %c0_i32_1 = arith.constant 0 : i32
    %c0_i32_2 = arith.constant 0 : i32
    return %c0_i32, %c0_i32_0, %c0_i32_1 : i32, i32, i32
  }
  func.func @transform_3(%arg0: i32, %arg1: i32) -> (i32, i32) {
    %c0_i32 = arith.constant 0 : i32
    %c0_i32_0 = arith.constant 0 : i32
    %c0_i32_1 = arith.constant 0 : i32
    return %c0_i32, %c0_i32_0 : i32, i32
  }
  func.func @transform_4(%arg0: i32, %arg1: i32) -> (i32, i32) {
    %c0_i32 = arith.constant 0 : i32
    %c0_i32_0 = arith.constant 0 : i32
    %c0_i32_1 = arith.constant 0 : i32
    return %c0_i32, %c0_i32_0 : i32, i32
  }
  func.func @transform_5(%arg0: i32, %arg1: i32) -> (i32, i32, i32, i32) {
    %c0_i32 = arith.constant 0 : i32
    %c0_i32_0 = arith.constant 0 : i32
    %c0_i32_1 = arith.constant 0 : i32
    return %arg0, %arg1, %c0_i32, %c0_i32_0 : i32, i32, i32, i32
  }
}

</mosaic_0001>

<bundles_post_ra>
// kernel: basic_block_forward.1
= control target key start
LH: loop header
LB: loop body
LE: loop exit
PB: predicated region body
PF: predicated region fallthrough
CT: control target
= control target key end

     0   :  { %s8799_s18 = smov 0   ;;  %s8801_s19 = smov 0   ;;  %s11525_s0 = inlined_call_operand.vmem [shape: bf16[2,20,18,128], index: 0, kind: input, shape index: {}]   ;;  %s11526_s1 = inlined_call_operand.vmem [shape: bf16[3,384,128], index: 1, kind: input, shape index: {}]   ;;  %s11527_s2 = inlined_call_operand.vmem [shape: bf16[3,384,128], index: 2, kind: input, shape index: {}]   ;;  %s11528_s3 = inlined_call_operand.vmem [shape: f32[1,128], index: 3, kind: input, shape index: {}]   ;;  %s11529_s4 = inlined_call_operand.vmem [shape: f32[1,128], index: 4, kind: input, shape index: {}]   ;;  %s11530_s5 = inlined_call_operand.vmem [shape: bf16[2,16,16,128], index: 5, kind: output, shape index: {}]  }
   0x1   :  { %s8803_s20 = smov 0  }
   0x2 LB: > { %s27_s21 = sadd.s32 1, %s8762_s19  ;;  %p6834_p0 = scmp.ge.s32.totalorder %s8766_s20, 1  ;;  %s8766_s20 = sphi %s8803_s20, %s15_s20   ;;  %s8762_s19 = sphi %s8801_s19, %s11691_s19   ;;  %s8758_s18 = sphi %s8799_s18, %s11690_s18  }
   0x3   : > { %p29_p1 = scmp.ge.s32.totalorder %s27_s21, 2  ;;  %p201_p2 = scmp.lt.s32.totalorder %s8766_s20, 3 }
   0x5   : > { %s11693_s21 = smov (%p29_p1, %s27_s21), 0  ;;  %p202_p3 = pnand %p6834_p0, %p201_p2 }
   0x7   : > { %205 = sbr.rel (%p202_p3) target bundleno = 1152 (0x480), region = 40 }
   0xe   : > { %v8490_v0 = vld [vmem:[%s11526_s1] sm:$0xff]   ;;  %v8768_v1 = vmov 0   ;;  %v8491_v2 = vld [vmem:[%s11526_s1 + $0x8] sm:$0xff]   ;;  %v8492_v3 = vld [vmem:[%s11526_s1 + $0x10] sm:$0xff]   ;;  %p234_p4 = scmp.lt.s32.totalorder %s8758_s18, 1  ;;  %vm1156_vm0 = vcmask 1046528  }
   0xf   : > { %1503 = vmatprep.subr.bf16.mxu0 %v8768_v1  ;;  %4019 = vst [vmem:[#allocation3 + $0x8] sm:$0xff] %v8768_v1  ;;  %v8498_v4 = vld [vmem:[%s11526_s1 + $0x80] sm:$0xff]   ;;  %v8493_v5 = vld [vmem:[%s11526_s1 + $0x18] sm:$0xff]   ;;  %v8500_v6 = vld [vmem:[%s11526_s1 + $0x88] sm:$0xff]   ;;  %vm655_vm1 = vsmask.f32 7424 }
  0x10   : > { %1504 = vmatpush1.bf16.msra.mxu0 %v8490_v0  ;;  %7972 = vmatprep.subr.bf16.mxu1 %v8498_v4  ;;  %v8502_v7 = vld [vmem:[%s11526_s1 + $0x90] sm:$0xff]   ;;  %v8494_v8 = vld [vmem:[%s11526_s1 + $0x20] sm:$0xff]   ;;  %s11695_s18 = smov (!%p234_p4, %s8758_s18), 1  ;;  %v8504_v9 = vld [vmem:[%s11526_s1 + $0x98] sm:$0xff]   ;;  %vm3626_vm2 = vcmask 1047552   ;;  %vm3961_vm4 = vcmask 1047559  }
  0x11   : > { %1505 = vmatprep.subr.bf16.mxu0 %v8768_v1  ;;  %7973 = vmatpush3.bf16.msra.mxu1 %v8498_v4  ;;  %v8495_v10 = vld [vmem:[%s11526_s1 + $0x28] sm:$0xff]   ;;  %s8464_s17 = smul.u32 240, %s11695_s18  ;;  %v8506_v11 = vld [vmem:[%s11526_s1 + $0xa0] sm:$0xff]   ;;  %v8496_v12 = vld [vmem:[%s11526_s1 + $0x30] sm:$0xff]   ;;  %vm3627_vm3 = vsmask.f32 7938 }
  0x12   : > { %7974 = vmatprep.subr.bf16.mxu1 %v8500_v6  ;;  %v8508_v13 = vld [vmem:[%s11526_s1 + $0xa8] sm:$0xff]   ;;  %v8497_v14 = vld [vmem:[%s11526_s1 + $0x38] sm:$0xff]   ;;  %v8510_v18 = vld [vmem:[%s11526_s1 + $0xb0] sm:$0xff]   ;;  %vm3962_vm5 = vsmask.f32 7966  ;;  %vm3904_vm6 = vcmask 1040384  }
  0x13   : > { %s8870_s28 = scalar_lea.vmem %s11525_s0, %s8464_s17  ;;  %v8499_v24 = vld [vmem:[%s11526_s1 + $0x40] sm:$0xff]   ;;  %v8512_v31 = vld [vmem:[%s11526_s1 + $0xb8] sm:$0xff]   ;;  %v8501_v33 = vld [vmem:[%s11526_s1 + $0x48] sm:$0xff]   ;;  %vm3905_vm7 = vsmask.f32 256  ;;  %s7358_s12 = sshll.u32 %s11695_s18, 7 }
  0x14   : > { %1506 = vmatpush1.bf16.msra.mxu0 %v8491_v2  ;;  %v8514_v15 = vld [vmem:[%s8870_s28] sm:$0xfe]   ;;  %v8515_v16 = vld [vmem:[%s8870_s28 + $0x8] ss:$0 sps:$4 sm:$0x11]   ;;  %v8503_v37 = vld [vmem:[%s11526_s1 + $0x50] sm:$0xff]   ;;  %s11339_s14 = scalar_lea.vmem %s11530_s5, %s7358_s12 }
  0x15   : > { %1507 = vmatprep.subr.bf16.mxu0 %v8768_v1  ;;  %7975 = vmatpush3.bf16.msra.mxu1 %v8500_v6  ;;  %v8516_v17 = vld [vmem:[%s8870_s28] sm:$0xff]   ;;  %v1157_v19 = vrot.slane %v8514_v15, 1  ;;  %v1158_v20 = vrot.slane %v8515_v16, 1  ;;  %v8517_v21 = vld [vmem:[%s8870_s28 + $0x8] ss:$0 sps:$4 sm:$0x11]   ;;  %vm10062_vm8 = vmand %vm3626_vm2, %vm655_vm1 }
  0x16   : > { %7976 = vmatprep.subr.bf16.mxu1 %v8502_v7  ;;  %v657_v22 = vshrl.u32 %v8516_v17, 16  ;;  %v659_v23 = vshll.u32 %v8516_v17, 16  ;;  %v664_v26 = vshll.u32 %v8517_v21, 16  ;;  %v8518_v28 = vld [vmem:[%s8870_s28 + $0xc] sm:$0xfe]   ;;  %v8914_v41 = vld [vmem:[%s11526_s1 + $0xc0] sm:$0xff]   ;;  %vm10069_vm9 = vmand %vm3626_vm2, %vm3627_vm3 }
  0x17   : > { %v1159_v25 = vsel %vm1156_vm0, %v1157_v19, %v1158_v20  ;;  %v8519_v29 = vld [vmem:[%s8870_s28 + $0x14] ss:$0 sps:$4 sm:$0x11]   ;;  %v1160_v35 = vrot.slane %v8518_v28, 1  ;;  %v8526_v38 = vld [vmem:[%s8870_s28 + $0x18] sm:$0xfe]   ;;  %vm10110_vm10 = vmand %vm3961_vm4, %vm3962_vm5 }
  0x18   : > { %1508 = vmatpush1.bf16.msra.mxu0 %v8492_v3  ;;  %7988 = vmatprep.mubr.bf16.mxu1 %v1159_v25  ;;  %v661_v27 = vrot.slane %v659_v23, 1  ;;  %v666_v30 = vrot.slane %v664_v26, 1  ;;  %v1161_v36 = vrot.slane %v8519_v29, 1  ;;  %v8527_v39 = vld [vmem:[%s8870_s28 + $0x20] ss:$0 sps:$4 sm:$0x11]   ;;  %vm10121_vm11 = vmand %vm3904_vm6, %vm3905_vm7 }
  0x19   : > { %1509 = vmatprep.subr.bf16.mxu0 %v8768_v1  ;;  %7977 = vmatpush3.bf16.msra.mxu1 %v8502_v7  ;;  %v1163_v42 = vrot.slane %v8526_v38, 1  ;;  %v1164_v43 = vrot.slane %v8527_v39, 1  ;;  %v8505_v44 = vld [vmem:[%s11526_s1 + $0x58] sm:$0xff]   ;;  %v8530_v46 = vld [vmem:[%s8870_s28 + $0x24] sm:$0xfe]   ;;  %v8522_v51 = vld [vmem:[%s8870_s28 + $0xc] sm:$0xff]  }
  0x1a   : > { %7978 = vmatprep.subr.bf16.mxu1 %v8504_v9  ;;  %v662_v32 = vor.u32 %v661_v27, %v657_v22  ;;  %v8909_v40 = vsel %vm1156_vm0, %v1160_v35, %v1161_v36  ;;  %v8531_v47 = vld [vmem:[%s8870_s28 + $0x2c] ss:$0 sps:$4 sm:$0x11]   ;;  %v8507_v48 = vld [vmem:[%s11526_s1 + $0x60] sm:$0xff]   ;;  %v1166_v50 = vrot.slane %v8530_v46, 1  ;;  %v8946_v54 = vld [vmem:[%s11526_s1 + $0xd0] sm:$0xff]  }
  0x1b   : > { %v8922_v45 = vsel %vm1156_vm0, %v1163_v42, %v1164_v43  ;;  %v8934_v49 = vld [vmem:[%s11526_s1 + $0xc8] sm:$0xff]   ;;  %v1167_v52 = vrot.slane %v8531_v47, 1  ;;  %v8523_v56 = vld [vmem:[%s8870_s28 + $0x14] ss:$0 sps:$4 sm:$0x11]   ;;  %v671_v57 = vshll.u32 %v8522_v51, 16 }
  0x1c   : > { %1510 = vmatpush1.bf16.msra.mxu0 %v8493_v5  ;;  %v667_v34 = vsel %vm655_vm1, %v662_v32, %v666_v30  ;;  %v8509_v55 = vld [vmem:[%s11526_s1 + $0x68] sm:$0xff]   ;;  %v8538_v58 = vld [vmem:[%s8870_s28 + $0x30] sm:$0xfe]   ;;  %v8539_v59 = vld [vmem:[%s8870_s28 + $0x38] ss:$0 sps:$4 sm:$0x11]  }
  0x1d   : > { %1511 = vmatprep.subr.bf16.mxu0 %v8768_v1  ;;  %7979 = vmatpush3.bf16.msra.mxu1 %v8504_v9  ;;  %v8941_v53 = vsel %vm1156_vm0, %v1166_v50, %v1167_v52  ;;  %v8961_v60 = vld [vmem:[%s11526_s1 + $0xd8] sm:$0xff]   ;;  %v1169_v61 = vrot.slane %v8538_v58, 1  ;;  %v8511_v62 = vld [vmem:[%s11526_s1 + $0x70] sm:$0xff]   ;;  %v669_v63 = vshrl.u32 %v8522_v51, 16  ;;  %v673_v0 = vrot.slane %v671_v57, 1  ;;  %v8980_v9 = vld [vmem:[%s11526_s1 + $0xe0] sm:$0xff]  }
  0x1e   : > { %7980 = vmatprep.subr.bf16.mxu1 %v8506_v11  ;;  %1535 = vmatprep.mubr.bf16.mxu0 %v667_v34  ;;  %v1170_v2 = vrot.slane %v8539_v59, 1  ;;  %v676_v3 = vshll.u32 %v8523_v56, 16  ;;  %v8528_v4 = vld [vmem:[%s8870_s28 + $0x18] sm:$0xff]   ;;  %v8529_v7 = vld [vmem:[%s8870_s28 + $0x20] ss:$0 sps:$4 sm:$0x11]  }
  0x1f   : > { %v8542_v6 = vld [vmem:[%s8870_s28 + $0x3c] sm:$0xfe]   ;;  %v683_v15 = vshll.u32 %v8528_v4, 16  ;;  %v8535_v19 = vld [vmem:[%s8870_s28 + $0x2c] ss:$0 sps:$4 sm:$0x11]  }
  0x20   : > { %1512 = vmatpush1.bf16.msra.mxu0 %v8494_v8  ;;  %v8971_v5 = vsel %vm1156_vm0, %v1169_v61, %v1170_v2  ;;  %v8543_v8 = vld [vmem:[%s8870_s28 + $0x44] ss:$0 sps:$4 sm:$0x11]   ;;  %v8998_v20 = vld [vmem:[%s11526_s1 + $0xe8] sm:$0xff]   ;;  %v688_v21 = vshll.u32 %v8529_v7, 16  ;;  %v9009_v27 = vld [vmem:[%s8870_s28 + $0x30] sm:$0xff]  }
  0x21   : > { %1513 = vmatprep.subr.bf16.mxu0 %v8768_v1  ;;  %7981 = vmatpush3.bf16.msra.mxu1 %v8506_v11  ;;  %v8513_v11 = vld [vmem:[%s11526_s1 + $0x78] sm:$0xff]   ;;  %v8520_v16 = vld [vmem:[%s8870_s28] sm:$0xff]   ;;  %v8549_v23 = vld [vmem:[%s8870_s28 + $0x48] sm:$0xfe]   ;;  %v685_v25 = vrot.slane %v683_v15, 1  ;;  %v700_v34 = vshll.u32 %v8535_v19, 16 }
  0x22   : > { %7982 = vmatprep.subr.bf16.mxu1 %v8508_v13  ;;  %v8534_v22 = vld [vmem:[%s8870_s28 + $0x24] sm:$0xff]   ;;  %v8550_v26 = vld [vmem:[%s8870_s28 + $0x50] ss:$0 sps:$4 sm:$0x11]   ;;  %v1175_v28 = vrot.slane %v8549_v23, 1  ;;  %v707_v36 = vshll.u32 %v9009_v27, 16 }
  0x23   : > { %v1176_v29 = vrot.slane %v8550_v26, 1  ;;  %v695_v30 = vshll.u32 %v8534_v22, 16  ;;  %v8555_v38 = vld [vmem:[%s8870_s28 + $0x5c] ss:$0 sps:$4 sm:$0x11]   ;;  %v693_v39 = vshrl.u32 %v8534_v22, 16 }
  0x24   : > { %1514 = vmatpush1.bf16.msra.mxu0 %v8495_v10  ;;  %v1172_v10 = vrot.slane %v8542_v6, 1  ;;  %v1179_v43 = vrot.slane %v8555_v38, 1  ;;  %v702_v46 = vrot.slane %v700_v34, 1  ;;  %v8541_v47 = vld [vmem:[%s8870_s28 + $0x38] ss:$0 sps:$4 sm:$0x11]  }
  0x25   : > { %1515 = vmatprep.subr.bf16.mxu0 %v8768_v1  ;;  %7983 = vmatpush3.bf16.msra.mxu1 %v8508_v13  ;;  %v674_v13 = vor.u32 %v673_v0, %v669_v63  ;;  %v9018_v35 = vsel %vm1156_vm0, %v1175_v28, %v1176_v29  ;;  %v709_v50 = vrot.slane %v707_v36, 1  ;;  %v8559_v51 = vld [vmem:[%s8870_s28 + $0x60] sm:$0xfe]   ;;  %v8560_v52 = vld [vmem:[%s8870_s28 + $0x68] ss:$0 sps:$4 sm:$0x11]  }
  0x26   : > { %7984 = vmatprep.subr.bf16.mxu1 %v8510_v18  ;;  %v8532_v56 = vld [vmem:[%s8870_s28 + $0x18] sm:$0xff]   ;;  %v1181_v59 = vrot.slane %v8559_v51, 1  ;;  %v712_v61 = vshll.u32 %v8541_v47, 16  ;;  %v1182_v63 = vrot.slane %v8560_v52, 1  ;;  %v8563_v0 = vld [vmem:[%s8870_s28 + $0x6c] sm:$0xfe]  }
  0x27   : > { %v8546_v58 = vld [vmem:[%s8870_s28 + $0x3c] sm:$0xff]   ;;  %v8564_v2 = vld [vmem:[%s8870_s28 + $0x74] ss:$0 sps:$4 sm:$0x11]   ;;  %v1184_v7 = vrot.slane %v8563_v0, 1  ;;  %v8552_v19 = vld [vmem:[%s8870_s28 + $0x48] sm:$0xff]  }
  0x28   : > { %1516 = vmatpush1.bf16.msra.mxu0 %v8496_v12  ;;  %v1173_v12 = vrot.slane %v8543_v8, 1  ;;  %v719_v6 = vshll.u32 %v8546_v58, 16  ;;  %v714_v8 = vrot.slane %v712_v61, 1  ;;  %v8571_v23 = vld [vmem:[%s8870_s28 + $0x84] sm:$0xfe]   ;;  %v8548_v0 = vld [vmem:[%s8870_s28 + $0x3c] sm:$0xff]  }
  0x29   : > { %1517 = vmatprep.subr.bf16.mxu0 %v8768_v1  ;;  %7985 = vmatpush3.bf16.msra.mxu1 %v8510_v18  ;;  %v681_v18 = vshrl.u32 %v8528_v4, 16  ;;  %v8574_v26 = vld [vmem:[%s11526_s1 + $0x108] sm:$0xff]   ;;  %v8577_v38 = vld [vmem:[%s8870_s28 + $0x90] sm:$0xfe]   ;;  %v8580_v52 = vld [vmem:[%s8870_s28 + $0x9c] sm:$0xfe]  }
  0x2a   : > { %7986 = vmatprep.subr.bf16.mxu1 %v8512_v31  ;;  %v8990_v17 = vsel %vm1156_vm0, %v1172_v10, %v1173_v12  ;;  %v717_v10 = vshrl.u32 %v8546_v58, 16  ;;  %v1193_v47 = vrot.slane %v8577_v38, 1  ;;  %v8558_v51 = vld [vmem:[%s8870_s28 + $0x5c] ss:$0 sps:$4 sm:$0x11]  }
  0x2b   : > { %v686_v32 = vor.u32 %v685_v25, %v681_v18  ;;  %v8569_v18 = vld [vmem:[%s8870_s28 + $0x80] ss:$0 sps:$4 sm:$0x11]   ;;  %v8572_v25 = vld [vmem:[%s8870_s28 + $0x8c] ss:$0 sps:$4 sm:$0x11]  }
  0x2c   : > { %1518 = vmatpush1.bf16.msra.mxu0 %v8497_v14  ;;  %v678_v14 = vrot.slane %v676_v3, 1  ;;  %v8565_v3 = vld [vmem:[%s11526_s1 + $0xf8] sm:$0xff]   ;;  %v1188_v22 = vrot.slane %v8569_v18, 1  ;;  %v1191_v29 = vrot.slane %v8572_v25, 1  ;;  %v8592_v18 = vld [vmem:[%s11526_s1 + $0x128] sm:$0xff]  }
  0x2d   : > { %1519 = vmatprep.subr.bf16.mxu0 %v8768_v1  ;;  %7987 = vmatpush3.bf16.msra.mxu1 %v8512_v31  ;;  %v8524_v31 = vld [vmem:[%s8870_s28 + $0xc] sm:$0xff]   ;;  %vm6062_vm12 = vsmask.f32 3328  ;;  %vm6063_vm13 = vsmask.f32 7440 }
  0x2e   : > { %8272 = vmatprep.subr.bf16.mxu1 %v8768_v1  ;;  %vm11120_vm14 = vmor %vm6062_vm12, %vm6063_vm13 }
  0x30   : > { %1520 = vmatpush1.bf16.msra.mxu0 %v8499_v24  ;;  %7989 = vmatmul.mubr.bf16.vlgmr.msra.gmra.mrb[0].mxu1 %v8909_v40  ;;  %v9005_v24 = vsel %vm655_vm1, %v674_v13, %v678_v14  ;;  %v8568_v13 = vld [vmem:[%s8870_s28 + $0x78] sm:$0xfe]   ;;  %v8536_v14 = vld [vmem:[%s8870_s28 + $0x24] sm:$0xff]  }
  0x31   : > { %1521 = vmatprep.subr.bf16.mxu0 %v8768_v1  ;;  %7992 = vmatprep.mubr.bf16.mxu1 %v8922_v45 }
  0x32   : > { %8288 = vmatpush1.bf16.msra.mxu1 %v8914_v41 }
  0x33   : > { %8273 = vmatprep.subr.bf16.mxu1 %v8768_v1 }
  0x34   : > { %1522 = vmatpush1.bf16.msra.mxu0 %v8501_v33  ;;  %v690_v33 = vrot.slane %v688_v21, 1  ;;  %v1187_v21 = vrot.slane %v8568_v13, 1 }
  0x35   : > { %1523 = vmatprep.subr.bf16.mxu0 %v8768_v1 }
  0x36   : > { %8289 = vmatpush1.bf16.msra.mxu1 %v8934_v49  ;;  %v9087_v28 = vsel %vm1156_vm0, %v1187_v21, %v1188_v22 }
  0x37   : > { %8274 = vmatprep.subr.bf16.mxu1 %v8768_v1 }
  0x38   : > { %1524 = vmatpush1.bf16.msra.mxu0 %v8503_v37  ;;  %7993 = vmatmul.mubr.bf16.gmra.mrb[4].mxu1 %v8941_v53  ;;  %v8554_v37 = vld [vmem:[%s8870_s28 + $0x54] sm:$0xfe]  }
  0x39   : > { %1525 = vmatprep.subr.bf16.mxu0 %v8768_v1  ;;  %7996 = vmatprep.mubr.bf16.mxu1 %v8971_v5  ;;  %v1178_v42 = vrot.slane %v8554_v37, 1  ;;  %v8557_v37 = vld [vmem:[%s8870_s28 + $0x54] sm:$0xff]  }
  0x3a   : > { %8290 = vmatpush1.bf16.msra.mxu1 %v8946_v54  ;;  %v743_v58 = vshll.u32 %v8557_v37, 16 }
  0x3b   : > { %8275 = vmatprep.subr.bf16.mxu1 %v8768_v1 }
  0x3c   : > { %1526 = vmatpush1.bf16.msra.mxu0 %v8505_v44  ;;  %v9026_v44 = vsel %vm655_vm1, %v686_v32, %v690_v33  ;;  %v8544_v33 = vld [vmem:[%s8870_s28 + $0x30] sm:$0xff]  }
  0x3d   : > { %1527 = vmatprep.subr.bf16.mxu0 %v8768_v1 }
  0x3e   : > { %8291 = vmatpush1.bf16.msra.mxu1 %v8961_v60 }
  0x3f   : > { %8276 = vmatprep.subr.bf16.mxu1 %v8768_v1 }
  0x40   : > { %1528 = vmatpush1.bf16.msra.mxu0 %v8507_v48  ;;  %7997 = vmatmul.mubr.bf16.gmra.mrb[8].mxu1 %v8990_v17  ;;  %v9031_v48 = vsel %vm1156_vm0, %v1178_v42, %v1179_v43  ;;  %v8582_v42 = vld [vmem:[%s11526_s1 + $0x110] sm:$0xff]  }
  0x41   : > { %1529 = vmatprep.subr.bf16.mxu0 %v8768_v1  ;;  %8000 = vmatprep.mubr.bf16.mxu1 %v9018_v35 }
  0x42   : > { %8292 = vmatpush1.bf16.msra.mxu1 %v8980_v9 }
  0x43   : > { %8277 = vmatprep.subr.bf16.mxu1 %v8768_v1 }
  0x44   : > { %1530 = vmatpush1.bf16.msra.mxu0 %v8509_v55  ;;  %v8561_v55 = vld [vmem:[%s11526_s1 + $0xf0] sm:$0xff]  }
  0x45   : > { %1531 = vmatprep.subr.bf16.mxu0 %v8768_v1 }
  0x46   : > { %8293 = vmatpush1.bf16.msra.mxu1 %v8998_v20 }
  0x47   : > { %8278 = vmatprep.subr.bf16.mxu1 %v8768_v1 }
  0x48   : > { %1532 = vmatpush1.bf16.msra.mxu0 %v8511_v62  ;;  %8001 = vmatmul.mubr.bf16.gmra.mrb[12].mxu1 %v9031_v48  ;;  %v8547_v62 = vld [vmem:[%s8870_s28 + $0x44] ss:$0 sps:$4 sm:$0x11]  }
  0x49   : > { %1533 = vmatprep.subr.bf16.mxu0 %v8768_v1 }
  0x4a   : > { %8294 = vmatpush1.bf16.msra.mxu1 %v8561_v55 }
  0x4b   : > { %8279 = vmatprep.subr.bf16.mxu1 %v8768_v1 }
  0x4c   : > { %1534 = vmatpush1.bf16.msra.mxu0 %v8513_v11  ;;  %v724_v11 = vshll.u32 %v8547_v62, 16 }
  0x4d   : > { %2141 = vmatprep.subr.bf16.mxu0 %v8768_v1 }
  0x4e   : > { %8295 = vmatpush1.bf16.msra.mxu1 %v8565_v3  ;;  %v726_v36 = vrot.slane %v724_v11, 1  ;;  %v8587_v11 = vld [vmem:[%s8870_s28 + $0xb0] ss:$0 sps:$4 sm:$0x11]  }
  0x4f   : > { %1536 = vmatmul.mubr.bf16.vlgmr.msra.gmra.mrb[0].mxu0 %v8520_v16  ;;  %8280 = vmatprep.subr.bf16.mxu1 %v8768_v1  ;;  %v721_v16 = vrot.slane %v719_v6, 1  ;;  %v8591_v6 = vld [vmem:[%s11526_s1 + $0x120] sm:$0xff]  }
  0x50   : > { %2142 = vmatpush1.bf16.msra.mxu0 %v8914_v41  ;;  %1543 = vmatprep.mubr.bf16.mxu0 %v9005_v24  ;;  %v697_v41 = vrot.slane %v695_v30, 1  ;;  %v8553_v30 = vld [vmem:[%s8870_s28 + $0x50] ss:$0 sps:$4 sm:$0x11]  }
  0x51   : > { %2143 = vmatprep.subr.bf16.mxu0 %v8768_v1  ;;  %v722_v34 = vor.u32 %v721_v16, %v717_v10  ;;  %v8586_v10 = vld [vmem:[%s8870_s28 + $0xa8] sm:$0xfe]   ;;  %v1200_v16 = vrot.slane %v8587_v11, 1  ;;  %v8585_v11 = vld [vmem:[%s8870_s28 + $0x80] ss:$0 sps:$4 sm:$0x11]  }
  0x52   : > { %v698_v57 = vor.u32 %v697_v41, %v693_v39  ;;  %v8578_v39 = vld [vmem:[%s8870_s28 + $0x98] ss:$0 sps:$4 sm:$0x11]   ;;  %v729_v41 = vshrl.u32 %v8552_v19, 16 }
  0x54   : > { %2144 = vmatpush1.bf16.msra.mxu0 %v8934_v49  ;;  %v705_v49 = vshrl.u32 %v9009_v27, 16  ;;  %v9057_v4 = vsel %vm655_vm1, %v698_v57, %v702_v46  ;;  %v736_v46 = vshll.u32 %v8553_v30, 16  ;;  %v8583_v57 = vld [vmem:[%s11526_s1 + $0x118] sm:$0xff]  }
  0x55   : > { %2145 = vmatprep.subr.bf16.mxu0 %v8768_v1 }
  0x56   : > { %v710_v15 = vor.u32 %v709_v50, %v705_v49  ;;  %v1194_v49 = vrot.slane %v8578_v39, 1  ;;  %v9107_v50 = vsel %vm655_vm1, %v722_v34, %v726_v36  ;;  %v9154_v34 = vld [vmem:[#allocation3 + $0x8] sm:$0xff]  ;;  %v8600_v36 = vld [vmem:[%s11526_s1 + $0x130] sm:$0xff]   ;;  %v8595_v39 = vld [vmem:[%s8870_s28 + $0xc0] sm:$0xfe]  }
  0x57   : > { %1544 = vmatmul.mubr.bf16.gmra.mrb[4].mxu0 %v8524_v31  ;;  %v731_v31 = vshll.u32 %v8552_v19, 16  ;;  %v8589_v19 = vld [vmem:[%s8870_s28 + $0xb4] sm:$0xfe]  }
  0x58   : > { %1551 = vmatprep.mubr.bf16.mxu0 %v9026_v44  ;;  %2146 = vmatpush1.bf16.msra.mxu0 %v8946_v54  ;;  %v9050_v54 = vsel %vm1156_vm0, %v1181_v59, %v1182_v63  ;;  %v9083_v27 = vsel %vm655_vm1, %v710_v15, %v714_v8  ;;  %v1196_v59 = vrot.slane %v8580_v52, 1  ;;  %v738_v63 = vrot.slane %v736_v46, 1  ;;  %v8566_v8 = vld [vmem:[%s8870_s28 + $0x60] sm:$0xff]  }
  0x59   : > { %2147 = vmatprep.subr.bf16.mxu0 %v8768_v1  ;;  %8004 = vmatprep.mubr.bf16.mxu1 %v9050_v54  ;;  %v733_v43 = vrot.slane %v731_v31, 1  ;;  %v1199_v15 = vrot.slane %v8586_v10, 1  ;;  %v755_v25 = vshll.u32 %v8566_v8, 16  ;;  %v753_v30 = vshrl.u32 %v8566_v8, 16 }
  0x5a   : > { %v1205_v46 = vrot.slane %v8595_v39, 1 }
  0x5b   : > { %v734_v62 = vor.u32 %v733_v43, %v729_v41  ;;  %v9147_v22 = vsel %vm1156_vm0, %v1199_v15, %v1200_v16  ;;  %v757_v38 = vrot.slane %v755_v25, 1  ;;  %v8596_v41 = vld [vmem:[%s8870_s28 + $0xc8] ss:$0 sps:$4 sm:$0x11]   ;;  %v9199_v15 = vld [vmem:[%s8870_s28 + $0x60] sm:$0xff]  }
  0x5c   : > { %2148 = vmatpush1.bf16.msra.mxu0 %v8961_v60  ;;  %v1185_v60 = vrot.slane %v8564_v2, 1  ;;  %v741_v2 = vshrl.u32 %v8557_v37, 16  ;;  %v8608_v16 = vld [vmem:[%s11526_s1 + $0x180] sm:$0xff]   ;;  %v8594_v25 = vld [vmem:[%s8870_s28 + $0x8c] ss:$0 sps:$4 sm:$0x11]  }
  0x5d   : > { %2149 = vmatprep.subr.bf16.mxu0 %v8768_v1  ;;  %v9136_v13 = vsel %vm655_vm1, %v734_v62, %v738_v63  ;;  %v758_v52 = vor.u32 %v757_v38, %v753_v30 }
  0x5e   : > { %v9065_v12 = vsel %vm1156_vm0, %v1184_v7, %v1185_v60  ;;  %v745_v7 = vrot.slane %v743_v58, 1  ;;  %v748_v60 = vshll.u32 %v8558_v51, 16  ;;  %v8598_v51 = vld [vmem:[%s8870_s28 + $0xcc] sm:$0xfe]  }
  0x5f   : > { %1552 = vmatmul.mubr.bf16.gmra.mrb[8].mxu0 %v8532_v56  ;;  %8005 = vmatmul.mubr.bf16.gmra.mrb[16].mxu1 %v9065_v12  ;;  %v8581_v56 = vld [vmem:[%s8870_s28 + $0xa4] ss:$0 sps:$4 sm:$0x11]   ;;  %v8599_v58 = vld [vmem:[%s8870_s28 + $0xd4] ss:$0 sps:$4 sm:$0x11]  }
  0x60   : > { %1559 = vmatprep.mubr.bf16.mxu0 %v9057_v4  ;;  %2150 = vmatpush1.bf16.msra.mxu0 %v8980_v9  ;;  %v8573_v9 = vld [vmem:[%s11526_s1 + $0x100] sm:$0xff]   ;;  %v1197_v61 = vrot.slane %v8581_v56, 1  ;;  %v750_v21 = vrot.slane %v748_v60, 1  ;;  %v1209_v62 = vrot.slane %v8599_v58, 1 }
  0x61   : > { %2151 = vmatprep.subr.bf16.mxu0 %v8768_v1  ;;  %8296 = vmatpush1.bf16.msra.mxu1 %v8573_v9  ;;  %v9242_v58 = vld [vmem:[%s11526_s1 + $0x140] sm:$0xff]  }
  0x62   : > { %8008 = vmatprep.mubr.bf16.mxu1 %v9087_v28  ;;  %8281 = vmatprep.subr.bf16.mxu1 %v8768_v1 }
  0x64   : > { %2152 = vmatpush1.bf16.msra.mxu0 %v8998_v20  ;;  %v1190_v20 = vrot.slane %v8571_v23, 1  ;;  %v746_v23 = vor.u32 %v745_v7, %v741_v2 }
  0x65   : > { %2153 = vmatprep.subr.bf16.mxu0 %v8768_v1  ;;  %8297 = vmatpush1.bf16.msra.mxu1 %v8574_v26 }
  0x66   : > { %v9094_v32 = vsel %vm1156_vm0, %v1190_v20, %v1191_v29  ;;  %8282 = vmatprep.subr.bf16.mxu1 %v8768_v1  ;;  %v8556_v20 = vld [vmem:[%s8870_s28 + $0x48] sm:$0xff]  }
  0x67   : > { %1560 = vmatmul.mubr.bf16.gmra.mrb[12].mxu0 %v8536_v14  ;;  %8009 = vmatmul.mubr.bf16.gmra.mrb[20].mxu1 %v9094_v32  ;;  %v8567_v14 = vld [vmem:[%s8870_s28 + $0x68] ss:$0 sps:$4 sm:$0x11]  }
  0x68   : > { %1567 = vmatprep.mubr.bf16.mxu0 %v9083_v27  ;;  %2154 = vmatpush1.bf16.msra.mxu0 %v8561_v55  ;;  %v9113_v55 = vsel %vm1156_vm0, %v1193_v47, %v1194_v49  ;;  %v760_v31 = vshll.u32 %v8567_v14, 16  ;;  %v1206_v47 = vrot.slane %v8596_v41, 1  ;;  %v8601_v49 = vld [vmem:[%s11526_s1 + $0x138] sm:$0xff]  }
  0x69   : > { %2155 = vmatprep.subr.bf16.mxu0 %v8768_v1  ;;  %8298 = vmatpush1.bf16.msra.mxu1 %v8582_v42 }
  0x6a   : > { %8012 = vmatprep.mubr.bf16.mxu1 %v9113_v55  ;;  %8283 = vmatprep.subr.bf16.mxu1 %v8768_v1  ;;  %v762_v56 = vrot.slane %v760_v31, 1  ;;  %v9217_v31 = vld [vmem:[%s8870_s28 + $0x6c] sm:$0xff]  }
  0x6c   : > { %2156 = vmatpush1.bf16.msra.mxu0 %v8565_v3  ;;  %v9125_v3 = vsel %vm1156_vm0, %v1196_v59, %v1197_v61  ;;  %v1208_v59 = vrot.slane %v8598_v51, 1  ;;  %v8562_v61 = vld [vmem:[%s8870_s28 + $0x54] sm:$0xff]   ;;  %v9187_v7 = vsel %vm655_vm1, %v758_v52, %v762_v56 }
  0x6d   : > { %2157 = vmatprep.subr.bf16.mxu0 %v8768_v1  ;;  %8299 = vmatpush1.bf16.msra.mxu1 %v8583_v57  ;;  %v8603_v51 = vld [vmem:[%s8870_s28 + $0x98] ss:$0 sps:$4 sm:$0x11]  }
  0x6e   : > { %8284 = vmatprep.subr.bf16.mxu1 %v8768_v1  ;;  %v9190_v60 = vsel %vm1156_vm0, %v1208_v59, %v1209_v62  ;;  %v9237_v52 = vld [vmem:[%s8870_s28 + $0x78] sm:$0xff]  }
  0x6f   : > { %1568 = vmatmul.mubr.bf16.gmra.mrb[16].mxu0 %v8544_v33  ;;  %8013 = vmatmul.mubr.bf16.gmra.mrb[24].mxu1 %v9125_v3  ;;  %v8575_v33 = vld [vmem:[%s8870_s28 + $0x6c] sm:$0xff]  }
  0x70   : > { %1575 = vmatprep.mubr.bf16.mxu0 %v9107_v50  ;;  %2158 = vmatpush1.bf16.msra.mxu0 %v8573_v9  ;;  %v8590_v9 = vld [vmem:[%s8870_s28 + $0xbc] ss:$0 sps:$4 sm:$0x11]   ;;  %v767_v43 = vshll.u32 %v8575_v33, 16  ;;  %v765_v63 = vshrl.u32 %v8575_v33, 16  ;;  %v8602_v33 = vld [vmem:[%s8870_s28 + $0x90] sm:$0xff]  }
  0x71   : > { %2159 = vmatprep.subr.bf16.mxu0 %v8768_v1  ;;  %8300 = vmatpush1.bf16.msra.mxu1 %v8591_v6  ;;  %v1203_v29 = vrot.slane %v8590_v9, 1  ;;  %v784_v9 = vshll.u32 %v8585_v11, 16  ;;  %v801_v56 = vshrl.u32 %v8602_v33, 16 }
  0x72   : > { %8285 = vmatprep.subr.bf16.mxu1 %v8768_v1  ;;  %8016 = vmatprep.mubr.bf16.mxu1 %v9147_v22 }
  0x74   : > { %2160 = vmatpush1.bf16.msra.mxu0 %v8574_v26  ;;  %v1202_v26 = vrot.slane %v8589_v19, 1 }
  0x75   : > { %2161 = vmatprep.subr.bf16.mxu0 %v8768_v1  ;;  %8301 = vmatpush1.bf16.msra.mxu1 %v8592_v18 }
  0x76   : > { %8286 = vmatprep.subr.bf16.mxu1 %v9154_v34  ;;  %v9161_v37 = vsel %vm1156_vm0, %v1202_v26, %v1203_v29  ;;  %v8612_v26 = vld [vmem:[%s11526_s1 + $0x188] sm:$0xff]   ;;  %v786_v29 = vrot.slane %v784_v9, 1  ;;  %v8627_v9 = vld [vmem:[%s11526_s1 + $0x1b0] sm:$0xff]  }
  0x77   : > { %1576 = vmatmul.mubr.bf16.gmra.mrb[20].mxu0 %v8548_v0  ;;  %8017 = vmatmul.mubr.bf16.gmra.mrb[28].mxu1 %v9161_v37  ;;  %v769_v0 = vrot.slane %v767_v43, 1  ;;  %v803_v43 = vshll.u32 %v8602_v33, 16 }
  0x78   : > { %1583 = vmatprep.mubr.bf16.mxu0 %v9136_v13  ;;  %2162 = vmatpush1.bf16.msra.mxu0 %v8582_v42  ;;  %v8576_v42 = vld [vmem:[%s8870_s28 + $0x74] ss:$0 sps:$4 sm:$0x11]  }
  0x79   : > { %2163 = vmatprep.subr.bf16.mxu0 %v8768_v1  ;;  %v9164_v1 = vsel %vm655_vm1, %v746_v23, %v750_v21  ;;  %8302 = vmatpush1.bf16.msra.mxu1 %v8600_v36  ;;  %v772_v2 = vshll.u32 %v8576_v42, 16  ;;  %v770_v10 = vor.u32 %v769_v0, %v765_v63  ;;  %v8593_v23 = vld [vmem:[%s8870_s28 + $0x84] sm:$0xff]   ;;  %v796_v42 = vshll.u32 %v8594_v25, 16  ;;  %v8605_v0 = vld [vmem:[%s8870_s28 + $0x9c] sm:$0xff]  }
  0x7a   : > { %8287 = vmatprep.subr.bf16.mxu1 %v9154_v34  ;;  %v791_v30 = vshll.u32 %v8593_v23, 16  ;;  %v789_v39 = vshrl.u32 %v8593_v23, 16  ;;  %v805_v59 = vrot.slane %v803_v43, 1  ;;  %v808_v63 = vshll.u32 %v8603_v51, 16 }
  0x7b   : > { %v774_v8 = vrot.slane %v772_v2, 1  ;;  %v8606_v2 = vld [vmem:[%s8870_s28 + $0xa4] ss:$0 sps:$4 sm:$0x11]   ;;  %v815_v11 = vshll.u32 %v8605_v0, 16 }
  0x7c   : > { %2164 = vmatpush1.bf16.msra.mxu0 %v8583_v57  ;;  %v9178_v57 = vsel %vm1156_vm0, %v1205_v46, %v1206_v47  ;;  %v793_v41 = vrot.slane %v791_v30, 1  ;;  %v8617_v46 = vld [vmem:[%s11526_s1 + $0x198] sm:$0xff]  }
  0x7d   : > { %2165 = vmatprep.subr.bf16.mxu0 %v9154_v34  ;;  %8020 = vmatprep.mubr.bf16.mxu1 %v9178_v57  ;;  %v817_v25 = vrot.slane %v815_v11, 1  ;;  %v8629_v30 = vld [vmem:[%s11526_s1 + $0x1b8] sm:$0xff]  }
  0x7e   : > { %8303 = vmatpush1.bf16.msra.mxu1 %v8601_v49  ;;  %v794_v47 = vor.u32 %v793_v41, %v789_v39  ;;  %v8613_v39 = vld [vmem:[%s8870_s28 + $0xb4] sm:$0xff]   ;;  %v8619_v41 = vld [vmem:[%s8870_s28 + $0xc8] ss:$0 sps:$4 sm:$0x11]   ;;  %v9305_v11 = vld [vmem:[%s8870_s28 + $0x9c] sm:$0xff]  }
  0x7f   : > { %1584 = vmatmul.mubr.bf16.gmra.mrb[24].mxu0 %v8556_v20  ;;  %2851 = vmatprep.subr.bf16.mxu1 %v9154_v34 }
  0x80   : > { %1591 = vmatprep.mubr.bf16.mxu0 %v9164_v1  ;;  %2166 = vmatpush1.bf16.msra.mxu0 %v8591_v6  ;;  %v8584_v6 = vld [vmem:[%s8870_s28 + $0x78] sm:$0xff]  }
  0x81   : > { %2167 = vmatprep.subr.bf16.mxu0 %v9154_v34  ;;  %8021 = vmatmul.mubr.bf16.gmra.mrb[32].mxu1 %v9190_v60  ;;  %v779_v14 = vshll.u32 %v8584_v6, 16  ;;  %v777_v19 = vshrl.u32 %v8584_v6, 16  ;;  %v8625_v6 = vld [vmem:[%s11526_s1 + $0x1a8] sm:$0xff]  }
  0x82   : > { %2221 = vmatprep.mubr.bf16.mxu1 %v9164_v1 }
  0x83   : > { %v781_v21 = vrot.slane %v779_v14, 1  ;;  %v9263_v14 = vld [vmem:[%s8870_s28 + $0x84] sm:$0xff]  }
  0x84   : > { %2168 = vmatpush1.bf16.msra.mxu0 %v8592_v18  ;;  %v9205_v18 = vsel %vm655_vm1, %v770_v10, %v774_v8  ;;  %v806_v8 = vor.u32 %v805_v59, %v801_v56  ;;  %v810_v10 = vrot.slane %v808_v63, 1  ;;  %v839_v59 = vshll.u32 %v8613_v39, 16 }
  0x85   : > { %2169 = vmatprep.subr.bf16.mxu0 %v9154_v34  ;;  %v782_v20 = vor.u32 %v781_v21, %v777_v19  ;;  %v820_v19 = vshll.u32 %v8606_v2, 16  ;;  %v8610_v21 = vld [vmem:[%s8870_s28 + $0xb0] ss:$0 sps:$4 sm:$0x11]   ;;  %v856_v2 = vshll.u32 %v8619_v41, 16  ;;  %v8636_v41 = vld [vmem:[%s11526_s1 + $0x1d8] sm:$0xff]  }
  0x86   : > { %v9270_v23 = vsel %vm655_vm1, %v806_v8, %v810_v10  ;;  %v832_v43 = vshll.u32 %v8610_v21, 16  ;;  %v837_v8 = vshrl.u32 %v8613_v39, 16  ;;  %v8633_v10 = vld [vmem:[%s11526_s1 + $0x1c8] sm:$0xff]  }
  0x87   : > { %1592 = vmatmul.mubr.bf16.gmra.mrb[28].mxu0 %v8562_v61  ;;  %v9224_v38 = vsel %vm655_vm1, %v782_v20, %v786_v29  ;;  %v822_v20 = vrot.slane %v820_v19, 1  ;;  %v8614_v29 = vld [vmem:[%s8870_s28 + $0xbc] ss:$0 sps:$4 sm:$0x11]   ;;  %v841_v19 = vrot.slane %v839_v59, 1  ;;  %v8622_v21 = vld [vmem:[%s8870_s28 + $0xcc] sm:$0xff]  }
  0x88   : > { %1599 = vmatprep.mubr.bf16.mxu0 %v9187_v7  ;;  %2170 = vmatpush1.bf16.msra.mxu0 %v8600_v36  ;;  %v8616_v36 = vld [vmem:[%s11526_s1 + $0x190] sm:$0xff]   ;;  %v844_v63 = vshll.u32 %v8614_v29, 16  ;;  %v861_v29 = vshrl.u32 %v8622_v21, 16 }
  0x89   : > { %2171 = vmatprep.subr.bf16.mxu0 %v9154_v34  ;;  %2222 = vmatmul.mubr.bf16.vlgmr.msra.gmra.mrb[36].mxu1 %v8562_v61  ;;  %v8621_v61 = vld [vmem:[%s11526_s1 + $0x1a0] sm:$0xff]  }
  0x8a   : > { %2229 = vmatprep.mubr.bf16.mxu1 %v9187_v7  ;;  %2852 = vmatpush1.bf16.msra.mxu1 %v8608_v16  ;;  %v813_v16 = vshrl.u32 %v8605_v0, 16 }
  0x8b   : > { %2853 = vmatprep.subr.bf16.mxu1 %v9154_v34 }
  0x8c   : > { %2172 = vmatpush1.bf16.msra.mxu0 %v8601_v49  ;;  %v798_v49 = vrot.slane %v796_v42, 1  ;;  %v818_v33 = vor.u32 %v817_v25, %v813_v16  ;;  %v9286_v42 = vld [vmem:[%s8870_s28 + $0x90] sm:$0xff]  }
  0x8d   : > { %8024 = vmatprep.subr.bf16.mxu0 %v9242_v58 }
  0x8e   : > { %2854 = vmatpush1.bf16.msra.mxu1 %v8612_v26  ;;  %v9248_v62 = vsel %vm655_vm1, %v794_v47, %v798_v49  ;;  %v8609_v26 = vld [vmem:[%s8870_s28 + $0xa8] sm:$0xff]   ;;  %v8631_v49 = vld [vmem:[%s11526_s1 + $0x1c0] sm:$0xff]   ;;  %v9293_v51 = vsel %vm655_vm1, %v818_v33, %v822_v20  ;;  %v858_v20 = vrot.slane %v856_v2, 1  ;;  %v9344_v2 = vld [vmem:[%s8870_s28 + $0xb4] sm:$0xff]  }
  0x8f   : > { %1600 = vmatmul.mubr.bf16.gmra.mrb[32].mxu0 %v9199_v15  ;;  %2855 = vmatprep.subr.bf16.mxu1 %v9154_v34  ;;  %v825_v47 = vshrl.u32 %v8609_v26, 16 }
  0x90   : > { %1607 = vmatprep.mubr.bf16.mxu0 %v9205_v18 }
  0x91   : > { %2230 = vmatmul.mubr.bf16.gmra.mrb[40].mxu1 %v9199_v15 }
  0x92   : > { %2237 = vmatprep.mubr.bf16.mxu1 %v9205_v18  ;;  %2856 = vmatpush1.bf16.msra.mxu1 %v8616_v36  ;;  %v827_v36 = vshll.u32 %v8609_v26, 16 }
  0x93   : > { %2857 = vmatprep.subr.bf16.mxu1 %v9154_v34 }
  0x94   : > { %v829_v56 = vrot.slane %v827_v36, 1  ;;  %v863_v36 = vshll.u32 %v8622_v21, 16  ;;  %v8646_v21 = vld [vmem:[%s11526_s1 + $0x1f8] sm:$0xff]  }
  0x96   : > { %2858 = vmatpush1.bf16.msra.mxu1 %v8617_v46  ;;  %v8618_v46 = vld [vmem:[%s8870_s28 + $0xc0] sm:$0xff]   ;;  %v830_v16 = vor.u32 %v829_v56, %v825_v47  ;;  %v865_v56 = vrot.slane %v863_v36, 1 }
  0x97   : > { %1608 = vmatmul.mubr.bf16.gmra.mrb[36].mxu0 %v9217_v31  ;;  %2859 = vmatprep.subr.bf16.mxu1 %v9154_v34  ;;  %v851_v0 = vshll.u32 %v8618_v46, 16  ;;  %v849_v25 = vshrl.u32 %v8618_v46, 16  ;;  %v842_v46 = vor.u32 %v841_v19, %v837_v8  ;;  %v8638_v47 = vld [vmem:[%s11526_s1 + $0x1e0] sm:$0xff]   ;;  %v8644_v8 = vld [vmem:[%s11526_s1 + $0x1f0] sm:$0xff]  }
  0x98   : > { %1615 = vmatprep.mubr.bf16.mxu0 %v9224_v38 }
  0x99   : > { %2238 = vmatmul.mubr.bf16.gmra.mrb[44].mxu1 %v9217_v31  ;;  %v853_v26 = vrot.slane %v851_v0, 1  ;;  %v8642_v0 = vld [vmem:[%s8870_s28 + $0xe0] ss:$0 sps:$4 sm:$0x11]  }
  0x9a   : > { %2245 = vmatprep.mubr.bf16.mxu1 %v9224_v38  ;;  %2860 = vmatpush1.bf16.msra.mxu1 %v8621_v61  ;;  %v834_v61 = vrot.slane %v832_v43, 1  ;;  %v9324_v43 = vld [vmem:[%s8870_s28 + $0xa8] sm:$0xff]   ;;  %v880_v19 = vshll.u32 %v8642_v0, 16  ;;  %v8645_v0 = vld [vmem:[%s11526_s1 + $0x178] sm:$0xff]  }
  0x9b   : > { %2861 = vmatprep.subr.bf16.mxu1 %v9154_v34 }
  0x9c   : > { %v9313_v33 = vsel %vm655_vm1, %v830_v16, %v834_v61  ;;  %v8640_v61 = vld [vmem:[%s11526_s1 + $0x1e8] sm:$0xff]   ;;  %v882_v36 = vrot.slane %v880_v19, 1 }
  0x9e   : > { %2862 = vmatpush1.bf16.msra.mxu1 %v8625_v6  ;;  %v8623_v6 = vld [vmem:[%s8870_s28 + $0xd4] ss:$0 sps:$4 sm:$0x11]  }
  0x9f   : > { %1616 = vmatmul.mubr.bf16.gmra.mrb[40].mxu0 %v9237_v52  ;;  %2863 = vmatprep.subr.bf16.mxu1 %v9154_v34  ;;  %v868_v39 = vshll.u32 %v8623_v6, 16  ;;  %v854_v6 = vor.u32 %v853_v26, %v849_v25  ;;  %v9363_v25 = vld [vmem:[%s8870_s28 + $0xc0] sm:$0xff]  }
  0xa0   : > { %1623 = vmatprep.mubr.bf16.mxu0 %v9248_v62 }
  0xa1   : > { %2246 = vmatmul.mubr.bf16.gmra.mrb[48].mxu1 %v9237_v52  ;;  %v870_v59 = vrot.slane %v868_v39, 1  ;;  %v8628_v39 = vld [vmem:[%s11526_s1 + $0x148] sm:$0xff]  }
  0xa2   : > { %2253 = vmatprep.mubr.bf16.mxu1 %v9248_v62  ;;  %2864 = vmatpush1.bf16.msra.mxu1 %v8627_v9  ;;  %v846_v9 = vrot.slane %v844_v63, 1  ;;  %v8641_v63 = vld [vmem:[%s8870_s28 + $0xd8] sm:$0xff]  }
  0xa3   : > { %2865 = vmatprep.subr.bf16.mxu1 %v9154_v34  ;;  %v875_v16 = vshll.u32 %v8641_v63, 16  ;;  %v873_v26 = vshrl.u32 %v8641_v63, 16  ;;  %v8737_v63 = vld [vmem:[%s8870_s28 + $0x24] sm:$0xff]  }
  0xa6   : > { %2866 = vmatpush1.bf16.msra.mxu1 %v8629_v30  ;;  %v8635_v30 = vld [vmem:[%s11526_s1 + $0x1d0] sm:$0xff]  }
  0xa7   : > { %1624 = vmatmul.mubr.bf16.gmra.mrb[44].mxu0 %v9263_v14  ;;  %2867 = vmatprep.subr.bf16.mxu1 %v9154_v34 }
  0xa8   : > { %1631 = vmatprep.mubr.bf16.mxu0 %v9270_v23 }
  0xa9   : > { %2254 = vmatmul.mubr.bf16.gmra.mrb[52].mxu1 %v9263_v14 }
  0xaa   : > { %2261 = vmatprep.mubr.bf16.mxu1 %v9270_v23  ;;  %2868 = vmatpush1.bf16.msra.mxu1 %v8631_v49  ;;  %v9331_v49 = vsel %vm655_vm1, %v842_v46, %v846_v9  ;;  %v866_v9 = vor.u32 %v865_v56, %v861_v29  ;;  %v8735_v46 = vld [vmem:[%s8870_s28 + $0xc] sm:$0xff]   ;;  %v8632_v56 = vld [vmem:[%s11526_s1 + $0x158] sm:$0xff]  }
  0xab   : > { %2869 = vmatprep.subr.bf16.mxu1 %v9154_v34 }
  0xae   : > { %2870 = vmatpush1.bf16.msra.mxu1 %v8633_v10  ;;  %v9351_v10 = vsel %vm655_vm1, %v854_v6, %v858_v20  ;;  %v9366_v20 = vsel %vm655_vm1, %v866_v9, %v870_v59  ;;  %v8736_v59 = vld [vmem:[%s8870_s28 + $0x18] sm:$0xff]   ;;  %v8738_v6 = vld [vmem:[%s8870_s28 + $0x30] sm:$0xff]  }
  0xaf   : > { %1632 = vmatmul.mubr.bf16.gmra.mrb[48].mxu0 %v9286_v42  ;;  %2871 = vmatprep.subr.bf16.mxu1 %v9154_v34 }
  0xb0   : > { %1639 = vmatprep.mubr.bf16.mxu0 %v9293_v51 }
  0xb1   : > { %2262 = vmatmul.mubr.bf16.gmra.mrb[56].mxu1 %v9286_v42 }
  0xb2   : > { %2269 = vmatprep.mubr.bf16.mxu1 %v9293_v51  ;;  %2872 = vmatpush1.bf16.msra.mxu1 %v8635_v30  ;;  %v877_v30 = vrot.slane %v875_v16, 1  ;;  %v8740_v16 = vld [vmem:[%s8870_s28 + $0x48] sm:$0xff]  }
  0xb3   : > { %2873 = vmatprep.subr.bf16.mxu1 %v9154_v34 }
  0xb4   : > { %v878_v29 = vor.u32 %v877_v30, %v873_v26  ;;  %v8650_v30 = vld [vmem:[%s11526_s1 + $0x218] sm:$0xff]  }
  0xb6   : > { %2874 = vmatpush1.bf16.msra.mxu1 %v8636_v41  ;;  %v9383_v41 = vsel %vm655_vm1, %v878_v29, %v882_v36  ;;  %v8741_v29 = vld [vmem:[%s8870_s28 + $0x54] sm:$0xff]  }
  0xb7   : > { %1640 = vmatmul.mubr.bf16.gmra.mrb[52].mxu0 %v9305_v11  ;;  %2875 = vmatprep.subr.bf16.mxu1 %v9154_v34 }
  0xb8   : > { %1647 = vmatprep.mubr.bf16.mxu0 %v9313_v33 }
  0xb9   : > { %2270 = vmatmul.mubr.bf16.gmra.mrb[60].mxu1 %v9305_v11 }
  0xba   : > { %2277 = vmatprep.mubr.bf16.mxu1 %v9313_v33  ;;  %2876 = vmatpush1.bf16.msra.mxu1 %v8638_v47  ;;  %v8630_v47 = vld [vmem:[%s11526_s1 + $0x150] sm:$0xff]  }
  0xbb   : > { %2877 = vmatprep.subr.bf16.mxu1 %v9154_v34 }
  0xbe   : > { %2878 = vmatpush1.bf16.msra.mxu1 %v8640_v61  ;;  %v8637_v61 = vld [vmem:[%s11526_s1 + $0x168] sm:$0xff]  }
  0xbf   : > { %1648 = vmatmul.mubr.bf16.gmra.mrb[56].mxu0 %v9324_v43  ;;  %2879 = vmatprep.subr.bf16.mxu1 %v9154_v34 }
  0xc0   : > { %1655 = vmatprep.mubr.bf16.mxu0 %v9331_v49 }
  0xc1   : > { %2278 = vmatmul.mubr.bf16.gmra.mrb[64].mxu1 %v9324_v43 }
  0xc2   : > { %2285 = vmatprep.mubr.bf16.mxu1 %v9331_v49  ;;  %2880 = vmatpush1.bf16.msra.mxu1 %v8644_v8  ;;  %v8739_v8 = vld [vmem:[%s8870_s28 + $0x3c] sm:$0xff]  }
  0xc3   : > { %2881 = vmatprep.subr.bf16.mxu1 %v9154_v34  ;;  %v9373_v34 = vld [vmem:[%s8870_s28 + $0xcc] sm:$0xff]  }
  0xc6   : > { %2882 = vmatpush1.bf16.msra.mxu1 %v8646_v21  ;;  %v8648_v21 = vld [vmem:[%s11526_s1 + $0x208] sm:$0xff]  }
  0xc7   : > { %1656 = vmatmul.mubr.bf16.gmra.mrb[60].mxu0 %v9344_v2 }
  0xc8   : > { %1663 = vmatprep.mubr.bf16.mxu0 %v9351_v10 }
  0xc9   : > { %2286 = vmatmul.mubr.bf16.gmra.mrb[68].mxu1 %v9344_v2 }
  0xca   : > { %2293 = vmatprep.mubr.bf16.mxu1 %v9351_v10 }
  0xcf   : > { %1664 = vmatmul.mubr.bf16.gmra.mrb[64].mxu0 %v9363_v25 }
  0xd0   : > { %1671 = vmatprep.mubr.bf16.mxu0 %v9366_v20 }
  0xd1   : > { %2294 = vmatmul.mubr.bf16.gmra.mrb[72].mxu1 %v9363_v25 }
  0xd2   : > { %2301 = vmatprep.mubr.bf16.mxu1 %v9366_v20 }
  0xd7   : > { %1672 = vmatmul.mubr.bf16.gmra.mrb[68].mxu0 %v9373_v34 }
  0xd8   : > { %2173 = vmatprep.mubr.bf16.mxu0 %v9005_v24  ;;  %v9394_v24 = vld [vmem:[%s8870_s28 + $0xd8] sm:$0xff]  }
  0xd9   : > { %2302 = vmatmul.mubr.bf16.gmra.mrb[76].mxu1 %v9373_v34 }
  0xda   : > { %2309 = vmatprep.mubr.bf16.mxu1 %v9383_v41 }
  0xdf   : > { %2174 = vmatmul.mubr.bf16.vlgmr.msra.gmra.mrb[72].mxu0 %v8735_v46  ;;  %v8652_v46 = vld [vmem:[%s11526_s1 + $0x228] sm:$0xff]  }
  0xe0   : > { %8025 = vmatpush3.bf16.msra.mxu0 %v9242_v58  ;;  %2181 = vmatprep.mubr.bf16.mxu0 %v9026_v44  ;;  %v8634_v58 = vld [vmem:[%s11526_s1 + $0x160] sm:$0xff]  }
  0xe1   : > { %8026 = vmatprep.subr.bf16.mxu0 %v8628_v39  ;;  %2310 = vmatmul.mubr.bf16.gmra.mrb[80].mxu1 %v9394_v24 }
  0xe2   : > { %2883 = vmatprep.mubr.bf16.mxu1 %v9026_v44  ;;  %v8639_v44 = vld [vmem:[%s11526_s1 + $0x170] sm:$0xff]  }
  0xe4   : > { %8027 = vmatpush3.bf16.msra.mxu0 %v8628_v39  ;;  %v8651_v39 = vld [vmem:[%s11526_s1 + $0x220] sm:$0xff]  }
  0xe5   : > { %8028 = vmatprep.subr.bf16.mxu0 %v8630_v47 }
  0xe7   : > { %2182 = vmatmul.mubr.bf16.gmra.mrb[76].mxu0 %v8736_v59 }
  0xe8   : > { %8029 = vmatpush3.bf16.msra.mxu0 %v8630_v47  ;;  %2189 = vmatprep.mubr.bf16.mxu0 %v9057_v4 }
  0xe9   : > { %8030 = vmatprep.subr.bf16.mxu0 %v8632_v56  ;;  %2884 = vmatmul.mubr.bf16.vlgmr.msra.gmra.mrb[84].mxu1 %v8736_v59 }
  0xea   : > { %2891 = vmatprep.mubr.bf16.mxu1 %v9057_v4  ;;  %v8647_v4 = vld [vmem:[%s11526_s1 + $0x200] sm:$0xff]  }
  0xec   : > { %8031 = vmatpush3.bf16.msra.mxu0 %v8632_v56 }
  0xed   : > { %8032 = vmatprep.subr.bf16.mxu0 %v8634_v58 }
  0xef   : > { %2190 = vmatmul.mubr.bf16.gmra.mrb[80].mxu0 %v8737_v63 }
  0xf0   : > { %2197 = vmatprep.mubr.bf16.mxu0 %v9083_v27  ;;  %8033 = vmatpush3.bf16.msra.mxu0 %v8634_v58 }
  0xf1   : > { %8034 = vmatprep.subr.bf16.mxu0 %v8637_v61  ;;  %2892 = vmatmul.mubr.bf16.gmra.mrb[88].mxu1 %v8737_v63 }
  0xf2   : > { %2899 = vmatprep.mubr.bf16.mxu1 %v9083_v27 }
  0xf4   : > { %8035 = vmatpush3.bf16.msra.mxu0 %v8637_v61 }
  0xf5   : > { %8036 = vmatprep.subr.bf16.mxu0 %v8639_v44 }
  0xf7   : > { %2198 = vmatmul.mubr.bf16.gmra.mrb[84].mxu0 %v8738_v6 }
  0xf8   : > { %2205 = vmatprep.mubr.bf16.mxu0 %v9107_v50  ;;  %8037 = vmatpush3.bf16.msra.mxu0 %v8639_v44 }
  0xf9   : > { %8038 = vmatprep.subr.bf16.mxu0 %v8645_v0  ;;  %2900 = vmatmul.mubr.bf16.gmra.mrb[92].mxu1 %v8738_v6  ;;  %v8654_v6 = vld [vmem:[%s11526_s1 + $0x238] sm:$0xff]  }
  0xfa   : > { %2907 = vmatprep.mubr.bf16.mxu1 %v9107_v50 }
  0xfc   : > { %8039 = vmatpush3.bf16.msra.mxu0 %v8645_v0 }
  0xfd   : > { %8076 = vmatprep.subr.bf16.mxu0 %v8647_v4 }
  0xff   : > { %2206 = vmatmul.mubr.bf16.gmra.mrb[88].mxu0 %v8739_v8 }
 0x100   : > { %2213 = vmatprep.mubr.bf16.mxu0 %v9136_v13 }
 0x101   : > { %2908 = vmatmul.mubr.bf16.gmra.mrb[96].mxu1 %v8739_v8 }
 0x102   : > { %2915 = vmatprep.mubr.bf16.mxu1 %v9136_v13 }
 0x103   : > { %v7990_v27 = vpop.f32.mrb[0].mxu1 }
 0x104   : > { %v1714_v19 = vpop.f32.mrb[1].mxu1 }
 0x105   : > { %v7991_v9 = vpop.f32.mrb[2].mxu1 }
 0x106   : > { %v1717_v26 = vpop.f32.mrb[3].mxu1 }
 0x107   : > { %2214 = vmatmul.mubr.bf16.gmra.mrb[92].mxu0 %v8740_v16 }
 0x108   : > { %8040 = vmatprep.mubr.bf16.mxu0 %v8909_v40  ;;  %v8649_v40 = vld [vmem:[%s11526_s1 + $0x210] sm:$0xff]  }
 0x109   : > { %2916 = vmatmul.mubr.bf16.gmra.mrb[100].mxu1 %v8740_v16 }
 0x10a   : > { %2923 = vmatprep.mubr.bf16.mxu1 %v9164_v1 }
 0x10b   : > { %v9439_v50 = vpop.f32.mrb[4].mxu1 }
 0x10c   : > { %v1730_v13 = vpop.f32.mrb[5].mxu1 }
 0x10d   : > { %v9444_v36 = vpop.f32.mrb[6].mxu1 }
 0x10e   : > { %v1733_v1 = vpop.f32.mrb[7].mxu1 }
 0x10f   : > { %8041 = vmatmul.mubr.bf16.vlgmr.msra.gmra.mrb[96].mxu0 %v8922_v45 }
 0x110   : > { %8077 = vmatpush3.bf16.msra.mxu0 %v8647_v4  ;;  %8044 = vmatprep.mubr.bf16.mxu0 %v8941_v53 }
 0x111   : > { %8078 = vmatprep.subr.bf16.mxu0 %v8648_v21  ;;  %2924 = vmatmul.mubr.bf16.gmra.mrb[104].mxu1 %v8741_v29 }
 0x112   : > { %2931 = vmatprep.mubr.bf16.mxu1 %v9187_v7 }
 0x113   : > { %v9457_v47 = vpop.f32.mrb[8].mxu1 }
 0x114   : > { %8079 = vmatpush3.bf16.msra.mxu0 %v8648_v21  ;;  %v9460_v7 = vpop.f32.mrb[9].mxu1 }
 0x115   : > { %8080 = vmatprep.subr.bf16.mxu0 %v8649_v40  ;;  %v9464_v56 = vpop.f32.mrb[10].mxu1 }
 0x116   : > { %v9466_v59 = vpop.f32.mrb[11].mxu1 }
 0x117   : > { %8045 = vmatmul.mubr.bf16.gmra.mrb[100].mxu0 %v8971_v5 }
 0x118   : > { %8048 = vmatprep.mubr.bf16.mxu0 %v8990_v17  ;;  %8081 = vmatpush3.bf16.msra.mxu0 %v8649_v40 }
 0x119   : > { %8082 = vmatprep.subr.bf16.mxu0 %v8650_v30  ;;  %2932 = vmatmul.mubr.bf16.gmra.mrb[108].mxu1 %v9199_v15  ;;  %v8653_v15 = vld [vmem:[%s11526_s1 + $0x230] sm:$0xff]  }
 0x11a   : > { %2939 = vmatprep.mubr.bf16.mxu1 %v9205_v18 }
 0x11b   : > { %v9482_v8 = vpop.f32.mrb[12].mxu1 }
 0x11c   : > { %8083 = vmatpush3.bf16.msra.mxu0 %v8650_v30  ;;  %v9486_v21 = vpop.f32.mrb[13].mxu1 }
 0x11d   : > { %8084 = vmatprep.subr.bf16.mxu0 %v8651_v39  ;;  %v9488_v40 = vpop.f32.mrb[14].mxu1 }
 0x11f   : > { %8049 = vmatmul.mubr.bf16.gmra.mrb[104].mxu0 %v9018_v35 }
 0x120   : > { %8052 = vmatprep.mubr.bf16.mxu0 %v9031_v48  ;;  %8085 = vmatpush3.bf16.msra.mxu0 %v8651_v39 }
 0x121   : > { %8086 = vmatprep.subr.bf16.mxu0 %v8652_v46  ;;  %2940 = vmatmul.mubr.bf16.gmra.mrb[112].mxu1 %v9217_v31 }
 0x122   : > { %v1537_v58 = vpop.f32.mrb[0].mxu0  ;;  %2947 = vmatprep.mubr.bf16.mxu1 %v9224_v38  ;;  %v9492_v38 = vpop.f32.mrb[15].mxu1 }
 0x123   : > { %v9471_v61 = vadd.f32 %v1714_v19, %v1537_v58  ;;  %v1539_v63 = vpop.f32.mrb[1].mxu0 }
 0x124   : > { %v1540_v44 = vpop.f32.mrb[2].mxu0  ;;  %8087 = vmatpush3.bf16.msra.mxu0 %v8652_v46 }
 0x125   : > { %v9473_v0 = vadd.f32 %v1717_v26, %v1540_v44  ;;  %v1542_v18 = vpop.f32.mrb[3].mxu0  ;;  %8088 = vmatprep.subr.bf16.mxu0 %v8653_v15 }
 0x127   : > { %8053 = vmatmul.mubr.bf16.gmra.mrb[108].mxu0 %v9050_v54 }
 0x128   : > { %8056 = vmatprep.mubr.bf16.mxu0 %v9065_v12  ;;  %8089 = vmatpush3.bf16.msra.mxu0 %v8653_v15 }
 0x129   : > { %8090 = vmatprep.subr.bf16.mxu0 %v8654_v6  ;;  %2948 = vmatmul.mubr.bf16.gmra.mrb[116].mxu1 %v9237_v52 }
 0x12a   : > { %v1545_v4 = vpop.f32.mrb[4].mxu0  ;;  %2955 = vmatprep.mubr.bf16.mxu1 %v9248_v62 }
 0x12b   : > { %v9484_v16 = vadd.f32 %v7990_v27, %v1545_v4  ;;  %v1547_v19 = vpop.f32.mrb[5].mxu0 }
 0x12c   : > { %v1548_v26 = vpop.f32.mrb[6].mxu0  ;;  %8091 = vmatpush3.bf16.msra.mxu0 %v8654_v6 }
 0x12d   : > { %v9490_v31 = vadd.f32 %v7991_v9, %v1548_v26  ;;  %v1550_v30 = vpop.f32.mrb[7].mxu0 }
 0x12f   : > { %8057 = vmatmul.mubr.bf16.gmra.mrb[112].mxu0 %v9087_v28 }
 0x130   : > { %8060 = vmatprep.mubr.bf16.mxu0 %v9094_v32 }
 0x131   : > { %2956 = vmatmul.mubr.bf16.gmra.mrb[120].mxu1 %v9263_v14 }
 0x132   : > { %v1553_v27 = vpop.f32.mrb[8].mxu0  ;;  %v9500_v15 = vpop.f32.mrb[16].mxu1  ;;  %2963 = vmatprep.mubr.bf16.mxu1 %v9270_v23 }
 0x133   : > { %v9498_v29 = vadd.f32 %v1730_v13, %v1553_v27  ;;  %v1555_v39 = vpop.f32.mrb[9].mxu0  ;;  %v9504_v63 = vpop.f32.mrb[17].mxu1 }
 0x134   : > { %v1556_v46 = vpop.f32.mrb[10].mxu0  ;;  %v9507_v52 = vpop.f32.mrb[18].mxu1  ;;  %v8655_v39 = vld [vmem:[%s8870_s28 + $0xd8] sm:$0xfe]  }
 0x135   : > { %v9502_v9 = vadd.f32 %v1733_v1, %v1556_v46  ;;  %v1558_v58 = vpop.f32.mrb[11].mxu0  ;;  %v9511_v62 = vpop.f32.mrb[19].mxu1  ;;  %v8656_v46 = vld [vmem:[%s8870_s28 + $0xe0] ss:$0 sps:$4 sm:$0x11]  }
 0x137   : > { %8061 = vmatmul.mubr.bf16.gmra.mrb[116].mxu0 %v9113_v55 }
 0x138   : > { %8064 = vmatprep.mubr.bf16.mxu0 %v9125_v3 }
 0x139   : > { %2964 = vmatmul.mubr.bf16.gmra.mrb[124].mxu1 %v9286_v42 }
 0x13a   : > { %v1561_v13 = vpop.f32.mrb[12].mxu0  ;;  %v9517_v6 = vpop.f32.mrb[20].mxu1  ;;  %2971 = vmatprep.mubr.bf16.mxu1 %v9293_v51 }
 0x13b   : > { %v9515_v44 = vadd.f32 %v9439_v50, %v1561_v13  ;;  %v1563_v1 = vpop.f32.mrb[13].mxu0  ;;  %v9522_v19 = vpop.f32.mrb[21].mxu1 }
 0x13c   : > { %v1564_v18 = vpop.f32.mrb[14].mxu0  ;;  %v9525_v23 = vpop.f32.mrb[22].mxu1  ;;  %v1212_v1 = vrot.slane %v8656_v46, 1 }
 0x13d   : > { %v9520_v14 = vadd.f32 %v9444_v36, %v1564_v18  ;;  %v1566_v4 = vpop.f32.mrb[15].mxu0  ;;  %v9529_v50 = vpop.f32.mrb[23].mxu1 }
 0x13f   : > { %8065 = vmatmul.mubr.bf16.gmra.mrb[120].mxu0 %v9147_v22 }
 0x140   : > { %8068 = vmatprep.mubr.bf16.mxu0 %v9161_v37 }
 0x141   : > { %2972 = vmatmul.mubr.bf16.gmra.mrb[128].mxu1 %v9305_v11  ;;  %v8662_v11 = vld [vmem:[%s11527_s2 + $0x80] sm:$0xff]  }
 0x142   : > { %v1569_v26 = vpop.f32.mrb[16].mxu0  ;;  %v9541_v13 = vpop.f32.mrb[24].mxu1  ;;  %2979 = vmatprep.mubr.bf16.mxu1 %v9313_v33  ;;  %8128 = vmatprep.subr.bf16.mxu1 %v8662_v11 }
 0x143   : > { %v9533_v30 = vadd.f32 %v9460_v7, %v1569_v26  ;;  %v1571_v36 = vpop.f32.mrb[17].mxu0  ;;  %v9545_v51 = vpop.f32.mrb[25].mxu1  ;;  %v1211_v7 = vrot.slane %v8655_v39, 1  ;;  %8129 = vmatpush3.bf16.msra.mxu1 %v8662_v11 }
 0x144   : > { %v1572_v27 = vpop.f32.mrb[18].mxu0  ;;  %v9548_v18 = vpop.f32.mrb[26].mxu1 }
 0x145   : > { %v9538_v42 = vadd.f32 %v9466_v59, %v1572_v27  ;;  %v1574_v58 = vpop.f32.mrb[19].mxu0  ;;  %v9550_v4 = vpop.f32.mrb[27].mxu1  ;;  %v9559_v27 = vsel %vm1156_vm0, %v1211_v7, %v1212_v1 }
 0x147   : > { %8069 = vmatmul.mubr.bf16.gmra.mrb[124].mxu0 %v9178_v57 }
 0x148   : > { %8072 = vmatprep.mubr.bf16.mxu0 %v9190_v60 }
 0x149   : > { %2980 = vmatmul.mubr.bf16.gmra.mrb[132].mxu1 %v9324_v43 }
 0x14a   : > { %v1577_v59 = vpop.f32.mrb[20].mxu0  ;;  %2987 = vmatprep.mubr.bf16.mxu1 %v9331_v49 }
 0x14b   : > { %v9556_v26 = vadd.f32 %v9457_v47, %v1577_v59  ;;  %v1579_v36 = vpop.f32.mrb[21].mxu0  ;;  %v9568_v47 = vpop.f32.mrb[28].mxu1 }
 0x14c   : > { %v1580_v33 = vpop.f32.mrb[22].mxu0  ;;  %v9570_v58 = vpop.f32.mrb[29].mxu1 }
 0x14d   : > { %v9562_v39 = vadd.f32 %v9464_v56, %v1580_v33  ;;  %v1582_v46 = vpop.f32.mrb[23].mxu0  ;;  %v9572_v1 = vpop.f32.mrb[30].mxu1 }
 0x14e   : > { %v9577_v11 = vpop.f32.mrb[31].mxu1 }
 0x14f   : > { %8073 = vmatmul.mubr.bf16.gmra.mrb[128].mxu0 %v9559_v27 }
 0x150   : > { %8092 = vmatprep.mubr.bf16.mxu0 %v8922_v45 }
 0x151   : > { %2988 = vmatmul.mubr.bf16.gmra.mrb[136].mxu1 %v9344_v2 }
 0x152   : > { %v1585_v7 = vpop.f32.mrb[24].mxu0  ;;  %2995 = vmatprep.mubr.bf16.mxu1 %v9351_v10 }
 0x153   : > { %v9575_v56 = vadd.f32 %v9486_v21, %v1585_v7  ;;  %v1587_v59 = vpop.f32.mrb[25].mxu0 }
 0x154   : > { %v1588_v43 = vpop.f32.mrb[26].mxu0  ;;  %v9586_v45 = vpop.f32.mrb[32].mxu1 }
 0x155   : > { %11539 = vst [vmem:[#allocation6_spill] sm:$0xff] %v9575_v56  ;;  %v9580_v36 = vadd.f32 %v9492_v38, %v1588_v43  ;;  %v1590_v49 = vpop.f32.mrb[27].mxu0  ;;  %v9588_v33 = vpop.f32.mrb[33].mxu1 }
 0x156   : > { %v9593_v7 = vpop.f32.mrb[34].mxu1 }
 0x157   : > { %11540 = vst [vmem:[#allocation7_spill] sm:$0xff] %v9580_v36  ;;  %8093 = vmatmul.mubr.bf16.vlgmr.msra.gmra.mrb[132].mxu0 %v8941_v53  ;;  %v9595_v2 = vpop.f32.mrb[35].mxu1  ;;  %v8657_v53 = vld [vmem:[%s8870_s28 + $0xe4] sm:$0xff]  }
 0x158   : > { %8096 = vmatprep.mubr.bf16.mxu0 %v8971_v5  ;;  %v8663_v5 = vld [vmem:[%s11527_s2 + $0x88] sm:$0xff]   ;;  %v887_v49 = vshll.u32 %v8657_v53, 16 }
 0x159   : > { %2996 = vmatmul.mubr.bf16.gmra.mrb[140].mxu1 %v9363_v25  ;;  %8130 = vmatprep.subr.bf16.mxu1 %v8663_v5 }
 0x15a   : > { %v1593_v21 = vpop.f32.mrb[28].mxu0  ;;  %3003 = vmatprep.mubr.bf16.mxu1 %v9366_v20  ;;  %8131 = vmatpush3.bf16.msra.mxu1 %v8663_v5  ;;  %v889_v56 = vrot.slane %v887_v49, 1 }
 0x15b   : > { %v9591_v46 = vadd.f32 %v9482_v8, %v1593_v21  ;;  %v1595_v38 = vpop.f32.mrb[29].mxu0  ;;  %v8658_v8 = vld [vmem:[%s8870_s28 + $0xec] ss:$0 sps:$4 sm:$0x11]  }
 0x15c   : > { %v1596_v59 = vpop.f32.mrb[30].mxu0  ;;  %v9609_v21 = vpop.f32.mrb[36].mxu1  ;;  %v892_v20 = vshll.u32 %v8658_v8, 16 }
 0x15d   : > { %11541 = vst [vmem:[#allocation8_spill] sm:$0xff] %v9591_v46  ;;  %v9602_v10 = vadd.f32 %v9488_v40, %v1596_v59  ;;  %v1598_v43 = vpop.f32.mrb[31].mxu0  ;;  %v2225_v36 = vpop.f32.mrb[37].mxu1 }
 0x15e   : > { %v9614_v43 = vpop.f32.mrb[38].mxu1  ;;  %v894_v36 = vrot.slane %v892_v20, 1 }
 0x15f   : > { %11542 = vst [vmem:[#allocation9_spill] sm:$0xff] %v9602_v10  ;;  %8097 = vmatmul.mubr.bf16.gmra.mrb[136].mxu0 %v8990_v17  ;;  %v2228_v10 = vpop.f32.mrb[39].mxu1  ;;  %v885_v17 = vshrl.u32 %v8657_v53, 16 }
 0x160   : > { %8100 = vmatprep.mubr.bf16.mxu0 %v9018_v35 }
 0x161   : > { %3004 = vmatmul.mubr.bf16.gmra.mrb[144].mxu1 %v9373_v34 }
 0x162   : > { %v1601_v38 = vpop.f32.mrb[32].mxu0  ;;  %3011 = vmatprep.mubr.bf16.mxu1 %v9383_v41 }
 0x163   : > { %v9612_v40 = vadd.f32 %v9504_v63, %v1601_v38  ;;  %v1603_v59 = vpop.f32.mrb[33].mxu0  ;;  %v890_v63 = vor.u32 %v889_v56, %v885_v17 }
 0x164   : > { %v1604_v25 = vpop.f32.mrb[34].mxu0  ;;  %v9623_v5 = vpop.f32.mrb[40].mxu1  ;;  %v8659_v59 = vld [vmem:[%s8870_s28 + $0xe4] sm:$0xff]  }
 0x165   : > { %v9617_v35 = vadd.f32 %v9511_v62, %v1604_v25  ;;  %v1606_v46 = vpop.f32.mrb[35].mxu0  ;;  %v2233_v53 = vpop.f32.mrb[41].mxu1 }
 0x166   : > { %v9628_v46 = vpop.f32.mrb[42].mxu1 }
 0x167   : > { %8101 = vmatmul.mubr.bf16.gmra.mrb[140].mxu0 %v9031_v48  ;;  %v2236_v49 = vpop.f32.mrb[43].mxu1  ;;  %v895_v48 = vsel %vm655_vm1, %v890_v63, %v894_v36  ;;  %v9652_v36 = vld [vmem:[#allocation3 + $0x8] sm:$0xff] }
 0x168   : > { %8104 = vmatprep.mubr.bf16.mxu0 %v9050_v54  ;;  %11543 = vst [vmem:[#allocation10_spill] sm:$0xff] %v9652_v36 }
 0x169   : > { %3012 = vmatmul.mubr.bf16.gmra.mrb[148].mxu1 %v9394_v24 }
 0x16a   : > { %v1609_v10 = vpop.f32.mrb[36].mxu0  ;;  %3019 = vmatprep.mubr.bf16.mxu1 %v895_v48 }
 0x16b   : > { %v9626_v8 = vadd.f32 %v9500_v15, %v1609_v10  ;;  %v1611_v62 = vpop.f32.mrb[37].mxu0  ;;  %v8664_v15 = vld [vmem:[%s11527_s2 + $0x90] sm:$0xff]  }
 0x16c   : > { %v1612_v34 = vpop.f32.mrb[38].mxu0  ;;  %v9640_v56 = vpop.f32.mrb[44].mxu1  ;;  %8132 = vmatprep.subr.bf16.mxu1 %v8664_v15 }
 0x16d   : > { %v9632_v41 = vadd.f32 %v9507_v52, %v1612_v34  ;;  %v1614_v54 = vpop.f32.mrb[39].mxu0  ;;  %v2241_v25 = vpop.f32.mrb[45].mxu1  ;;  %8133 = vmatpush3.bf16.msra.mxu1 %v8664_v15 }
 0x16e   : > { %v9646_v24 = vpop.f32.mrb[46].mxu1 }
 0x16f   : > { %8105 = vmatmul.mubr.bf16.gmra.mrb[144].mxu0 %v9065_v12  ;;  %v2244_v20 = vpop.f32.mrb[47].mxu1 }
 0x170   : > { %8108 = vmatprep.mubr.bf16.mxu0 %v9087_v28 }
 0x171   : > { %3020 = vmatmul.mubr.bf16.gmra.mrb[152].mxu1 %v8659_v59 }
 0x172   : > { %v1617_v38 = vpop.f32.mrb[40].mxu0  ;;  %8144 = vmatprep.mubr.bf16.mxu1 %v9652_v36 }
 0x173   : > { %v9644_v52 = vadd.f32 %v9522_v19, %v1617_v38  ;;  %v1619_v17 = vpop.f32.mrb[41].mxu0 }
 0x174   : > { %v1620_v12 = vpop.f32.mrb[42].mxu0  ;;  %v9656_v19 = vpop.f32.mrb[48].mxu1 }
 0x175   : > { %v9649_v28 = vadd.f32 %v9529_v50, %v1620_v12  ;;  %v1622_v63 = vpop.f32.mrb[43].mxu0  ;;  %v2249_v53 = vpop.f32.mrb[49].mxu1 }
 0x176   : > { %v9661_v50 = vpop.f32.mrb[50].mxu1 }
 0x177   : > { %8109 = vmatmul.mubr.bf16.gmra.mrb[148].mxu0 %v9094_v32  ;;  %v2252_v48 = vpop.f32.mrb[51].mxu1 }
 0x178   : > { %8112 = vmatprep.mubr.bf16.mxu0 %v9113_v55  ;;  %v8665_v55 = vld [vmem:[%s11527_s2 + $0x98] sm:$0xff]  }
 0x179   : > { %8134 = vmatprep.subr.bf16.mxu1 %v8665_v55 }
 0x17a   : > { %v1625_v10 = vpop.f32.mrb[44].mxu0  ;;  %8135 = vmatpush3.bf16.msra.mxu1 %v8665_v55 }
 0x17b   : > { %v9659_v62 = vadd.f32 %v9517_v6, %v1625_v10  ;;  %v1627_v34 = vpop.f32.mrb[45].mxu0 }
 0x17c   : > { %v1628_v49 = vpop.f32.mrb[46].mxu0  ;;  %v9671_v15 = vpop.f32.mrb[52].mxu1  ;;  %v8660_v34 = vld [vmem:[%s8870_s28 + $0xe4] sm:$0xfe]  }
 0x17d   : > { %v9664_v32 = vadd.f32 %v9525_v23, %v1628_v49  ;;  %v1630_v54 = vpop.f32.mrb[47].mxu0  ;;  %v2257_v38 = vpop.f32.mrb[53].mxu1 }
 0x17e   : > { %v9676_v25 = vpop.f32.mrb[54].mxu1  ;;  %v8661_v54 = vld [vmem:[%s8870_s28 + $0xec] ss:$0 sps:$4 sm:$0x11]  }
 0x17f   : > { %8113 = vmatmul.mubr.bf16.gmra.mrb[152].mxu0 %v9125_v3 }
 0x180   : > { %8116 = vmatprep.mubr.bf16.mxu0 %v9147_v22  ;;  %v2260_v22 = vpop.f32.mrb[55].mxu1 }
 0x182   : > { %v1633_v6 = vpop.f32.mrb[48].mxu0 }
 0x183   : > { %v9674_v59 = vadd.f32 %v9545_v51, %v1633_v6  ;;  %v1635_v23 = vpop.f32.mrb[49].mxu0  ;;  %v1215_v6 = vrot.slane %v8661_v54, 1 }
 0x184   : > { %v1636_v3 = vpop.f32.mrb[50].mxu0  ;;  %v9683_v20 = vpop.f32.mrb[56].mxu1 }
 0x185   : > { %v9679_v17 = vadd.f32 %v9550_v4, %v1636_v3  ;;  %v1638_v12 = vpop.f32.mrb[51].mxu0  ;;  %v2265_v51 = vpop.f32.mrb[57].mxu1 }
 0x186   : > { %v9689_v49 = vpop.f32.mrb[58].mxu1 }
 0x187   : > { %11544 = vst [vmem:[#allocation11_spill] sm:$0xff] %v9679_v17  ;;  %8117 = vmatmul.mubr.bf16.gmra.mrb[156].mxu0 %v9161_v37  ;;  %v2268_v4 = vpop.f32.mrb[59].mxu1 }
 0x188   : > { %8120 = vmatprep.mubr.bf16.mxu0 %v9178_v57  ;;  %v1214_v57 = vrot.slane %v8660_v34, 1  ;;  %v8670_v34 = vld [vmem:[%s11527_s2] sm:$0xff]   ;;  %v8671_v4 = vld [vmem:[%s11527_s2 + $0x48] sm:$0xff]  }
 0x18a   : > { %v1641_v63 = vpop.f32.mrb[52].mxu0 }
 0x18b   : > { %v9686_v10 = vadd.f32 %v9541_v13, %v1641_v63  ;;  %v1643_v53 = vpop.f32.mrb[53].mxu0 }
 0x18c   : > { %v1644_v48 = vpop.f32.mrb[54].mxu0  ;;  %v9697_v38 = vpop.f32.mrb[60].mxu1 }
 0x18d   : > { %v9693_v55 = vadd.f32 %v9548_v18, %v1644_v48  ;;  %v1646_v37 = vpop.f32.mrb[55].mxu0  ;;  %v2273_v23 = vpop.f32.mrb[61].mxu1  ;;  %v1216_v18 = vsel %vm1156_vm0, %v1214_v57, %v1215_v6 }
 0x18e   : > { %v9702_v12 = vpop.f32.mrb[62].mxu1 }
 0x18f   : > { %11545 = vst [vmem:[#allocation12_spill] sm:$0xff] %v9693_v55  ;;  %8121 = vmatmul.mubr.bf16.gmra.mrb[160].mxu0 %v9190_v60  ;;  %v2276_v51 = vpop.f32.mrb[63].mxu1  ;;  %v8669_v60 = vld [vmem:[%s11527_s2 + $0x40] sm:$0xff]  }
 0x190   : > { %8124 = vmatprep.mubr.bf16.mxu0 %v9559_v27  ;;  %7564 = vmatprep.subr.bf16.mxu0 %v8669_v60  ;;  %v8674_v51 = vld [vmem:[%s11527_s2 + $0x10] sm:$0xff]  }
 0x191   : > { %7565 = vmatpush3.bf16.msra.mxu0 %v8670_v34 }
 0x192   : > { %v1649_v13 = vpop.f32.mrb[56].mxu0  ;;  %7566 = vmatprep.subr.bf16.mxu0 %v8671_v4  ;;  %v8676_v4 = vld [vmem:[%s11527_s2 + $0x18] sm:$0xff]  }
 0x193   : > { %v9700_v3 = vadd.f32 %v9570_v58, %v1649_v13  ;;  %v1651_v22 = vpop.f32.mrb[57].mxu0  ;;  %v8666_v58 = vld [vmem:[%s11527_s2 + $0xa0] sm:$0xff]   ;;  %v8672_v13 = vld [vmem:[%s11527_s2 + $0x8] sm:$0xff]  }
 0x194   : > { %v1652_v63 = vpop.f32.mrb[58].mxu0  ;;  %8136 = vmatprep.subr.bf16.mxu1 %v8666_v58  ;;  %v9717_v48 = vpop.f32.mrb[64].mxu1 }
 0x195   : > { %11546 = vst [vmem:[#allocation13_spill] sm:$0xff] %v9700_v3  ;;  %v9709_v27 = vadd.f32 %v9577_v11, %v1652_v63  ;;  %v1654_v53 = vpop.f32.mrb[59].mxu0  ;;  %8137 = vmatpush3.bf16.msra.mxu1 %v8666_v58  ;;  %v2281_v54 = vpop.f32.mrb[65].mxu1  ;;  %7567 = vmatpush3.bf16.msra.mxu0 %v8672_v13 }
 0x196   : > { %v9726_v6 = vpop.f32.mrb[66].mxu1 }
 0x197   : > { %11547 = vst [vmem:[#allocation14_spill] sm:$0xff] %v9709_v27  ;;  %8125 = vmatmul.mubr.bf16.gmra.mrb[164].mxu0 %v1216_v18  ;;  %v2284_v22 = vpop.f32.mrb[67].mxu1 }
 0x198   : > { %4297 = vmatprep.mubr.bf16.mxu0 %v9652_v36 }
 0x19a   : > { %v1657_v11 = vpop.f32.mrb[60].mxu0 }
 0x19b   : > { %v9724_v37 = vadd.f32 %v9568_v47, %v1657_v11  ;;  %v1659_v57 = vpop.f32.mrb[61].mxu0  ;;  %v8673_v47 = vld [vmem:[%s11527_s2 + $0x50] sm:$0xff]  }
 0x19c   : > { %v1660_v23 = vpop.f32.mrb[62].mxu0  ;;  %7568 = vmatprep.subr.bf16.mxu0 %v8673_v47  ;;  %v9740_v60 = vpop.f32.mrb[68].mxu1  ;;  %v8679_v47 = vld [vmem:[%s11527_s2 + $0x20] sm:$0xff]  }
 0x19d   : > { %11548 = vst [vmem:[#allocation15_spill] sm:$0xff] %v9724_v37  ;;  %v9732_v63 = vadd.f32 %v9572_v1, %v1660_v23  ;;  %v1662_v18 = vpop.f32.mrb[63].mxu0  ;;  %11550 = vst [vmem:[#allocation17_spill] sm:$0xff] %v9740_v60  ;;  %7569 = vmatpush3.bf16.msra.mxu0 %v8674_v51  ;;  %v2289_v58 = vpop.f32.mrb[69].mxu1  ;;  %v8675_v1 = vld [vmem:[%s11527_s2 + $0x58] sm:$0xff]  }
 0x19e   : > { %v9748_v54 = vpop.f32.mrb[70].mxu1  ;;  %7570 = vmatprep.subr.bf16.mxu0 %v8675_v1  ;;  %v8667_v18 = vld [vmem:[%s11527_s2 + $0xa8] sm:$0xff]  }
 0x19f   : > { %11549 = vst [vmem:[#allocation16_spill] sm:$0xff] %v9732_v63  ;;  %11552 = vst [vmem:[#allocation19_spill] sm:$0xff] %v9748_v54  ;;  %v2292_v13 = vpop.f32.mrb[71].mxu1  ;;  %8138 = vmatprep.subr.bf16.mxu1 %v8667_v18  ;;  %v8680_v58 = vld [vmem:[%s11527_s2 + $0x68] sm:$0xff]  }
 0x1a0   : > { %8139 = vmatpush3.bf16.msra.mxu1 %v8667_v18 }
 0x1a1   : > { %7571 = vmatpush3.bf16.msra.mxu0 %v8676_v4 }
 0x1a2   : > { %v1665_v53 = vpop.f32.mrb[64].mxu0 }
 0x1a3   : > { %v9746_v34 = vadd.f32 %v9588_v33, %v1665_v53  ;;  %v1667_v11 = vpop.f32.mrb[65].mxu0  ;;  %v8678_v33 = vld [vmem:[%s11527_s2 + $0x60] sm:$0xff]  }
 0x1a4   : > { %v1668_v57 = vpop.f32.mrb[66].mxu0  ;;  %7572 = vmatprep.subr.bf16.mxu0 %v8678_v33  ;;  %v9765_v51 = vpop.f32.mrb[72].mxu1 }
 0x1a5   : > { %11551 = vst [vmem:[#allocation18_spill] sm:$0xff] %v9746_v34  ;;  %v9754_v23 = vadd.f32 %v9595_v2, %v1668_v57  ;;  %v1670_v22 = vpop.f32.mrb[67].mxu0  ;;  %11554 = vst [vmem:[#allocation21_spill] sm:$0xff] %v9765_v51  ;;  %7573 = vmatpush3.bf16.msra.mxu0 %v8679_v47  ;;  %v2297_v53 = vpop.f32.mrb[73].mxu1  ;;  %v8681_v57 = vld [vmem:[%s11527_s2 + $0x28] sm:$0xff]   ;;  %v8683_v47 = vld [vmem:[%s11527_s2 + $0x30] sm:$0xff]  }
 0x1a6   : > { %v9773_v4 = vpop.f32.mrb[74].mxu1  ;;  %7574 = vmatprep.subr.bf16.mxu0 %v8680_v58 }
 0x1a7   : > { %11553 = vst [vmem:[#allocation20_spill] sm:$0xff] %v9754_v23  ;;  %11556 = vst [vmem:[#allocation23_spill] sm:$0xff] %v9773_v4  ;;  %v2300_v22 = vpop.f32.mrb[75].mxu1 }
 0x1a9   : > { %7575 = vmatpush3.bf16.msra.mxu0 %v8681_v57 }
 0x1aa   : > { %v1673_v2 = vpop.f32.mrb[68].mxu0 }
 0x1ab   : > { %v9771_v1 = vadd.f32 %v9586_v45, %v1673_v2  ;;  %v1675_v11 = vpop.f32.mrb[69].mxu0  ;;  %v8682_v45 = vld [vmem:[%s11527_s2 + $0x70] sm:$0xff]  }
 0x1ac   : > { %v1676_v13 = vpop.f32.mrb[70].mxu0  ;;  %7576 = vmatprep.subr.bf16.mxu0 %v8682_v45  ;;  %v9787_v2 = vpop.f32.mrb[76].mxu1 }
 0x1ad   : > { %11555 = vst [vmem:[#allocation22_spill] sm:$0xff] %v9771_v1  ;;  %v9779_v33 = vadd.f32 %v9593_v7, %v1676_v13  ;;  %v1678_v18 = vpop.f32.mrb[71].mxu0  ;;  %11558 = vst [vmem:[#allocation25_spill] sm:$0xff] %v9787_v2  ;;  %7577 = vmatpush3.bf16.msra.mxu0 %v8683_v47  ;;  %v2305_v58 = vpop.f32.mrb[77].mxu1  ;;  %v8684_v7 = vld [vmem:[%s11527_s2 + $0x78] sm:$0xff]  }
 0x1ae   : > { %v9794_v57 = vpop.f32.mrb[78].mxu1  ;;  %v8685_v13 = vld [vmem:[%s11527_s2 + $0x38] sm:$0xff]   ;;  %7578 = vmatprep.subr.bf16.mxu0 %v8684_v7 }
 0x1af   : > { %11557 = vst [vmem:[#allocation24_spill] sm:$0xff] %v9779_v33  ;;  %11559 = vst [vmem:[#allocation26_spill] sm:$0xff] %v9794_v57  ;;  %v2308_v18 = vpop.f32.mrb[79].mxu1 }
 0x1b1   : > { %7579 = vmatpush3.bf16.msra.mxu0 %v8685_v13 }
 0x1b2   : > { %v9789_v53 = vpop.f32.mrb[72].mxu0 }
 0x1b3   : > { %v2177_v11 = vpop.f32.mrb[73].mxu0 }
 0x1b4   : > { %v9799_v22 = vpop.f32.mrb[74].mxu0  ;;  %4298 = vmatmul.mubr.bf16.vlgmr.msra.gmra.mrb[168].mxu0 %v9652_v36  ;;  %v9802_v47 = vpop.f32.mrb[80].mxu1 }
 0x1b5   : > { %v2180_v45 = vpop.f32.mrb[75].mxu0  ;;  %11560 = vst [vmem:[#allocation27_spill] sm:$0xff] %v9802_v47  ;;  %v2313_v23 = vpop.f32.mrb[81].mxu1 }
 0x1b6   : > { %v9804_v11 = vpop.f32.mrb[82].mxu1  ;;  %v8668_v23 = vld [vmem:[%s11527_s2 + $0xb0] sm:$0xff]  }
 0x1b7   : > { %11561 = vst [vmem:[#allocation28_spill] sm:$0xff] %v9804_v11  ;;  %v2316_v34 = vpop.f32.mrb[83].mxu1  ;;  %8140 = vmatprep.subr.bf16.mxu1 %v8668_v23 }
 0x1b8   : > { %8141 = vmatpush3.bf16.msra.mxu1 %v8668_v23 }
 0x1ba   : > { %v2183_v58 = vpop.f32.mrb[76].mxu0 }
 0x1bb   : > { %v2185_v33 = vpop.f32.mrb[77].mxu0 }
 0x1bc   : > { %v2186_v57 = vpop.f32.mrb[78].mxu0  ;;  %v9806_v2 = vpop.f32.mrb[84].mxu1 }
 0x1bd   : > { %v2188_v1 = vpop.f32.mrb[79].mxu0  ;;  %11562 = vst [vmem:[#allocation29_spill] sm:$0xff] %v9806_v2  ;;  %v2887_v63 = vpop.f32.mrb[85].mxu1 }
 0x1be   : > { %v9808_v7 = vpop.f32.mrb[86].mxu1  ;;  %v8677_v63 = vld [vmem:[%s11527_s2 + $0xb8] sm:$0xff]  }
 0x1bf   : > { %11563 = vst [vmem:[#allocation30_spill] sm:$0xff] %v9808_v7  ;;  %v2890_v45 = vpop.f32.mrb[87].mxu1  ;;  %8142 = vmatprep.subr.bf16.mxu1 %v8677_v63 }
 0x1c0   : > { %8143 = vmatpush3.bf16.msra.mxu1 %v8677_v63 }
 0x1c2   : > { %v2191_v27 = vpop.f32.mrb[80].mxu0 }
 0x1c3   : > { %v2193_v18 = vpop.f32.mrb[81].mxu0 }
 0x1c4   : > { %v9810_v13 = vpop.f32.mrb[82].mxu0  ;;  %v9815_v33 = vpop.f32.mrb[88].mxu1 }
 0x1c5   : > { %v2196_v36 = vpop.f32.mrb[83].mxu0  ;;  %11564 = vst [vmem:[#allocation31_spill] sm:$0xff] %v9815_v33  ;;  %v2895_v1 = vpop.f32.mrb[89].mxu1 }
 0x1c6   : > { %v9817_v11 = vpop.f32.mrb[90].mxu1 }
 0x1c7   : > { %11565 = vst [vmem:[#allocation32_spill] sm:$0xff] %v9817_v11  ;;  %v2898_v45 = vpop.f32.mrb[91].mxu1 }
 0x1ca   : > { %v2199_v34 = vpop.f32.mrb[84].mxu0 }
 0x1cb   : > { %v2201_v2 = vpop.f32.mrb[85].mxu0 }
 0x1cc   : > { %v2202_v18 = vpop.f32.mrb[86].mxu0  ;;  %v9822_v7 = vpop.f32.mrb[92].mxu1 }
 0x1cd   : > { %v2204_v36 = vpop.f32.mrb[87].mxu0  ;;  %11566 = vst [vmem:[#allocation33_spill] sm:$0xff] %v9822_v7  ;;  %v2903_v23 = vpop.f32.mrb[93].mxu1 }
 0x1ce   : > { %v9824_v33 = vpop.f32.mrb[94].mxu1 }
 0x1cf   : > { %11567 = vst [vmem:[#allocation34_spill] sm:$0xff] %v9824_v33  ;;  %v2906_v2 = vpop.f32.mrb[95].mxu1 }
 0x1d2   : > { %v2207_v47 = vpop.f32.mrb[88].mxu0 }
 0x1d3   : > { %v2209_v54 = vpop.f32.mrb[89].mxu0 }
 0x1d4   : > { %v2210_v1 = vpop.f32.mrb[90].mxu0  ;;  %v9826_v11 = vpop.f32.mrb[96].mxu1 }
 0x1d5   : > { %v2212_v3 = vpop.f32.mrb[91].mxu0  ;;  %v2911_v37 = vpop.f32.mrb[97].mxu1 }
 0x1d6   : > { %v9828_v51 = vpop.f32.mrb[98].mxu1  ;;  %v8686_v3 = vld [vmem:[%s11527_s2 + $0x100] sm:$0xff]  }
 0x1d7   : > { %11568 = vst [vmem:[#allocation35_spill] sm:$0xff] %v9828_v51  ;;  %v2914_v36 = vpop.f32.mrb[99].mxu1  ;;  %7700 = vmatprep.subr.bf16.mxu1 %v8686_v3 }
 0x1da   : > { %v2215_v4 = vpop.f32.mrb[92].mxu0 }
 0x1db   : > { %v2217_v60 = vpop.f32.mrb[93].mxu0 }
 0x1dc   : > { %v2218_v45 = vpop.f32.mrb[94].mxu0  ;;  %v9830_v17 = vpop.f32.mrb[100].mxu1 }
 0x1dd   : > { %v2220_v63 = vpop.f32.mrb[95].mxu0  ;;  %v2919_v23 = vpop.f32.mrb[101].mxu1 }
 0x1de   : > { %v9832_v33 = vpop.f32.mrb[102].mxu1 }
 0x1df   : > { %11569 = vst [vmem:[#allocation36_spill] sm:$0xff] %v9832_v33  ;;  %v2922_v2 = vpop.f32.mrb[103].mxu1 }
 0x1e2   : > { %v8042_v7 = vpop.f32.mrb[96].mxu0 }
 0x1e3   : > { %v2361_v54 = vadd.f32 %v8042_v7, %v2183_v58  ;;  %v2352_v55 = vpop.f32.mrb[97].mxu0 }
 0x1e4   : > { %v2353_v37 = vadd.f32 %v2352_v55, %v9789_v53  ;;  %v8043_v60 = vpop.f32.mrb[98].mxu0  ;;  %v9851_v55 = vpop.f32.mrb[104].mxu1 }
 0x1e5   : > { %v9839_v51 = vadd.f32 %v2361_v54, %v9484_v16  ;;  %v2364_v36 = vadd.f32 %v8043_v60, %v2186_v57  ;;  %v2355_v63 = vpop.f32.mrb[99].mxu0  ;;  %v2927_v2 = vpop.f32.mrb[105].mxu1 }
 0x1e6   : > { %v9842_v23 = vadd.f32 %v2353_v37, %v9471_v61  ;;  %v2356_v58 = vadd.f32 %v2355_v63, %v9799_v22  ;;  %v9853_v57 = vpop.f32.mrb[106].mxu1 }
 0x1e7   : > { %v9846_v7 = vadd.f32 %v2364_v36, %v9490_v31  ;;  %v2930_v61 = vpop.f32.mrb[107].mxu1 }
 0x1e8   : > { %v9849_v33 = vadd.f32 %v2356_v58, %v9473_v0 }
 0x1ea   : > { %v8046_v53 = vpop.f32.mrb[100].mxu0 }
 0x1eb   : > { %v2377_v16 = vadd.f32 %v8046_v53, %v2199_v34  ;;  %v2368_v54 = vpop.f32.mrb[101].mxu0 }
 0x1ec   : > { %v2369_v3 = vadd.f32 %v2368_v54, %v2191_v27  ;;  %v8047_v60 = vpop.f32.mrb[102].mxu0  ;;  %v9868_v58 = vpop.f32.mrb[108].mxu1 }
 0x1ed   : > { %v9856_v37 = vadd.f32 %v2377_v16, %v9515_v44  ;;  %v2380_v22 = vadd.f32 %v8047_v60, %v2202_v18  ;;  %v2371_v31 = vpop.f32.mrb[103].mxu0  ;;  %v2935_v53 = vpop.f32.mrb[109].mxu1 }
 0x1ee   : > { %v9859_v36 = vadd.f32 %v2369_v3, %v9498_v29  ;;  %v2372_v0 = vadd.f32 %v2371_v31, %v9810_v13  ;;  %v9870_v16 = vpop.f32.mrb[110].mxu1 }
 0x1ef   : > { %v9863_v63 = vadd.f32 %v2380_v22, %v9520_v14  ;;  %v2938_v29 = vpop.f32.mrb[111].mxu1 }
 0x1f0   : > { %v9866_v34 = vadd.f32 %v2372_v0, %v9502_v9  ;;  %v11572_v29 = vld [vmem:[#allocation9_spill] sm:$0xff] }
 0x1f2   : > { %v8050_v27 = vpop.f32.mrb[104].mxu0 }
 0x1f3   : > { %v2393_v2 = vadd.f32 %v8050_v27, %v2215_v4  ;;  %v2384_v44 = vpop.f32.mrb[105].mxu0 }
 0x1f4   : > { %v2385_v18 = vadd.f32 %v2384_v44, %v2207_v47  ;;  %v8051_v54 = vpop.f32.mrb[106].mxu0  ;;  %v9884_v22 = vpop.f32.mrb[112].mxu1  ;;  %v11571_v44 = vld [vmem:[#allocation6_spill] sm:$0xff] }
 0x1f5   : > { %v9873_v3 = vadd.f32 %v2393_v2, %v9556_v26  ;;  %v2396_v13 = vadd.f32 %v8051_v54, %v2218_v45  ;;  %v2387_v14 = vpop.f32.mrb[107].mxu0  ;;  %v2943_v31 = vpop.f32.mrb[113].mxu1 }
 0x1f6   : > { %v9876_v60 = vadd.f32 %v2385_v18, %v9533_v30  ;;  %v2388_v9 = vadd.f32 %v2387_v14, %v2210_v1  ;;  %v9887_v27 = vpop.f32.mrb[114].mxu1  ;;  %v11570_v1 = vld [vmem:[#allocation8_spill] sm:$0xff] }
 0x1f7   : > { %v9879_v61 = vadd.f32 %v2396_v13, %v9562_v39  ;;  %v2946_v53 = vpop.f32.mrb[115].mxu1  ;;  %v11573_v13 = vld [vmem:[#allocation7_spill] sm:$0xff] }
 0x1f8   : > { %v9882_v4 = vadd.f32 %v2388_v9, %v9538_v42 }
 0x1fa   : > { %v8054_v47 = vpop.f32.mrb[108].mxu0 }
 0x1fb   : > { %v2409_v0 = vadd.f32 %v8054_v47, %v9623_v5  ;;  %v2400_v26 = vpop.f32.mrb[109].mxu0 }
 0x1fc   : > { %v2401_v45 = vadd.f32 %v2400_v26, %v9609_v21  ;;  %v8055_v30 = vpop.f32.mrb[110].mxu0  ;;  %v9904_v21 = vpop.f32.mrb[116].mxu1 }
 0x1fd   : > { %v9891_v2 = vadd.f32 %v2409_v0, %v11570_v1  ;;  %v2412_v39 = vadd.f32 %v8055_v30, %v9628_v46  ;;  %v2403_v42 = vpop.f32.mrb[111].mxu0  ;;  %v2951_v47 = vpop.f32.mrb[117].mxu1 }
 0x1fe   : > { %v9895_v18 = vadd.f32 %v2401_v45, %v11571_v44  ;;  %v2404_v54 = vadd.f32 %v2403_v42, %v9614_v43  ;;  %v9907_v46 = vpop.f32.mrb[118].mxu1 }
 0x1ff   : > { %v9899_v5 = vadd.f32 %v2412_v39, %v11572_v29  ;;  %v2954_v30 = vpop.f32.mrb[119].mxu1 }
 0x200   : > { %v9902_v14 = vadd.f32 %v2404_v54, %v11573_v13 }
 0x202   : > { %v8058_v9 = vpop.f32.mrb[112].mxu0 }
 0x203   : > { %v2425_v31 = vadd.f32 %v8058_v9, %v9656_v19  ;;  %v2416_v0 = vpop.f32.mrb[113].mxu0 }
 0x204   : > { %v2417_v26 = vadd.f32 %v2416_v0, %v9640_v56  ;;  %v8059_v45 = vpop.f32.mrb[114].mxu0  ;;  %v9924_v56 = vpop.f32.mrb[120].mxu1 }
 0x205   : > { %v9911_v43 = vadd.f32 %v2425_v31, %v9626_v8  ;;  %v2428_v53 = vadd.f32 %v8059_v45, %v9661_v50  ;;  %v2419_v1 = vpop.f32.mrb[115].mxu0  ;;  %v2959_v29 = vpop.f32.mrb[121].mxu1 }
 0x206   : > { %v9915_v39 = vadd.f32 %v2417_v26, %v9612_v40  ;;  %v2420_v42 = vadd.f32 %v2419_v1, %v9646_v24  ;;  %v9927_v50 = vpop.f32.mrb[122].mxu1 }
 0x207   : > { %v9919_v19 = vadd.f32 %v2428_v53, %v9632_v41  ;;  %v2962_v47 = vpop.f32.mrb[123].mxu1 }
 0x208   : > { %v9922_v44 = vadd.f32 %v2420_v42, %v9617_v35  ;;  %v11580_v47 = vld [vmem:[#allocation21_spill] sm:$0xff] }
 0x20a   : > { %v8062_v54 = vpop.f32.mrb[116].mxu0 }
 0x20b   : > { %v2441_v8 = vadd.f32 %v8062_v54, %v9683_v20  ;;  %v2432_v13 = vpop.f32.mrb[117].mxu0 }
 0x20c   : > { %v2433_v40 = vadd.f32 %v2432_v13, %v9671_v15  ;;  %v8063_v9 = vpop.f32.mrb[118].mxu0  ;;  %v9944_v15 = vpop.f32.mrb[124].mxu1  ;;  %v11578_v13 = vld [vmem:[#allocation11_spill] sm:$0xff] }
 0x20d   : > { %v9931_v24 = vadd.f32 %v2441_v8, %v9659_v62  ;;  %v2444_v41 = vadd.f32 %v8063_v9, %v9689_v49  ;;  %v2435_v35 = vpop.f32.mrb[119].mxu0  ;;  %v2967_v30 = vpop.f32.mrb[125].mxu1  ;;  %v11576_v8 = vld [vmem:[#allocation12_spill] sm:$0xff] }
 0x20e   : > { %v9935_v31 = vadd.f32 %v2433_v40, %v9644_v52  ;;  %v2436_v0 = vadd.f32 %v2435_v35, %v9676_v25  ;;  %v9947_v49 = vpop.f32.mrb[126].mxu1 }
 0x20f   : > { %v9939_v20 = vadd.f32 %v2444_v41, %v9664_v32  ;;  %v2970_v42 = vpop.f32.mrb[127].mxu1 }
 0x210   : > { %v9942_v26 = vadd.f32 %v2436_v0, %v9649_v28  ;;  %v11581_v0 = vld [vmem:[#allocation17_spill] sm:$0xff] }
 0x212   : > { %v8066_v45 = vpop.f32.mrb[120].mxu0 }
 0x213   : > { %v2457_v62 = vadd.f32 %v8066_v45, %v9717_v48  ;;  %v2448_v53 = vpop.f32.mrb[121].mxu0 }
 0x214   : > { %v2449_v52 = vadd.f32 %v2448_v53, %v9697_v38  ;;  %v8067_v1 = vpop.f32.mrb[122].mxu0  ;;  %v9964_v38 = vpop.f32.mrb[128].mxu1  ;;  %v11582_v53 = vld [vmem:[#allocation15_spill] sm:$0xff] }
 0x215   : > { %v9951_v25 = vadd.f32 %v2457_v62, %v9686_v10  ;;  %v2460_v32 = vadd.f32 %v8067_v1, %v9726_v6  ;;  %v2451_v28 = vpop.f32.mrb[123].mxu0  ;;  %v8702_v10 = vld [vmem:[%s11527_s2 + $0x1c0] sm:$0xff]   ;;  %v2975_v9 = vpop.f32.mrb[129].mxu1  ;;  %v11584_v1 = vld [vmem:[#allocation23_spill] sm:$0xff] }
 0x216   : > { %v9955_v54 = vadd.f32 %v2449_v52, %v9674_v59  ;;  %v2452_v29 = vadd.f32 %v2451_v28, %v9702_v12  ;;  %v8703_v6 = vld [vmem:[%s11527_s2 + $0x180] sm:$0xff]   ;;  %v9973_v35 = vpop.f32.mrb[130].mxu1  ;;  %7836 = vmatprep.subr.bf16.mxu0 %v8702_v10  ;;  %v11585_v28 = vld [vmem:[#allocation13_spill] sm:$0xff]  ;;  %v11590_v10 = vld [vmem:[#allocation14_spill] sm:$0xff] }
 0x217   : > { %11574 = vst [vmem:[#allocation8_spill] sm:$0xff] %v9951_v25  ;;  %v9959_v48 = vadd.f32 %v2460_v32, %v11576_v8  ;;  %v2978_v62 = vpop.f32.mrb[131].mxu1  ;;  %7837 = vmatpush3.bf16.msra.mxu0 %v8703_v6  ;;  %v11587_v8 = vld [vmem:[#allocation19_spill] sm:$0xff] }
 0x218   : > { %11575 = vst [vmem:[#allocation6_spill] sm:$0xff] %v9955_v54  ;;  %v9962_v40 = vadd.f32 %v2452_v29, %v11578_v13 }
 0x219   : > { %11577 = vst [vmem:[#allocation9_spill] sm:$0xff] %v9959_v48 }
 0x21a   : > { %11579 = vst [vmem:[#allocation7_spill] sm:$0xff] %v9962_v40  ;;  %v8070_v59 = vpop.f32.mrb[124].mxu0 }
 0x21b   : > { %v2473_v12 = vadd.f32 %v8070_v59, %v11580_v47  ;;  %v2464_v41 = vpop.f32.mrb[125].mxu0  ;;  %v11588_v59 = vld [vmem:[#allocation16_spill] sm:$0xff] }
 0x21c   : > { %v2465_v45 = vadd.f32 %v2464_v41, %v11581_v0  ;;  %v8071_v30 = vpop.f32.mrb[126].mxu0  ;;  %v9990_v41 = vpop.f32.mrb[132].mxu1 }
 0x21d   : > { %v9977_v52 = vadd.f32 %v2473_v12, %v11582_v53  ;;  %v2476_v42 = vadd.f32 %v8071_v30, %v11584_v1  ;;  %v2467_v32 = vpop.f32.mrb[127].mxu0  ;;  %11592 = vst [vmem:[#allocation15_spill] sm:$0xff] %v9990_v41  ;;  %v2983_v0 = vpop.f32.mrb[133].mxu1  ;;  %v11593_v12 = vld [vmem:[#allocation27_spill] sm:$0xff]  ;;  %v11595_v1 = vld [vmem:[#allocation25_spill] sm:$0xff] }
 0x21e   : > { %v9981_v29 = vadd.f32 %v2465_v45, %v11585_v28  ;;  %v2468_v13 = vadd.f32 %v2467_v32, %v11587_v8  ;;  %v9993_v30 = vpop.f32.mrb[134].mxu1  ;;  %v11596_v32 = vld [vmem:[#allocation22_spill] sm:$0xff] }
 0x21f   : > { %11583 = vst [vmem:[#allocation12_spill] sm:$0xff] %v9977_v52  ;;  %v9985_v9 = vadd.f32 %v2476_v42, %v11588_v59  ;;  %11594 = vst [vmem:[#allocation23_spill] sm:$0xff] %v9993_v30  ;;  %v11598_v42 = vld [vmem:[#allocation28_spill] sm:$0xff] }
 0x220   : > { %11586 = vst [vmem:[#allocation11_spill] sm:$0xff] %v9981_v29  ;;  %v9988_v47 = vadd.f32 %v2468_v13, %v11590_v10  ;;  %v2986_v29 = vpop.f32.mrb[135].mxu1  ;;  %v11599_v10 = vld [vmem:[#allocation18_spill] sm:$0xff]  ;;  %v11602_v52 = vld [vmem:[#allocation24_spill] sm:$0xff] }
 0x221   : > { %11589 = vst [vmem:[#allocation21_spill] sm:$0xff] %v9985_v9  ;;  %v11601_v9 = vld [vmem:[#allocation26_spill] sm:$0xff]  ;;  %v8705_v29 = vld [vmem:[%s11527_s2 + $0x1c8] sm:$0xff]  }
 0x222   : > { %11591 = vst [vmem:[#allocation17_spill] sm:$0xff] %v9988_v47  ;;  %v8074_v6 = vpop.f32.mrb[128].mxu0  ;;  %7838 = vmatprep.subr.bf16.mxu0 %v8705_v29 }
 0x223   : > { %v2489_v62 = vadd.f32 %v8074_v6, %v11593_v12  ;;  %v2480_v53 = vpop.f32.mrb[129].mxu0  ;;  %v11604_v12 = vld [vmem:[#allocation20_spill] sm:$0xff] }
 0x224   : > { %v2481_v45 = vadd.f32 %v2480_v53, %v11595_v1  ;;  %v8075_v28 = vpop.f32.mrb[130].mxu0  ;;  %v10010_v53 = vpop.f32.mrb[136].mxu1 }
 0x225   : > { %v9997_v8 = vadd.f32 %v2489_v62, %v11596_v32  ;;  %v2492_v59 = vadd.f32 %v8075_v28, %v11598_v42  ;;  %v2483_v13 = vpop.f32.mrb[131].mxu0  ;;  %11606 = vst [vmem:[#allocation27_spill] sm:$0xff] %v10010_v53  ;;  %v8706_v62 = vld [vmem:[%s11527_s2 + $0x188] sm:$0xff]   ;;  %v11607_v28 = vld [vmem:[#allocation31_spill] sm:$0xff]  ;;  %v10024_v42 = vld [vmem:[%s11528_s3] ss:$0 sm:$0xff] }
 0x226   : > { %v10001_v47 = vadd.f32 %v2481_v45, %v11599_v10  ;;  %v2484_v0 = vadd.f32 %v2483_v13, %v11601_v9  ;;  %v2991_v45 = vpop.f32.mrb[137].mxu1  ;;  %7839 = vmatpush3.bf16.msra.mxu0 %v8706_v62 }
 0x227   : > { %11597 = vst [vmem:[#allocation13_spill] sm:$0xff] %v9997_v8  ;;  %v10005_v6 = vadd.f32 %v2492_v59, %v11602_v52  ;;  %v10019_v52 = vpop.f32.mrb[138].mxu1  ;;  %v11609_v59 = vld [vmem:[#allocation29_spill] sm:$0xff] }
 0x228   : > { %11600 = vst [vmem:[#allocation19_spill] sm:$0xff] %v10001_v47  ;;  %v10008_v40 = vadd.f32 %v2484_v0, %v11604_v12  ;;  %11608 = vst [vmem:[#allocation25_spill] sm:$0xff] %v10019_v52  ;;  %v2994_v0 = vpop.f32.mrb[139].mxu1 }
 0x229   : > { %11603 = vst [vmem:[#allocation16_spill] sm:$0xff] %v10005_v6 }
 0x22a   : > { %11605 = vst [vmem:[#allocation14_spill] sm:$0xff] %v10008_v40  ;;  %v8094_v1 = vpop.f32.mrb[132].mxu0  ;;  %v11610_v40 = vld [vmem:[#allocation32_spill] sm:$0xff] }
 0x22b   : > { %v3071_v9 = vadd.f32 %v8094_v1, %v11607_v28  ;;  %v3062_v32 = vpop.f32.mrb[133].mxu0  ;;  %v11611_v28 = vld [vmem:[#allocation30_spill] sm:$0xff] }
 0x22c   : > { %v3063_v13 = vadd.f32 %v3062_v32, %v11609_v59  ;;  %v8095_v10 = vpop.f32.mrb[134].mxu0  ;;  %v10036_v62 = vpop.f32.mrb[140].mxu1 }
 0x22d   : > { %v3243_v12 = vadd.f32 %v3071_v9, %v9839_v51  ;;  %v3074_v45 = vadd.f32 %v8095_v10, %v11610_v40  ;;  %v3065_v6 = vpop.f32.mrb[135].mxu0  ;;  %11612 = vst [vmem:[#allocation22_spill] sm:$0xff] %v10036_v62  ;;  %v2999_v9 = vpop.f32.mrb[141].mxu1 }
 0x22e   : > { %v3241_v1 = vadd.f32 %v3063_v13, %v9842_v23  ;;  %v3066_v47 = vadd.f32 %v3065_v6, %v11611_v28  ;;  %v10040_v0 = vpop.f32.mrb[142].mxu1 }
 0x22f   : > { %v3358_v29 = vadd.f32 %v10024_v42, %v3243_v12  ;;  %v3244_v8 = vadd.f32 %v3074_v45, %v9846_v7  ;;  %11613 = vst [vmem:[#allocation28_spill] sm:$0xff] %v10040_v0  ;;  %v11614_v45 = vld [vmem:[#allocation33_spill] sm:$0xff] }
 0x230   : > { %v3356_v48 = vadd.f32 %v10024_v42, %v3241_v1  ;;  %v3242_v32 = vadd.f32 %v3066_v47, %v9849_v33  ;;  %v3002_v47 = vpop.f32.mrb[143].mxu1 }
 0x231   : > { %v3359_v59 = vadd.f32 %v10024_v42, %v3244_v8  ;;  %v3394_v10 = vmax.f32 %v3358_v29, 0.0 }
 0x232   : > { %v3357_v51 = vadd.f32 %v10024_v42, %v3242_v32  ;;  %v8098_v40 = vpop.f32.mrb[136].mxu0  ;;  %v3392_v7 = vmax.f32 %v3356_v48, 0.0  ;;  %v11615_v32 = vld [vmem:[#allocation35_spill] sm:$0xff] }
 0x233   : > { %v3395_v23 = vmax.f32 %v3359_v59, 0.0  ;;  %v3087_v6 = vadd.f32 %v8098_v40, %v9826_v11  ;;  %v3078_v13 = vpop.f32.mrb[137].mxu0  ;;  %v11616_v59 = vld [vmem:[#allocation34_spill] sm:$0xff] }
 0x234   : > { %v3393_v12 = vmax.f32 %v3357_v51, 0.0  ;;  %v3079_v1 = vadd.f32 %v3078_v13, %v11614_v45  ;;  %v8099_v33 = vpop.f32.mrb[138].mxu0 }
 0x235   : > { %v3429_v8 = vpack.c.bf16 %v3395_v23, %v3394_v10  ;;  %v3247_v28 = vadd.f32 %v3087_v6, %v9856_v37  ;;  %v3090_v62 = vadd.f32 %v8099_v33, %v11615_v32  ;;  %v3081_v9 = vpop.f32.mrb[139].mxu0  ;;  %v10052_v33 = vpop.f32.mrb[144].mxu1 }
 0x236   : > { %v3428_v29 = vpack.c.bf16 %v3393_v12, %v3392_v7  ;;  %v3245_v11 = vadd.f32 %v3079_v1, %v9859_v36  ;;  %v3082_v40 = vadd.f32 %v3081_v9, %v11616_v59  ;;  %11617 = vst [vmem:[#allocation18_spill] sm:$0xff] %v10052_v33 }
 0x237   : > { %3447 = vst [vmem:[#allocation3 + $0x20] sm:$0xff] %v3429_v8  ;;  %v3490_v48 = vshrl.u32 %v3429_v8, 16  ;;  %v3493_v51 = vshll.u32 %v3429_v8, 16  ;;  %v3362_v13 = vadd.f32 %v10024_v42, %v3247_v28  ;;  %v3248_v45 = vadd.f32 %v3090_v62, %v9863_v63  ;;  %4305 = vmatprep.mubr.bf16.mxu0 %v3429_v8  ;;  %v8708_v63 = vld [vmem:[%s11527_s2 + $0x1d0] sm:$0xff]  }
 0x238   : > { %v3483_v10 = vshrl.u32 %v3428_v29, 16  ;;  %v3486_v23 = vshll.u32 %v3428_v29, 16  ;;  %v3360_v37 = vadd.f32 %v10024_v42, %v3245_v11  ;;  %v3246_v6 = vadd.f32 %v3082_v40, %v9866_v34  ;;  %v8709_v62 = vld [vmem:[%s11527_s2 + $0x190] sm:$0xff]   ;;  %v3849_v29 = vld [vmem:[#allocation3 + $0x28] sm:$0xff]  ;;  %v3007_v11 = vpop.f32.mrb[145].mxu1  ;;  %7840 = vmatprep.subr.bf16.mxu0 %v8708_v63  ;;  %v3632_v63 = vld [vmem:[#allocation3 + $0x18] sm:$0xff] }
 0x239   : > { %v3492_v7 = vrot.slane %v3490_v48, 7  ;;  %v3713_v36 = vrot.slane %v3493_v51, 1  ;;  %v3398_v12 = vmax.f32 %v3362_v13, 0.0  ;;  %v3363_v1 = vadd.f32 %v10024_v42, %v3248_v45  ;;  %v3629_v13 = vld [vmem:[#allocation3] sm:$0xff]  ;;  %v3846_v45 = vld [vmem:[#allocation3 + $0x10] sm:$0xff]  ;;  %7841 = vmatpush3.bf16.msra.mxu0 %v8709_v62 }
 0x23a   : > { %v3485_v47 = vrot.slane %v3483_v10, 7  ;;  %v3706_v8 = vrot.slane %v3486_v23, 1  ;;  %v3396_v28 = vmax.f32 %v3360_v37, 0.0  ;;  %v3361_v32 = vadd.f32 %v10024_v42, %v3246_v6  ;;  %v8102_v9 = vpop.f32.mrb[140].mxu0  ;;  %v10074_v37 = vpop.f32.mrb[146].mxu1 }
 0x23b   : > { %v3714_v59 = vor.u32 %v3713_v36, %v3490_v48  ;;  %v3399_v0 = vmax.f32 %v3363_v1, 0.0  ;;  %v3103_v33 = vadd.f32 %v8102_v9, %v9851_v55  ;;  %v3094_v30 = vpop.f32.mrb[141].mxu0  ;;  %v3495_v54 = vor.u32 %v3493_v51, %v3492_v7  ;;  %v3010_v52 = vpop.f32.mrb[147].mxu1 }
 0x23c   : > { %v3488_v6 = vor.u32 %v3486_v23, %v3485_v47  ;;  %v3707_v25 = vor.u32 %v3706_v8, %v3483_v10  ;;  %v3397_v11 = vmax.f32 %v3361_v32, 0.0  ;;  %v3095_v48 = vadd.f32 %v3094_v30, %v9830_v17  ;;  %v8103_v36 = vpop.f32.mrb[142].mxu0 }
 0x23d   : > { %v10077_v41 = vpack.c.bf16 %v3399_v0, %v3398_v12  ;;  %v3251_v53 = vadd.f32 %v3103_v33, %v9873_v3  ;;  %v3106_v1 = vadd.f32 %v8103_v36, %v9853_v57  ;;  %v3097_v55 = vpop.f32.mrb[143].mxu0  ;;  %v3850_v51 = vsel %vm10062_vm8, %v3714_v59, %v3849_v29  ;;  %v11622_v12 = vld [vmem:[#allocation36_spill] sm:$0xff] }
 0x23e   : > { %v3630_v23 = vsel %vm10069_vm9, %v3488_v6, %v3629_v13  ;;  %v3847_v10 = vsel %vm10062_vm8, %v3707_v25, %v3846_v45  ;;  %v10087_v17 = vpack.c.bf16 %v3397_v11, %v3396_v28  ;;  %v3249_v30 = vadd.f32 %v3095_v48, %v9876_v60  ;;  %3851 = vst [vmem:[#allocation3 + $0x28] sm:$0xff] %v3850_v51  ;;  %v3855_v13 = vld [vmem:[#allocation3 + $0x58] sm:$0xff] }
 0x23f   : > { %3631 = vst [vmem:[#allocation3] sm:$0xff] %v3630_v23  ;;  %3848 = vst [vmem:[#allocation3 + $0x10] sm:$0xff] %v3847_v10  ;;  %v3504_v57 = vshrl.u32 %v10077_v41, 16  ;;  %v3507_v3 = vshll.u32 %v10077_v41, 16  ;;  %v3366_v52 = vadd.f32 %v10024_v42, %v3251_v53  ;;  %v3252_v0 = vadd.f32 %v3106_v1, %v9879_v61  ;;  %v10105_v61 = vpop.f32.mrb[148].mxu1 }
 0x240   : > { %3449 = vst [vmem:[#allocation3 + $0x50] sm:$0xff] %v10077_v41  ;;  %3448 = vst [vmem:[#allocation3 + $0x38] sm:$0xff] %v10087_v17  ;;  %v3497_v25 = vshrl.u32 %v10087_v17, 16  ;;  %v3500_v7 = vshll.u32 %v10087_v17, 16  ;;  %v3364_v60 = vadd.f32 %v10024_v42, %v3249_v30  ;;  %v3098_v33 = vadd.f32 %v3097_v55, %v11622_v12  ;;  %v3015_v45 = vpop.f32.mrb[149].mxu1 }
 0x241   : > { %v10100_v62 = vrot.slane %v3504_v57, 7  ;;  %v3727_v47 = vrot.slane %v3507_v3, 1  ;;  %v3402_v8 = vmax.f32 %v3366_v52, 0.0  ;;  %v3367_v53 = vadd.f32 %v10024_v42, %v3252_v0  ;;  %v10117_v51 = vpop.f32.mrb[150].mxu1  ;;  %v3635_v45 = vld [vmem:[#allocation3 + $0x30] sm:$0xff] }
 0x242   : > { %v3499_v28 = vrot.slane %v3497_v25, 7  ;;  %v3720_v32 = vrot.slane %v3500_v7, 1  ;;  %v3400_v9 = vmax.f32 %v3364_v60, 0.0  ;;  %v3250_v29 = vadd.f32 %v3098_v33, %v9882_v4  ;;  %v8106_v59 = vpop.f32.mrb[144].mxu0 }
 0x243   : > { %v3403_v11 = vmax.f32 %v3367_v53, 0.0  ;;  %v3119_v48 = vadd.f32 %v8106_v59, %v9884_v22  ;;  %v3110_v36 = vpop.f32.mrb[145].mxu0  ;;  %v3633_v1 = vsel %vm10069_vm9, %v3495_v54, %v3632_v63  ;;  %v3728_v55 = vor.u32 %v3727_v47, %v3504_v57  ;;  %v3018_v22 = vpop.f32.mrb[151].mxu1  ;;  %v3852_v63 = vld [vmem:[#allocation3 + $0x40] sm:$0xff] }
 0x244   : > { %v3365_v23 = vadd.f32 %v10024_v42, %v3250_v29  ;;  %v3111_v10 = vadd.f32 %v3110_v36, %v9868_v58  ;;  %v8107_v30 = vpop.f32.mrb[146].mxu0  ;;  %v3721_v52 = vor.u32 %v3720_v32, %v3497_v25  ;;  %3634 = vst [vmem:[#allocation3 + $0x18] sm:$0xff] %v3633_v1  ;;  %v3502_v0 = vor.u32 %v3500_v7, %v3499_v28 }
 0x245   : > { %v10127_v60 = vpack.c.bf16 %v3403_v11, %v3402_v8  ;;  %v3255_v54 = vadd.f32 %v3119_v48, %v9891_v2  ;;  %v3122_v57 = vadd.f32 %v8107_v30, %v9887_v27  ;;  %v3113_v12 = vpop.f32.mrb[147].mxu0  ;;  %v3967_v33 = vld [vmem:[#allocation3 + $0x28] sm:$0x80]  ;;  %v3856_v47 = vsel %vm10062_vm8, %v3728_v55, %v3855_v13  ;;  %v11627_v11 = vld [vmem:[#allocation10_spill] sm:$0xff]  ;;  %v10160_v55 = vpop.f32.mrb[152].mxu1 }
 0x246   : > { %v3907_v53 = vld [vmem:[#allocation3] sm:$0x1]  ;;  %v3964_v29 = vld [vmem:[#allocation3 + $0x10] sm:$0x80]  ;;  %v3401_v58 = vmax.f32 %v3365_v23, 0.0  ;;  %v3253_v25 = vadd.f32 %v3111_v10, %v9895_v18  ;;  %v3114_v32 = vadd.f32 %v3113_v12, %v9870_v16  ;;  %v3968_v7 = vsel %vm10110_vm10, 0, %v3967_v33 }
 0x247   : > { %3857 = vst [vmem:[#allocation3 + $0x58] sm:$0xff] %v3856_v47  ;;  %v3908_v27 = vsel %vm10121_vm11, 0, %v3907_v53  ;;  %v3965_v2 = vsel %vm10110_vm10, 0, %v3964_v29  ;;  %3451 = vst [vmem:[#allocation3 + $0x80] sm:$0xff] %v10127_v60  ;;  %v3518_v8 = vshrl.u32 %v10127_v60, 16  ;;  %v3521_v28 = vshll.u32 %v10127_v60, 16 }
 0x248   : > { %3969 = vst [vmem:[#allocation3 + $0x28] sm:$0x80] %v3968_v7  ;;  %3909 = vst [vmem:[#allocation3] sm:$0x1] %v3908_v27  ;;  %v10144_v16 = vpack.c.bf16 %v3401_v58, %v3400_v9  ;;  %v3370_v18 = vadd.f32 %v10024_v42, %v3255_v54  ;;  %v3368_v59 = vadd.f32 %v10024_v42, %v3253_v25  ;;  %v8712_v23 = vld [vmem:[%s11527_s2 + $0x198] sm:$0xff]   ;;  %v3858_v53 = vld [vmem:[#allocation3 + $0x70] sm:$0xff] }
 0x249   : > { %3966 = vst [vmem:[#allocation3 + $0x10] sm:$0x80] %v3965_v2  ;;  %v3256_v13 = vadd.f32 %v3122_v57, %v9899_v5  ;;  %4018 = vst [vmem:[#allocation3] sm:$0xff] %v11627_v11  ;;  %v10153_v48 = vrot.slane %v3518_v8, 7  ;;  %v3741_v36 = vrot.slane %v3521_v28, 1  ;;  %v3254_v9 = vadd.f32 %v3114_v32, %v9902_v14  ;;  %v8711_v5 = vld [vmem:[%s11527_s2 + $0x1d8] sm:$0xff]  }
 0x24a   : > { %4020 = vst [vmem:[#allocation3 + $0x10] sm:$0xff] %v11627_v11  ;;  %v3853_v1 = vsel %vm10062_vm8, %v3721_v52, %v3852_v63  ;;  %3450 = vst [vmem:[#allocation3 + $0x68] sm:$0xff] %v10144_v16  ;;  %v3511_v10 = vshrl.u32 %v10144_v16, 16  ;;  %v3514_v30 = vshll.u32 %v10144_v16, 16  ;;  %v3406_v14 = vmax.f32 %v3370_v18, 0.0  ;;  %v8110_v54 = vpop.f32.mrb[148].mxu0  ;;  %7842 = vmatprep.subr.bf16.mxu0 %v8711_v5 }
 0x24b   : > { %v3404_v22 = vmax.f32 %v3368_v59, 0.0  ;;  %3854 = vst [vmem:[#allocation3 + $0x40] sm:$0xff] %v3853_v1  ;;  %v3023_v52 = vpop.f32.mrb[153].mxu1  ;;  %v3371_v57 = vadd.f32 %v10024_v42, %v3256_v13  ;;  %v3369_v12 = vadd.f32 %v10024_v42, %v3254_v9  ;;  %v3135_v33 = vadd.f32 %v8110_v54, %v9924_v56  ;;  %v3126_v63 = vpop.f32.mrb[149].mxu0  ;;  %v3910_v47 = vld [vmem:[#allocation3 + $0x18] sm:$0x1]  ;;  %7843 = vmatpush3.bf16.msra.mxu0 %v8712_v23 }
 0x24c   : > { %v3636_v29 = vsel %vm10069_vm9, %v3502_v0, %v3635_v45  ;;  %v10176_v58 = vpop.f32.mrb[154].mxu1  ;;  %v10178_v25 = vrot.slane %v3511_v10, 7  ;;  %v3734_v32 = vrot.slane %v3514_v30, 1  ;;  %v3127_v7 = vadd.f32 %v3126_v63, %v9904_v21  ;;  %v8111_v27 = vpop.f32.mrb[150].mxu0  ;;  %v8687_v56 = vld [vmem:[%s11527_s2 + $0xc0] sm:$0xff]   ;;  %v8688_v9 = vld [vmem:[%s11527_s2 + $0x108] sm:$0xff]  }
 0x24d   : > { %v3911_v2 = vsel %vm10121_vm11, 0, %v3910_v47  ;;  %3637 = vst [vmem:[#allocation3 + $0x30] sm:$0xff] %v3636_v29  ;;  %v3026_v0 = vpop.f32.mrb[155].mxu1  ;;  %v3407_v18 = vmax.f32 %v3371_v57, 0.0  ;;  %v3405_v59 = vmax.f32 %v3369_v12, 0.0  ;;  %v3259_v13 = vadd.f32 %v3135_v33, %v9911_v43  ;;  %v3129_v11 = vpop.f32.mrb[151].mxu0 }
 0x24e   : > { %v3138_v45 = vadd.f32 %v8111_v27, %v9927_v50  ;;  %3912 = vst [vmem:[#allocation3 + $0x18] sm:$0x1] %v3911_v2  ;;  %v3973_v21 = vld [vmem:[#allocation3 + $0x58] sm:$0x80]  ;;  %v3257_v1 = vadd.f32 %v3127_v7, %v9915_v39  ;;  %v3130_v5 = vadd.f32 %v3129_v11, %v9907_v46  ;;  %v3735_v52 = vor.u32 %v3734_v32, %v3511_v10  ;;  %v8713_v39 = vld [vmem:[%s11527_s2 + $0x1e0] sm:$0xff]   ;;  %v8689_v10 = vld [vmem:[%s11527_s2 + $0xc8] sm:$0xff]  }
 0x24f   : > { %v4030_v54 = vld [vmem:[#allocation3 + $0x28] sm:$0xff]  ;;  %v3974_v23 = vsel %vm10110_vm10, 0, %v3973_v21  ;;  %v10197_v57 = vpack.c.bf16 %v3407_v18, %v3406_v14  ;;  %v10199_v43 = vpack.c.bf16 %v3405_v59, %v3404_v22  ;;  %v3374_v50 = vadd.f32 %v10024_v42, %v3259_v13  ;;  %v8715_v22 = vld [vmem:[%s11527_s2 + $0x1a0] sm:$0xff]   ;;  %7844 = vmatprep.subr.bf16.mxu0 %v8713_v39  ;;  %v8691_v0 = vld [vmem:[%s11527_s2 + $0xd0] sm:$0xff]  }
 0x250   : > { %v3260_v12 = vadd.f32 %v3138_v45, %v9919_v19  ;;  %8145 = vmatmul.mubr.bf16.vlgmr.msra.gmra.mrb[156].mxu1 %v4030_v54  ;;  %3975 = vst [vmem:[#allocation3 + $0x58] sm:$0x80] %v3974_v23  ;;  %v3372_v46 = vadd.f32 %v10024_v42, %v3257_v1  ;;  %v3258_v33 = vadd.f32 %v3130_v5, %v9922_v44  ;;  %v8716_v18 = vld [vmem:[%s11527_s2 + $0x1e8] sm:$0xff]  }
 0x251   : > { %7701 = vmatpush3.bf16.msra.mxu1 %v8687_v56  ;;  %v3859_v14 = vsel %vm10062_vm8, %v3735_v52, %v3858_v53  ;;  %v3742_v19 = vor.u32 %v3741_v36, %v3518_v8  ;;  %3453 = vst [vmem:[#allocation3 + $0xb0] sm:$0xff] %v10197_v57  ;;  %v3532_v63 = vshrl.u32 %v10197_v57, 16  ;;  %v3535_v44 = vshll.u32 %v10197_v57, 16  ;;  %3452 = vst [vmem:[#allocation3 + $0x98] sm:$0xff] %v10199_v43  ;;  %v3861_v53 = vld [vmem:[#allocation3 + $0x88] sm:$0xff]  ;;  %v8690_v8 = vld [vmem:[%s11527_s2 + $0x110] sm:$0xff]  }
 0x252   : > { %v3525_v47 = vshrl.u32 %v10199_v43, 16  ;;  %v3528_v29 = vshll.u32 %v10199_v43, 16  ;;  %7702 = vmatprep.subr.bf16.mxu1 %v8688_v9  ;;  %3860 = vst [vmem:[#allocation3 + $0x70] sm:$0xff] %v3859_v14  ;;  %v3410_v36 = vmax.f32 %v3374_v50, 0.0  ;;  %v3408_v32 = vmax.f32 %v3372_v46, 0.0  ;;  %v8114_v56 = vpop.f32.mrb[152].mxu0  ;;  %7845 = vmatpush3.bf16.msra.mxu0 %v8715_v22 }
 0x253   : > { %v3375_v7 = vadd.f32 %v10024_v42, %v3260_v12  ;;  %v3373_v27 = vadd.f32 %v10024_v42, %v3258_v33  ;;  %v3970_v2 = vld [vmem:[#allocation3 + $0x40] sm:$0x80]  ;;  %v10237_v59 = vrot.slane %v3532_v63, 7  ;;  %v10241_v13 = vrot.slane %v3535_v44, 1  ;;  %v3142_v21 = vpop.f32.mrb[153].mxu0  ;;  %v8717_v9 = vld [vmem:[%s11527_s2 + $0x1a8] sm:$0xff]   ;;  %7846 = vmatprep.subr.bf16.mxu0 %v8716_v18 }
 0x254   : > { %v10243_v45 = vrot.slane %v3525_v47, 7  ;;  %v3748_v11 = vrot.slane %v3528_v29, 1  ;;  %v3151_v54 = vadd.f32 %v8114_v56, %v9964_v38  ;;  %v3143_v23 = vadd.f32 %v3142_v21, %v9944_v15  ;;  %v8115_v52 = vpop.f32.mrb[154].mxu0  ;;  %v3913_v12 = vld [vmem:[#allocation3 + $0x30] sm:$0x1]  ;;  %v8692_v38 = vld [vmem:[%s11527_s2 + $0x118] sm:$0xff]  }
 0x255   : > { %v3411_v1 = vmax.f32 %v3375_v7, 0.0  ;;  %v3409_v5 = vmax.f32 %v3373_v27, 0.0  ;;  %v10252_v50 = vld [vmem:[#allocation3 + $0x18] sm:$0xff]  ;;  %7703 = vmatpush3.bf16.msra.mxu1 %v8689_v10  ;;  %v3154_v39 = vadd.f32 %v8115_v52, %v9973_v35  ;;  %v3145_v46 = vpop.f32.mrb[155].mxu0  ;;  %v3971_v33 = vsel %vm10110_vm10, 0, %v3970_v2 }
 0x256   : > { %4306 = vmatmul.mubr.bf16.gmra.mrb[172].mxu0 %v10252_v50  ;;  %v3914_v14 = vsel %vm10121_vm11, 0, %v3913_v12  ;;  %v3862_v15 = vsel %vm10062_vm8, %v3742_v19, %v3861_v53  ;;  %7704 = vmatprep.subr.bf16.mxu1 %v8690_v8  ;;  %v3263_v22 = vadd.f32 %v3151_v54, %v9931_v24  ;;  %v3261_v7 = vadd.f32 %v3143_v23, %v9935_v31  ;;  %v8718_v24 = vld [vmem:[%s11527_s2 + $0x1f0] sm:$0xff]   ;;  %v8720_v54 = vld [vmem:[%s11527_s2 + $0x1f8] sm:$0xff]  }
 0x257   : > { %v10265_v10 = vpack.c.bf16 %v3411_v1, %v3410_v36  ;;  %v10267_v35 = vpack.c.bf16 %v3409_v5, %v3408_v32  ;;  %3972 = vst [vmem:[#allocation3 + $0x40] sm:$0x80] %v3971_v33  ;;  %4313 = vmatprep.mubr.bf16.mxu0 %v10087_v17  ;;  %3915 = vst [vmem:[#allocation3 + $0x30] sm:$0x1] %v3914_v14  ;;  %v3264_v19 = vadd.f32 %v3154_v39, %v9939_v20  ;;  %v11628_v33 = vld [vmem:[#allocation27_spill] sm:$0xff] }
 0x258   : > { %3863 = vst [vmem:[#allocation3 + $0x88] sm:$0xff] %v3862_v15  ;;  %v3146_v53 = vadd.f32 %v3145_v46, %v9947_v49  ;;  %v3749_v8 = vor.u32 %v3748_v11, %v3525_v47  ;;  %v3509_v36 = vor.u32 %v3507_v3, %v10100_v62  ;;  %7847 = vmatpush3.bf16.msra.mxu0 %v8717_v9  ;;  %v3864_v47 = vld [vmem:[#allocation3 + $0xa0] sm:$0xff]  ;;  %v3638_v3 = vld [vmem:[#allocation3 + $0x48] sm:$0xff]  ;;  %v8693_v62 = vld [vmem:[%s11527_s2 + $0xd8] sm:$0xff]  }
 0x259   : > { %3455 = vst [vmem:[#allocation3 + $0xe0] sm:$0xff] %v10265_v10  ;;  %v3546_v31 = vshrl.u32 %v10265_v10, 16  ;;  %v11534_v17 = vshll.u32 %v10265_v10, 16  ;;  %3454 = vst [vmem:[#allocation3 + $0xc8] sm:$0xff] %v10267_v35  ;;  %v3539_v20 = vshrl.u32 %v10267_v35, 16  ;;  %v11538_v49 = vshll.u32 %v10267_v35, 16  ;;  %7705 = vmatpush3.bf16.msra.mxu1 %v8691_v0  ;;  %7848 = vmatprep.subr.bf16.mxu0 %v8718_v24 }
 0x25a   : > { %v3378_v32 = vadd.f32 %v10024_v42, %v3263_v22  ;;  %v3376_v27 = vadd.f32 %v10024_v42, %v3261_v7  ;;  %v3379_v56 = vadd.f32 %v10024_v42, %v3264_v19  ;;  %v3262_v2 = vadd.f32 %v3146_v53, %v9942_v26  ;;  %v3976_v18 = vld [vmem:[#allocation3 + $0x70] sm:$0x80]  ;;  %7706 = vmatprep.subr.bf16.mxu1 %v8692_v38  ;;  %v8694_v0 = vld [vmem:[%s11527_s2 + $0x120] sm:$0xff]   ;;  %v8118_v5 = vpop.f32.mrb[156].mxu0  ;;  %v11629_v15 = vld [vmem:[#allocation15_spill] sm:$0xff] }
 0x25b   : > { %v8719_v11 = vld [vmem:[%s11527_s2 + $0x1b0] sm:$0xff]   ;;  %v10301_v21 = vrot.slane %v3546_v31, 7  ;;  %v10305_v9 = vrot.slane %v11534_v17, 1  ;;  %v10309_v26 = vrot.slane %v3539_v20, 7  ;;  %v10313_v1 = vrot.slane %v11538_v49, 1  ;;  %v3158_v46 = vpop.f32.mrb[157].mxu0 }
 0x25c   : > { %v3414_v23 = vmax.f32 %v3378_v32, 0.0  ;;  %v3412_v52 = vmax.f32 %v3376_v27, 0.0  ;;  %v3415_v12 = vmax.f32 %v3379_v56, 0.0  ;;  %v3377_v39 = vadd.f32 %v10024_v42, %v3262_v2  ;;  %7849 = vmatpush3.bf16.msra.mxu0 %v8719_v11  ;;  %v8119_v22 = vpop.f32.mrb[158].mxu0  ;;  %v8695_v53 = vld [vmem:[%s11527_s2 + $0xe0] sm:$0xff]   ;;  %v8696_v24 = vld [vmem:[%s11527_s2 + $0x128] sm:$0xff]  }
 0x25d   : > { %v3167_v14 = vadd.f32 %v8118_v5, %v11628_v33  ;;  %v3159_v38 = vadd.f32 %v3158_v46, %v11629_v15  ;;  %v3977_v7 = vsel %vm10110_vm10, 0, %v3976_v18  ;;  %v3865_v19 = vsel %vm10062_vm8, %v3749_v8, %v3864_v47  ;;  %7707 = vmatpush3.bf16.msra.mxu1 %v8693_v62  ;;  %7850 = vmatprep.subr.bf16.mxu0 %v8720_v54  ;;  %v8721_v32 = vld [vmem:[%s11527_s2 + $0x1b8] sm:$0xff]   ;;  %v11630_v2 = vld [vmem:[#allocation25_spill] sm:$0xff]  ;;  %v3161_v8 = vpop.f32.mrb[159].mxu0  ;;  %v11631_v54 = vld [vmem:[#allocation8_spill] sm:$0xff] }
 0x25e   : > { %v10334_v27 = vpack.c.bf16 %v3415_v12, %v3414_v23  ;;  %v3413_v56 = vmax.f32 %v3377_v39, 0.0  ;;  %v3170_v18 = vadd.f32 %v8119_v22, %v11630_v2  ;;  %v4033_v47 = vld [vmem:[#allocation3 + $0x40] sm:$0xff]  ;;  %3978 = vst [vmem:[#allocation3 + $0x70] sm:$0x80] %v3977_v7  ;;  %v10337_v62 = vld [vmem:[#allocation3 + $0x30] sm:$0xff]  ;;  %3866 = vst [vmem:[#allocation3 + $0xa0] sm:$0xff] %v3865_v19  ;;  %v3639_v5 = vsel %vm10069_vm9, %v3509_v36, %v3638_v3 }
 0x25f   : > { %v3979_v11 = vld [vmem:[#allocation3 + $0x88] sm:$0x80]  ;;  %7708 = vmatprep.subr.bf16.mxu1 %v8694_v0  ;;  %v3267_v46 = vadd.f32 %v3167_v14, %v11631_v54  ;;  %v11632_v33 = vld [vmem:[#allocation6_spill] sm:$0xff]  ;;  %v11633_v23 = vld [vmem:[#allocation23_spill] sm:$0xff]  ;;  %8148 = vmatprep.mubr.bf16.mxu1 %v4033_v47  ;;  %3640 = vst [vmem:[#allocation3 + $0x48] sm:$0xff] %v3639_v5  ;;  %v3756_v47 = vor.u32 %v10241_v13, %v3532_v63 }
 0x260   : > { %v3265_v15 = vadd.f32 %v3159_v38, %v11632_v33  ;;  %v3162_v12 = vadd.f32 %v3161_v8, %v11633_v23  ;;  %v4036_v39 = vld [vmem:[#allocation3 + $0x58] sm:$0xff]  ;;  %4314 = vmatmul.mubr.bf16.gmra.mrb[176].mxu0 %v10337_v62  ;;  %v3980_v22 = vsel %vm10110_vm10, 0, %v3979_v11  ;;  %3457 = vst [vmem:[#allocation3 + $0x110] sm:$0xff] %v10334_v27  ;;  %v3560_v7 = vshrl.u32 %v10334_v27, 16  ;;  %v11634_v0 = vld [vmem:[#allocation9_spill] sm:$0xff]  ;;  %v8698_v13 = vld [vmem:[%s11527_s2 + $0x130] sm:$0xff]  }
 0x261   : > { %v11533_v36 = vshll.u32 %v10334_v27, 16  ;;  %v10350_v3 = vpack.c.bf16 %v3413_v56, %v3412_v52  ;;  %v3268_v14 = vadd.f32 %v3170_v18, %v11634_v0  ;;  %8149 = vmatmul.mubr.bf16.gmra.mrb[160].mxu1 %v4036_v39  ;;  %4321 = vmatprep.mubr.bf16.mxu0 %v10077_v41  ;;  %3981 = vst [vmem:[#allocation3 + $0x88] sm:$0x80] %v3980_v22  ;;  %v11635_v2 = vld [vmem:[#allocation7_spill] sm:$0xff]  ;;  %v8697_v52 = vld [vmem:[%s11527_s2 + $0xe8] sm:$0xff]   ;;  %v3870_v22 = vld [vmem:[#allocation3 + $0xd0] sm:$0xff] }
 0x262   : > { %v3382_v38 = vadd.f32 %v10024_v42, %v3267_v46  ;;  %v3380_v19 = vadd.f32 %v10024_v42, %v3265_v15  ;;  %v3266_v8 = vadd.f32 %v3162_v12, %v11635_v2  ;;  %v3867_v11 = vld [vmem:[#allocation3 + $0xb8] sm:$0xff]  ;;  %7709 = vmatpush3.bf16.msra.mxu1 %v8695_v53  ;;  %v10365_v41 = vrot.slane %v3560_v7, 7  ;;  %7851 = vmatpush3.bf16.msra.mxu0 %v8721_v32  ;;  %v8122_v33 = vpop.f32.mrb[160].mxu0  ;;  %v8699_v0 = vld [vmem:[%s11527_s2 + $0xf0] sm:$0xff]  }
 0x263   : > { %v10369_v56 = vrot.slane %v11533_v36, 1  ;;  %3456 = vst [vmem:[#allocation3 + $0xf8] sm:$0xff] %v10350_v3  ;;  %v3553_v18 = vshrl.u32 %v10350_v3, 16  ;;  %v11535_v63 = vshll.u32 %v10350_v3, 16  ;;  %7710 = vmatprep.subr.bf16.mxu1 %v8696_v24  ;;  %v3383_v54 = vadd.f32 %v10024_v42, %v3268_v14  ;;  %v11636_v24 = vld [vmem:[#allocation18_spill] sm:$0xff]  ;;  %v3174_v39 = vpop.f32.mrb[161].mxu0 }
 0x264   : > { %v3418_v53 = vmax.f32 %v3382_v38, 0.0  ;;  %v3416_v5 = vmax.f32 %v3380_v19, 0.0  ;;  %v3381_v46 = vadd.f32 %v10024_v42, %v3266_v8  ;;  %v3183_v12 = vadd.f32 %v8122_v33, %v11636_v24  ;;  %v11637_v19 = vld [vmem:[#allocation22_spill] sm:$0xff]  ;;  %v8123_v8 = vpop.f32.mrb[162].mxu0  ;;  %v11638_v24 = vld [vmem:[#allocation12_spill] sm:$0xff]  ;;  %v3656_v57 = vld [vmem:[#allocation3 + $0xd8] sm:$0xff] }
 0x265   : > { %v10381_v15 = vrot.slane %v3553_v18, 7  ;;  %v10385_v23 = vrot.slane %v11535_v63, 1  ;;  %v3868_v32 = vsel %vm10062_vm8, %v3756_v47, %v3867_v11  ;;  %v3419_v14 = vmax.f32 %v3383_v54, 0.0  ;;  %v4039_v36 = vld [vmem:[#allocation3 + $0x70] sm:$0xff]  ;;  %v3982_v17 = vld [vmem:[#allocation3 + $0xa0] sm:$0x80] }
 0x266   : > { %v3417_v38 = vmax.f32 %v3381_v46, 0.0  ;;  %v3175_v2 = vadd.f32 %v3174_v39, %v11637_v19  ;;  %3869 = vst [vmem:[#allocation3 + $0xb8] sm:$0xff] %v3868_v32  ;;  %v3763_v33 = vor.u32 %v10313_v1, %v3539_v20  ;;  %7711 = vmatpush3.bf16.msra.mxu1 %v8697_v52  ;;  %v3271_v47 = vadd.f32 %v3183_v12, %v11638_v24  ;;  %v3177_v63 = vpop.f32.mrb[163].mxu0  ;;  %v3916_v46 = vld [vmem:[#allocation3 + $0x48] sm:$0x1]  ;;  %v8700_v20 = vld [vmem:[%s11527_s2 + $0x138] sm:$0xff]  }
 0x267   : > { %v3186_v11 = vadd.f32 %v8123_v8, %v10074_v37  ;;  %8152 = vmatprep.mubr.bf16.mxu1 %v4039_v36  ;;  %v3983_v54 = vsel %vm10110_vm10, 0, %v3982_v17  ;;  %v3516_v39 = vor.u32 %v3514_v30, %v10178_v25  ;;  %7712 = vmatprep.subr.bf16.mxu1 %v8698_v13  ;;  %v10407_v1 = vpack.c.bf16 %v3419_v14, %v3418_v53  ;;  %v11639_v37 = vld [vmem:[#allocation11_spill] sm:$0xff]  ;;  %v11640_v36 = vld [vmem:[#allocation28_spill] sm:$0xff]  ;;  %v11641_v8 = vld [vmem:[#allocation21_spill] sm:$0xff] }
 0x268   : > { %v10409_v52 = vpack.c.bf16 %v3417_v38, %v3416_v5  ;;  %v3269_v12 = vadd.f32 %v3175_v2, %v11639_v37  ;;  %v3178_v32 = vadd.f32 %v3177_v63, %v11640_v36  ;;  %v4042_v19 = vld [vmem:[#allocation3 + $0x88] sm:$0xff]  ;;  %3984 = vst [vmem:[#allocation3 + $0xa0] sm:$0x80] %v3983_v54  ;;  %v3386_v17 = vadd.f32 %v10024_v42, %v3271_v47  ;;  %v8701_v14 = vld [vmem:[%s11527_s2 + $0xf8] sm:$0xff]   ;;  %v10434_v54 = vld [vmem:[%s11527_s2 + $0x140] sm:$0xff]  }
 0x269   : > { %v3272_v24 = vadd.f32 %v3186_v11, %v11641_v8  ;;  %8153 = vmatmul.mubr.bf16.gmra.mrb[164].mxu1 %v4042_v19  ;;  %v3917_v30 = vsel %vm10121_vm11, 0, %v3916_v46  ;;  %v3871_v25 = vsel %vm10062_vm8, %v3763_v33, %v3870_v22  ;;  %3459 = vst [vmem:[#allocation3 + $0x140] sm:$0xff] %v10407_v1  ;;  %v3574_v13 = vshrl.u32 %v10407_v1, 16  ;;  %v11642_v33 = vld [vmem:[#allocation17_spill] sm:$0xff]  ;;  %v3641_v11 = vld [vmem:[#allocation3 + $0x60] sm:$0xff] }
 0x26a   : > { %v11536_v53 = vshll.u32 %v10407_v1, 16  ;;  %3458 = vst [vmem:[#allocation3 + $0x128] sm:$0xff] %v10409_v52  ;;  %v3567_v63 = vshrl.u32 %v10409_v52, 16  ;;  %v11537_v5 = vshll.u32 %v10409_v52, 16  ;;  %3918 = vst [vmem:[#allocation3 + $0x48] sm:$0x1] %v3917_v30  ;;  %7713 = vmatpush3.bf16.msra.mxu1 %v8699_v0  ;;  %v3384_v38 = vadd.f32 %v10024_v42, %v3269_v12 }
 0x26b   : > { %3872 = vst [vmem:[#allocation3 + $0xd0] sm:$0xff] %v3871_v25  ;;  %v3422_v22 = vmax.f32 %v3386_v17, 0.0  ;;  %v3387_v2 = vadd.f32 %v10024_v42, %v3272_v24  ;;  %v3270_v47 = vadd.f32 %v3178_v32, %v11642_v33  ;;  %7714 = vmatprep.subr.bf16.mxu1 %v8700_v20  ;;  %v10438_v0 = vrot.slane %v3574_v13, 7  ;;  %v8126_v12 = vpop.f32.mrb[164].mxu0  ;;  %v3873_v30 = vld [vmem:[#allocation3 + $0xe8] sm:$0xff] }
 0x26c   : > { %v10442_v46 = vrot.slane %v11536_v53, 1  ;;  %v10446_v37 = vrot.slane %v3567_v63, 7  ;;  %v10450_v20 = vrot.slane %v11537_v5, 1  ;;  %v3420_v36 = vmax.f32 %v3384_v38, 0.0  ;;  %v3190_v8 = vpop.f32.mrb[165].mxu0 }
 0x26d   : > { %v3423_v32 = vmax.f32 %v3387_v2, 0.0  ;;  %v3385_v19 = vadd.f32 %v10024_v42, %v3270_v47  ;;  %v3199_v17 = vadd.f32 %v8126_v12, %v10160_v55  ;;  %v3985_v24 = vld [vmem:[#allocation3 + $0xb8] sm:$0x80]  ;;  %v3191_v25 = vadd.f32 %v3190_v8, %v10105_v61  ;;  %v8127_v33 = vpop.f32.mrb[166].mxu0  ;;  %v11643_v47 = vld [vmem:[#allocation13_spill] sm:$0xff] }
 0x26e   : > { %v3986_v53 = vsel %vm10110_vm10, 0, %v3985_v24  ;;  %v3642_v5 = vsel %vm10069_vm9, %v3516_v39, %v3641_v11  ;;  %v3770_v38 = vor.u32 %v10305_v9, %v3546_v31  ;;  %7715 = vmatpush3.bf16.msra.mxu1 %v8701_v14  ;;  %v3202_v49 = vadd.f32 %v8127_v33, %v10176_v58  ;;  %v3193_v61 = vpop.f32.mrb[167].mxu0  ;;  %v11644_v39 = vld [vmem:[#allocation19_spill] sm:$0xff] }
 0x26f   : > { %v10462_v2 = vpack.c.bf16 %v3423_v32, %v3422_v22  ;;  %v3421_v55 = vmax.f32 %v3385_v19, 0.0  ;;  %v3275_v12 = vadd.f32 %v3199_v17, %v11643_v47  ;;  %v10466_v8 = vld [vmem:[#allocation3 + $0xa0] sm:$0xff]  ;;  %3987 = vst [vmem:[#allocation3 + $0xb8] sm:$0x80] %v3986_v53  ;;  %3643 = vst [vmem:[#allocation3 + $0x60] sm:$0xff] %v3642_v5  ;;  %8176 = vmatprep.subr.bf16.mxu1 %v10434_v54 }
 0x270   : > { %v3273_v11 = vadd.f32 %v3191_v25, %v11644_v39  ;;  %v3194_v24 = vadd.f32 %v3193_v61, %v10117_v51  ;;  %8156 = vmatprep.mubr.bf16.mxu1 %v10466_v8  ;;  %v3874_v31 = vsel %vm10062_vm8, %v3770_v38, %v3873_v30  ;;  %v3777_v58 = vor.u32 %v10385_v23, %v3553_v18  ;;  %v11645_v19 = vld [vmem:[#allocation16_spill] sm:$0xff]  ;;  %v11646_v30 = vld [vmem:[#allocation14_spill] sm:$0xff]  ;;  %v3644_v39 = vld [vmem:[#allocation3 + $0x78] sm:$0xff] }
 0x271   : > { %3461 = vst [vmem:[#allocation3 + $0x170] sm:$0xff] %v10462_v2  ;;  %v3588_v9 = vshrl.u32 %v10462_v2, 16  ;;  %v3591_v53 = vshll.u32 %v10462_v2, 16  ;;  %v10480_v5 = vpack.c.bf16 %v3421_v55, %v3420_v36  ;;  %v3390_v14 = vadd.f32 %v10024_v42, %v3275_v12  ;;  %v10483_v51 = vld [vmem:[#allocation3 + $0x48] sm:$0xff]  ;;  %3875 = vst [vmem:[#allocation3 + $0xe8] sm:$0xff] %v3874_v31  ;;  %v3876_v25 = vld [vmem:[#allocation3 + $0x100] sm:$0xff] }
 0x272   : > { %v3988_v22 = vld [vmem:[#allocation3 + $0xd0] sm:$0x80]  ;;  %v3388_v32 = vadd.f32 %v10024_v42, %v3273_v11  ;;  %v3276_v17 = vadd.f32 %v3202_v49, %v11645_v19  ;;  %v3274_v18 = vadd.f32 %v3194_v24, %v11646_v30  ;;  %4322 = vmatmul.mubr.bf16.gmra.mrb[180].mxu0 %v10483_v51  ;;  %v3877_v31 = vsel %vm10062_vm8, %v3777_v58, %v3876_v25 }
 0x273   : > { %v3989_v23 = vsel %vm10110_vm10, 0, %v3988_v22  ;;  %v10493_v36 = vrot.slane %v3588_v9, 7  ;;  %v3811_v33 = vrot.slane %v3591_v53, 1  ;;  %3460 = vst [vmem:[#allocation3 + $0x158] sm:$0xff] %v10480_v5  ;;  %v3581_v38 = vshrl.u32 %v10480_v5, 16  ;;  %4329 = vmatprep.mubr.bf16.mxu0 %v10144_v16  ;;  %v3879_v22 = vld [vmem:[#allocation3 + $0x118] sm:$0xff] }
 0x274   : > { %v3584_v49 = vshll.u32 %v10480_v5, 16  ;;  %3990 = vst [vmem:[#allocation3 + $0xd0] sm:$0x80] %v3989_v23  ;;  %v3426_v55 = vmax.f32 %v3390_v14, 0.0  ;;  %v3424_v47 = vmax.f32 %v3388_v32, 0.0  ;;  %v3391_v12 = vadd.f32 %v10024_v42, %v3276_v17  ;;  %v3882_v14 = vld [vmem:[#allocation3 + $0x130] sm:$0xff] }
 0x275   : > { %v3389_v61 = vadd.f32 %v10024_v42, %v3274_v18  ;;  %v10503_v11 = vrot.slane %v3581_v38, 7  ;;  %v3523_v16 = vor.u32 %v3521_v28, %v10153_v48  ;;  %v3647_v32 = vld [vmem:[#allocation3 + $0x90] sm:$0xff]  ;;  %3878 = vst [vmem:[#allocation3 + $0x100] sm:$0xff] %v3877_v31  ;;  %v3784_v18 = vor.u32 %v10369_v56, %v3560_v7  ;;  %v3885_v23 = vld [vmem:[#allocation3 + $0x148] sm:$0xff] }
 0x276   : > { %v3804_v24 = vrot.slane %v3584_v49, 1  ;;  %v3427_v19 = vmax.f32 %v3391_v12, 0.0  ;;  %v10512_v30 = vld [vmem:[#allocation3 + $0xb8] sm:$0xff]  ;;  %v3919_v42 = vld [vmem:[#allocation3 + $0x60] sm:$0x1]  ;;  %v3791_v58 = vor.u32 %v10450_v20, %v3567_v63  ;;  %v3530_v48 = vor.u32 %v3528_v29, %v10243_v45 }
 0x277   : > { %v3425_v17 = vmax.f32 %v3389_v61, 0.0  ;;  %8157 = vmatmul.mubr.bf16.gmra.mrb[168].mxu1 %v10512_v30  ;;  %v3920_v60 = vsel %vm10121_vm11, 0, %v3919_v42  ;;  %v3645_v28 = vsel %vm10069_vm9, %v3523_v16, %v3644_v39  ;;  %v3798_v7 = vor.u32 %v10442_v46, %v3574_v13  ;;  %v3888_v61 = vld [vmem:[#allocation3 + $0x160] sm:$0xff] }
 0x278   : > { %v3445_v56 = vpack.c.bf16 %v3427_v19, %v3426_v55  ;;  %3921 = vst [vmem:[#allocation3 + $0x60] sm:$0x1] %v3920_v60  ;;  %v3991_v63 = vld [vmem:[#allocation3 + $0xe8] sm:$0x80]  ;;  %3646 = vst [vmem:[#allocation3 + $0x78] sm:$0xff] %v3645_v28  ;;  %v3880_v20 = vsel %vm10062_vm8, %v3784_v18, %v3879_v22  ;;  %v3883_v12 = vsel %vm10062_vm8, %v3791_v58, %v3882_v14  ;;  %v3680_v58 = vld [vmem:[#allocation3 + $0x198] sm:$0xff] }
 0x279   : > { %v10531_v25 = vpack.c.bf16 %v3425_v17, %v3424_v47  ;;  %v3992_v29 = vsel %vm10110_vm10, 0, %v3991_v63  ;;  %3881 = vst [vmem:[#allocation3 + $0x118] sm:$0xff] %v3880_v20  ;;  %3884 = vst [vmem:[#allocation3 + $0x130] sm:$0xff] %v3883_v12  ;;  %v3648_v45 = vsel %vm10069_vm9, %v3530_v48, %v3647_v32  ;;  %v3886_v13 = vsel %vm10062_vm8, %v3798_v7, %v3885_v23  ;;  %v3650_v55 = vld [vmem:[#allocation3 + $0xa8] sm:$0xff]  ;;  %v3653_v47 = vld [vmem:[#allocation3 + $0xc0] sm:$0xff] }
 0x27a   : > { %v3805_v46 = vor.u32 %v3804_v24, %v3581_v38  ;;  %v3602_v39 = vshrl.u32 %v3445_v56, 16  ;;  %v3605_v31 = vshll.u32 %v3445_v56, 16  ;;  %3993 = vst [vmem:[#allocation3 + $0xe8] sm:$0x80] %v3992_v29  ;;  %3649 = vst [vmem:[#allocation3 + $0x90] sm:$0xff] %v3648_v45  ;;  %v3891_v32 = vld [vmem:[#allocation3 + $0x178] sm:$0xff]  ;;  %v3537_v24 = vor.u32 %v3535_v44, %v10237_v59 }
 0x27b   : > { %3462 = vst [vmem:[#allocation3 + $0x188] sm:$0xff] %v10531_v25  ;;  %v3595_v16 = vshrl.u32 %v10531_v25, 16  ;;  %v3598_v22 = vshll.u32 %v10531_v25, 16  ;;  %v10546_v14 = vld [vmem:[#allocation3 + $0xd0] sm:$0xff]  ;;  %3887 = vst [vmem:[#allocation3 + $0x148] sm:$0xff] %v3886_v13  ;;  %v3812_v19 = vor.u32 %v3811_v33, %v3588_v9  ;;  %v11647_v17 = vshll.u32 %v10267_v35, 16 }
 0x27c   : > { %8160 = vmatprep.mubr.bf16.mxu1 %v10546_v14  ;;  %v3889_v38 = vsel %vm10062_vm8, %v3805_v46, %v3888_v61  ;;  %v3604_v18 = vrot.slane %v3602_v39, 7  ;;  %v3825_v23 = vrot.slane %v3605_v31, 1  ;;  %v3897_v44 = vld [vmem:[#allocation3 + $0x1a8] sm:$0xff]  ;;  %v3994_v59 = vld [vmem:[#allocation3 + $0x100] sm:$0x80]  ;;  %v3651_v9 = vsel %vm10069_vm9, %v3537_v24, %v3650_v55  ;;  %v3659_v56 = vld [vmem:[#allocation3 + $0xf0] sm:$0xff] }
 0x27d   : > { %v3544_v42 = vor.u32 %v11647_v17, %v10309_v26  ;;  %v10561_v60 = vrot.slane %v3595_v16, 7  ;;  %v10565_v28 = vrot.slane %v3598_v22, 1  ;;  %3890 = vst [vmem:[#allocation3 + $0x160] sm:$0xff] %v3889_v38  ;;  %v3892_v26 = vsel %vm10062_vm8, %v3812_v19, %v3891_v32  ;;  %3652 = vst [vmem:[#allocation3 + $0xa8] sm:$0xff] %v3651_v9  ;;  %v3662_v45 = vld [vmem:[#allocation3 + $0x108] sm:$0xff]  ;;  %v3665_v13 = vld [vmem:[#allocation3 + $0x120] sm:$0xff] }
 0x27e   : > { %v11648_v48 = vshll.u32 %v10265_v10, 16  ;;  %v3607_v63 = vor.u32 %v3605_v31, %v3604_v18  ;;  %v3826_v20 = vor.u32 %v3825_v23, %v3602_v39  ;;  %v3995_v12 = vsel %vm10110_vm10, 0, %v3994_v59  ;;  %3893 = vst [vmem:[#allocation3 + $0x178] sm:$0xff] %v3892_v26  ;;  %v3668_v46 = vld [vmem:[#allocation3 + $0x138] sm:$0xff]  ;;  %v3674_v24 = vld [vmem:[#allocation3 + $0x168] sm:$0xff]  ;;  %v3671_v9 = vld [vmem:[#allocation3 + $0x150] sm:$0xff] }
 0x27f   : > { %v3654_v33 = vsel %vm10069_vm9, %v3544_v42, %v3653_v47  ;;  %v11649_v61 = vshll.u32 %v10350_v3, 16  ;;  %v10581_v55 = vld [vmem:[#allocation3 + $0x60] sm:$0xff]  ;;  %3996 = vst [vmem:[#allocation3 + $0x100] sm:$0x80] %v3995_v12  ;;  %v3922_v10 = vld [vmem:[#allocation3 + $0x78] sm:$0x1] }
 0x280   : > { %v3551_v7 = vor.u32 %v11648_v48, %v10301_v21  ;;  %3655 = vst [vmem:[#allocation3 + $0xc0] sm:$0xff] %v3654_v33  ;;  %v11650_v47 = vshll.u32 %v10334_v27, 16  ;;  %v11651_v31 = vshll.u32 %v10409_v52, 16  ;;  %v3681_v19 = vsel %vm10069_vm9, %v3607_v63, %v3680_v58  ;;  %4330 = vmatmul.mubr.bf16.gmra.mrb[184].mxu0 %v10581_v55  ;;  %v10599_v42 = vld [vmem:[#allocation3 + $0x80] sm:$0xff] }
 0x281   : > { %v3558_v29 = vor.u32 %v11649_v61, %v10381_v15  ;;  %v11652_v15 = vshll.u32 %v10407_v1, 16  ;;  %v3898_v17 = vsel %vm10062_vm8, %v3826_v20, %v3897_v44  ;;  %v3923_v27 = vsel %vm10121_vm11, 0, %v3922_v10  ;;  %3682 = vst [vmem:[#allocation3 + $0x198] sm:$0xff] %v3681_v19  ;;  %4337 = vmatprep.mubr.bf16.mxu0 %v10599_v42  ;;  %v10606_v18 = vld [vmem:[#allocation3 + $0xe8] sm:$0xff]  ;;  %v3677_v63 = vld [vmem:[#allocation3 + $0x180] sm:$0xff]  ;;  %v3894_v20 = vld [vmem:[#allocation3 + $0x190] sm:$0xff] }
 0x282   : > { %v3657_v21 = vsel %vm10069_vm9, %v3551_v7, %v3656_v57  ;;  %v3565_v39 = vor.u32 %v11650_v47, %v10365_v41  ;;  %v3572_v32 = vor.u32 %v11651_v31, %v10446_v37  ;;  %v3997_v41 = vld [vmem:[#allocation3 + $0x118] sm:$0x80]  ;;  %v4000_v37 = vld [vmem:[#allocation3 + $0x130] sm:$0x80]  ;;  %3899 = vst [vmem:[#allocation3 + $0x1a8] sm:$0xff] %v3898_v17  ;;  %8161 = vmatmul.mubr.bf16.gmra.mrb[172].mxu1 %v10606_v18 }
 0x283   : > { %v3579_v38 = vor.u32 %v11652_v15, %v10438_v0  ;;  %3658 = vst [vmem:[#allocation3 + $0xd8] sm:$0xff] %v3657_v21  ;;  %v3660_v0 = vsel %vm10069_vm9, %v3558_v29, %v3659_v56  ;;  %3924 = vst [vmem:[#allocation3 + $0x78] sm:$0x1] %v3923_v27  ;;  %v3998_v58 = vsel %vm10110_vm10, 0, %v3997_v41  ;;  %v4001_v23 = vsel %vm10110_vm10, 0, %v4000_v37  ;;  %v10671_v37 = vld [vmem:[#allocation3 + $0x8] sm:$0xff] }
 0x284   : > { %v3925_v57 = vld [vmem:[#allocation3 + $0x90] sm:$0x1]  ;;  %3661 = vst [vmem:[#allocation3 + $0xf0] sm:$0xff] %v3660_v0  ;;  %v3663_v44 = vsel %vm10069_vm9, %v3565_v39, %v3662_v45  ;;  %v3666_v59 = vsel %vm10069_vm9, %v3572_v32, %v3665_v13  ;;  %3999 = vst [vmem:[#allocation3 + $0x118] sm:$0x80] %v3998_v58  ;;  %v3586_v7 = vor.u32 %v3584_v49, %v10503_v11 }
 0x285   : > { %4002 = vst [vmem:[#allocation3 + $0x130] sm:$0x80] %v4001_v23  ;;  %v3926_v26 = vsel %vm10121_vm11, 0, %v3925_v57  ;;  %v4003_v33 = vld [vmem:[#allocation3 + $0x148] sm:$0x80]  ;;  %3664 = vst [vmem:[#allocation3 + $0x108] sm:$0xff] %v3663_v44  ;;  %v3669_v48 = vsel %vm10069_vm9, %v3579_v38, %v3668_v46  ;;  %v3593_v56 = vor.u32 %v3591_v53, %v10493_v36  ;;  %v3600_v29 = vor.u32 %v3598_v22, %v10561_v60 }
 0x286   : > { %3667 = vst [vmem:[#allocation3 + $0x120] sm:$0xff] %v3666_v59  ;;  %3927 = vst [vmem:[#allocation3 + $0x90] sm:$0x1] %v3926_v26  ;;  %v4004_v12 = vsel %vm10110_vm10, 0, %v4003_v33  ;;  %v4006_v61 = vld [vmem:[#allocation3 + $0x160] sm:$0x80]  ;;  %v3819_v49 = vor.u32 %v10565_v28, %v3595_v16  ;;  %v3672_v36 = vsel %vm10069_vm9, %v3586_v7, %v3671_v9 }
 0x287   : > { %3670 = vst [vmem:[#allocation3 + $0x138] sm:$0xff] %v3669_v48  ;;  %4005 = vst [vmem:[#allocation3 + $0x148] sm:$0x80] %v4004_v12  ;;  %v4007_v53 = vsel %vm10110_vm10, 0, %v4006_v61  ;;  %v3675_v11 = vsel %vm10069_vm9, %v3593_v56, %v3674_v24  ;;  %v3928_v45 = vld [vmem:[#allocation3 + $0xa8] sm:$0x1]  ;;  %v3678_v22 = vsel %vm10069_vm9, %v3600_v29, %v3677_v63 }
 0x288   : > { %4008 = vst [vmem:[#allocation3 + $0x160] sm:$0x80] %v4007_v53  ;;  %v4009_v13 = vld [vmem:[#allocation3 + $0x178] sm:$0x80]  ;;  %v3931_v46 = vld [vmem:[#allocation3 + $0xc0] sm:$0x1]  ;;  %v3895_v16 = vsel %vm10062_vm8, %v3819_v49, %v3894_v20 }
 0x289   : > { %3673 = vst [vmem:[#allocation3 + $0x150] sm:$0xff] %v3672_v36  ;;  %3676 = vst [vmem:[#allocation3 + $0x168] sm:$0xff] %v3675_v11  ;;  %v10645_v60 = vld [vmem:[#allocation3 + $0x100] sm:$0xff]  ;;  %v3929_v28 = vsel %vm10121_vm11, 0, %v3928_v45  ;;  %v4010_v10 = vsel %vm10110_vm10, 0, %v4009_v13  ;;  %v3932_v21 = vsel %vm10121_vm11, 0, %v3931_v46 }
 0x28a   : > { %3679 = vst [vmem:[#allocation3 + $0x180] sm:$0xff] %v3678_v22  ;;  %3896 = vst [vmem:[#allocation3 + $0x190] sm:$0xff] %v3895_v16  ;;  %8164 = vmatprep.mubr.bf16.mxu1 %v10645_v60  ;;  %v3934_v34 = vld [vmem:[#allocation3 + $0xd8] sm:$0x1]  ;;  %v4015_v47 = vld [vmem:[#allocation3 + $0x1a8] sm:$0x80] }
 0x28b   : > { %3930 = vst [vmem:[#allocation3 + $0xa8] sm:$0x1] %v3929_v28  ;;  %4011 = vst [vmem:[#allocation3 + $0x178] sm:$0x80] %v4010_v10  ;;  %v3958_v40 = vld [vmem:[#allocation3 + $0x198] sm:$0x1] }
 0x28c   : > { %3933 = vst [vmem:[#allocation3 + $0xc0] sm:$0x1] %v3932_v21  ;;  %v10654_v39 = vld [vmem:[#allocation3 + $0x78] sm:$0xff]  ;;  %v3935_v31 = vsel %vm10121_vm11, 0, %v3934_v34  ;;  %v3959_v32 = vsel %vm10121_vm11, 0, %v3958_v40  ;;  %v4016_v15 = vsel %vm10110_vm10, 0, %v4015_v47 }
 0x28d   : > { %4338 = vmatmul.mubr.bf16.gmra.mrb[188].mxu0 %v10654_v39  ;;  %v10663_v38 = vld [vmem:[#allocation3 + $0x118] sm:$0xff]  ;;  %v10665_v24 = vld [vmem:[#allocation3 + $0x130] sm:$0xff]  ;;  %3936 = vst [vmem:[#allocation3 + $0xd8] sm:$0x1] %v3935_v31  ;;  %3960 = vst [vmem:[#allocation3 + $0x198] sm:$0x1] %v3959_v32 }
 0x28e   : > { %v3937_v19 = vld [vmem:[#allocation3 + $0xf0] sm:$0x1]  ;;  %4017 = vst [vmem:[#allocation3 + $0x1a8] sm:$0x80] %v4016_v15  ;;  %4345 = vmatprep.mubr.bf16.mxu0 %v10199_v43  ;;  %8165 = vmatmul.mubr.bf16.gmra.mrb[176].mxu1 %v10663_v38  ;;  %v3940_v27 = vld [vmem:[#allocation3 + $0x108] sm:$0x1] }
 0x28f   : > { %v3938_v17 = vsel %vm10121_vm11, 0, %v3937_v19  ;;  %v3943_v41 = vld [vmem:[#allocation3 + $0x120] sm:$0x1]  ;;  %4022 = vst [vmem:[#allocation3 + $0x198] sm:$0xff] %v10671_v37  ;;  %4024 = vst [vmem:[#allocation3 + $0x1a8] sm:$0xff] %v10671_v37  ;;  %8168 = vmatprep.mubr.bf16.mxu1 %v10665_v24  ;;  %v3941_v0 = vsel %vm10121_vm11, 0, %v3940_v27 }
 0x290   : > { %3939 = vst [vmem:[#allocation3 + $0xf0] sm:$0x1] %v3938_v17  ;;  %v3944_v43 = vsel %vm10121_vm11, 0, %v3943_v41  ;;  %v3946_v58 = vld [vmem:[#allocation3 + $0x138] sm:$0x1]  ;;  %v10690_v56 = vld [vmem:[#allocation3 + $0x90] sm:$0xff] }
 0x291   : > { %3942 = vst [vmem:[#allocation3 + $0x108] sm:$0x1] %v3941_v0  ;;  %3945 = vst [vmem:[#allocation3 + $0x120] sm:$0x1] %v3944_v43  ;;  %v3947_v23 = vsel %vm10121_vm11, 0, %v3946_v58  ;;  %v10692_v63 = vld [vmem:[#allocation3 + $0x160] sm:$0xff] }
 0x292   : > { %v3949_v57 = vld [vmem:[#allocation3 + $0x150] sm:$0x1]  ;;  %v3952_v44 = vld [vmem:[#allocation3 + $0x168] sm:$0x1]  ;;  %3948 = vst [vmem:[#allocation3 + $0x138] sm:$0x1] %v3947_v23 }
 0x293   : > { %v3950_v59 = vsel %vm10121_vm11, 0, %v3949_v57  ;;  %v3953_v9 = vsel %vm10121_vm11, 0, %v3952_v44  ;;  %v3955_v26 = vld [vmem:[#allocation3 + $0x180] sm:$0x1]  ;;  %v4012_v33 = vld [vmem:[#allocation3 + $0x190] sm:$0x80] }
 0x294   : > { %3951 = vst [vmem:[#allocation3 + $0x150] sm:$0x1] %v3950_v59  ;;  %3954 = vst [vmem:[#allocation3 + $0x168] sm:$0x1] %v3953_v9  ;;  %v3956_v48 = vsel %vm10121_vm11, 0, %v3955_v26  ;;  %v4013_v7 = vsel %vm10110_vm10, 0, %v4012_v33 }
 0x295   : > { %3957 = vst [vmem:[#allocation3 + $0x180] sm:$0x1] %v3956_v48  ;;  %4014 = vst [vmem:[#allocation3 + $0x190] sm:$0x80] %v4013_v7  ;;  %4346 = vmatmul.mubr.bf16.gmra.mrb[192].mxu0 %v10690_v56  ;;  %v10695_v20 = vld [vmem:[#allocation3 + $0xb0] sm:$0xff]  ;;  %v10697_v12 = vld [vmem:[#allocation3 + $0x148] sm:$0xff] }
 0x296   : > { %4353 = vmatprep.mubr.bf16.mxu0 %v10695_v20  ;;  %8169 = vmatmul.mubr.bf16.gmra.mrb[180].mxu1 %v10697_v12  ;;  %v10702_v6 = vld [vmem:[#allocation3 + $0xa8] sm:$0xff]  ;;  %v10705_v4 = vld [vmem:[#allocation3 + $0x178] sm:$0xff]  ;;  %v4621_v61 = vld [vmem:[#allocation3 + $0x20] sm:$0xff]  ;;  %v7580_v16 = vpop.f32.mrb[168].mxu0 }
 0x297   : > { %8172 = vmatprep.mubr.bf16.mxu1 %v10692_v63  ;;  %v10709_v29 = vld [vmem:[#allocation3 + $0xc0] sm:$0xff]  ;;  %v8707_v49 = vld [vmem:[%s11527_s2 + $0x148] sm:$0xff]   ;;  %v10719_v36 = vld [vmem:[#allocation3 + $0x38] sm:$0xff]  ;;  %v7581_v10 = vpop.f32.mrb[169].mxu0 }
 0x298   : > { %v10715_v53 = vld [vmem:[#allocation3 + $0xe0] sm:$0xff]  ;;  %v10726_v11 = vld [vmem:[#allocation3 + $0xd8] sm:$0xff]  ;;  %v10737_v13 = vld [vmem:[#allocation3 + $0xf0] sm:$0xff]  ;;  %v10750_v21 = vadd.f32 %v7581_v10, %v7580_v16  ;;  %v7583_v47 = vpop.f32.mrb[170].mxu0 }
 0x299   : > { %v8714_v45 = vld [vmem:[%s11527_s2 + $0x158] sm:$0xff]   ;;  %v8723_v46 = vld [vmem:[%s11527_s2 + $0x168] sm:$0xff]   ;;  %v8724_v28 = vld [vmem:[%s11527_s2 + $0x170] sm:$0xff]   ;;  %v7584_v31 = vpop.f32.mrb[171].mxu0 }
 0x29a   : > { %v4630_v22 = vld [vmem:[#allocation3 + $0x68] sm:$0xff]  ;;  %v8725_v40 = vld [vmem:[%s11527_s2 + $0x178] sm:$0xff]   ;;  %v10761_v32 = vadd.f32 %v7584_v31, %v7583_v47  ;;  %v10766_v15 = vld [vmem:[%s11527_s2 + $0x200] sm:$0xff]  }
 0x29b   : > { %v10752_v34 = vld [vmem:[#allocation3 + $0x108] sm:$0xff]  ;;  %v10768_v19 = vld [vmem:[#allocation3 + $0x120] sm:$0xff]  ;;  %v10774_v17 = vld [vmem:[#allocation3 + $0x138] sm:$0xff] }
 0x29c   : > { %v10780_v27 = vld [vmem:[#allocation3 + $0x150] sm:$0xff]  ;;  %v10785_v41 = vld [vmem:[#allocation3 + $0x168] sm:$0xff]  ;;  %v10824_v43 = vld [vmem:[#allocation3 + $0x40] sm:$0xff] }
 0x29d   : > { %4354 = vmatmul.mubr.bf16.gmra.mrb[196].mxu0 %v10702_v6  ;;  %v8727_v0 = vld [vmem:[%s11527_s2 + $0x208] sm:$0xff]   ;;  %v8728_v58 = vld [vmem:[%s11527_s2 + $0x210] sm:$0xff]   ;;  %v8729_v23 = vld [vmem:[%s11527_s2 + $0x218] sm:$0xff]  }
 0x29e   : > { %4361 = vmatprep.mubr.bf16.mxu0 %v10267_v35  ;;  %8173 = vmatmul.mubr.bf16.gmra.mrb[184].mxu1 %v10705_v4  ;;  %v8710_v35 = vld [vmem:[%s11527_s2 + $0x150] sm:$0xff]   ;;  %v10842_v44 = vld [vmem:[#allocation3 + $0x88] sm:$0xff]  ;;  %v8730_v48 = vld [vmem:[%s11527_s2 + $0x220] sm:$0xff]  }
 0x29f   : > { %4893 = vmatprep.mubr.bf16.mxu1 %v4621_v61  ;;  %v10839_v57 = vld [vmem:[#allocation3 + $0x70] sm:$0xff] }
 0x2a5   : > { %4362 = vmatmul.mubr.bf16.gmra.mrb[200].mxu0 %v10709_v29 }
 0x2a6   : > { %4369 = vmatprep.mubr.bf16.mxu0 %v10715_v53  ;;  %4894 = vmatmul.mubr.bf16.vlgmr.msra.gmra.mrb[188].mxu1 %v10252_v50  ;;  %v4627_v50 = vld [vmem:[#allocation3 + $0x50] sm:$0xff] }
 0x2a7   : > { %4901 = vmatprep.mubr.bf16.mxu1 %v10719_v36  ;;  %8177 = vmatpush3.bf16.msra.mxu1 %v10434_v54  ;;  %v8722_v54 = vld [vmem:[%s11527_s2 + $0x160] sm:$0xff]  }
 0x2a8   : > { %8178 = vmatprep.subr.bf16.mxu1 %v8707_v49 }
 0x2ab   : > { %8179 = vmatpush3.bf16.msra.mxu1 %v8707_v49 }
 0x2ac   : > { %8180 = vmatprep.subr.bf16.mxu1 %v8710_v35 }
 0x2ad   : > { %4370 = vmatmul.mubr.bf16.gmra.mrb[204].mxu0 %v10726_v11 }
 0x2ae   : > { %4377 = vmatprep.mubr.bf16.mxu0 %v10350_v3  ;;  %4902 = vmatmul.mubr.bf16.gmra.mrb[192].mxu1 %v10337_v62  ;;  %v10743_v3 = vld [vmem:[#allocation3 + $0x110] sm:$0xff] }
 0x2af   : > { %4909 = vmatprep.mubr.bf16.mxu1 %v4627_v50  ;;  %8181 = vmatpush3.bf16.msra.mxu1 %v8710_v35 }
 0x2b0   : > { %8182 = vmatprep.subr.bf16.mxu1 %v8714_v45 }
 0x2b3   : > { %8183 = vmatpush3.bf16.msra.mxu1 %v8714_v45 }
 0x2b4   : > { %8184 = vmatprep.subr.bf16.mxu1 %v8722_v54 }
 0x2b5   : > { %4378 = vmatmul.mubr.bf16.gmra.mrb[208].mxu0 %v10737_v13 }
 0x2b6   : > { %4385 = vmatprep.mubr.bf16.mxu0 %v10743_v3  ;;  %4910 = vmatmul.mubr.bf16.gmra.mrb[196].mxu1 %v10483_v51 }
 0x2b7   : > { %4917 = vmatprep.mubr.bf16.mxu1 %v4630_v22  ;;  %8185 = vmatpush3.bf16.msra.mxu1 %v8722_v54 }
 0x2b8   : > { %8186 = vmatprep.subr.bf16.mxu1 %v8723_v46 }
 0x2bb   : > { %8187 = vmatpush3.bf16.msra.mxu1 %v8723_v46 }
 0x2bc   : > { %8188 = vmatprep.subr.bf16.mxu1 %v8724_v28 }
 0x2bd   : > { %4386 = vmatmul.mubr.bf16.gmra.mrb[212].mxu0 %v10752_v34 }
 0x2be   : > { %4393 = vmatprep.mubr.bf16.mxu0 %v10409_v52  ;;  %4918 = vmatmul.mubr.bf16.gmra.mrb[200].mxu1 %v10581_v55  ;;  %v4636_v52 = vld [vmem:[#allocation3 + $0x98] sm:$0xff] }
 0x2bf   : > { %4925 = vmatprep.mubr.bf16.mxu1 %v10599_v42  ;;  %8189 = vmatpush3.bf16.msra.mxu1 %v8724_v28 }
 0x2c0   : > { %8190 = vmatprep.subr.bf16.mxu1 %v8725_v40 }
 0x2c3   : > { %8191 = vmatpush3.bf16.msra.mxu1 %v8725_v40 }
 0x2c4   : > { %8224 = vmatprep.subr.bf16.mxu1 %v10766_v15 }
 0x2c5   : > { %4394 = vmatmul.mubr.bf16.gmra.mrb[216].mxu0 %v10768_v19 }
 0x2c6   : > { %4401 = vmatprep.mubr.bf16.mxu0 %v10407_v1  ;;  %4926 = vmatmul.mubr.bf16.gmra.mrb[204].mxu1 %v10654_v39  ;;  %v4642_v1 = vld [vmem:[#allocation3 + $0xc8] sm:$0xff] }
 0x2c7   : > { %4933 = vmatprep.mubr.bf16.mxu1 %v4636_v52 }
 0x2cd   : > { %4402 = vmatmul.mubr.bf16.gmra.mrb[220].mxu0 %v10774_v17 }
 0x2ce   : > { %4409 = vmatprep.mubr.bf16.mxu0 %v10480_v5  ;;  %4934 = vmatmul.mubr.bf16.gmra.mrb[208].mxu1 %v10690_v56  ;;  %v4654_v5 = vld [vmem:[#allocation3 + $0x128] sm:$0xff] }
 0x2cf   : > { %4941 = vmatprep.mubr.bf16.mxu1 %v10695_v20 }
 0x2d5   : > { %4410 = vmatmul.mubr.bf16.gmra.mrb[224].mxu0 %v10780_v27 }
 0x2d6   : > { %4417 = vmatprep.mubr.bf16.mxu0 %v10462_v2  ;;  %4942 = vmatmul.mubr.bf16.gmra.mrb[212].mxu1 %v10702_v6  ;;  %v4648_v2 = vld [vmem:[#allocation3 + $0xf8] sm:$0xff] }
 0x2d7   : > { %4949 = vmatprep.mubr.bf16.mxu1 %v4642_v1 }
 0x2dd   : > { %4418 = vmatmul.mubr.bf16.gmra.mrb[228].mxu0 %v10785_v41 }
 0x2de   : > { %4950 = vmatmul.mubr.bf16.gmra.mrb[216].mxu1 %v10709_v29  ;;  %5553 = vmatprep.mubr.bf16.mxu0 %v10719_v36 }
 0x2df   : > { %4957 = vmatprep.mubr.bf16.mxu1 %v10715_v53 }
 0x2e5   : > { %5554 = vmatmul.mubr.bf16.vlgmr.msra.gmra.mrb[232].mxu0 %v10337_v62  ;;  %v4657_v62 = vld [vmem:[#allocation3 + $0x140] sm:$0xff] }
 0x2e6   : > { %4958 = vmatmul.mubr.bf16.gmra.mrb[220].mxu1 %v10726_v11  ;;  %5561 = vmatprep.mubr.bf16.mxu0 %v4627_v50 }
 0x2e7   : > { %4965 = vmatprep.mubr.bf16.mxu1 %v4648_v2 }
 0x2ed   : > { %5562 = vmatmul.mubr.bf16.gmra.mrb[236].mxu0 %v10483_v51  ;;  %v10804_v51 = vld [vmem:[#allocation3 + $0x158] sm:$0xff] }
 0x2ee   : > { %4966 = vmatmul.mubr.bf16.gmra.mrb[224].mxu1 %v10737_v13  ;;  %5569 = vmatprep.mubr.bf16.mxu0 %v4630_v22 }
 0x2ef   : > { %4973 = vmatprep.mubr.bf16.mxu1 %v10743_v3 }
 0x2f5   : > { %5570 = vmatmul.mubr.bf16.gmra.mrb[240].mxu0 %v10581_v55  ;;  %v10809_v55 = vld [vmem:[#allocation3 + $0x170] sm:$0xff] }
 0x2f6   : > { %4974 = vmatmul.mubr.bf16.gmra.mrb[228].mxu1 %v10752_v34  ;;  %5577 = vmatprep.mubr.bf16.mxu0 %v10599_v42  ;;  %v10817_v42 = vld [vmem:[#allocation3 + $0x180] sm:$0xff] }
 0x2f7   : > { %4981 = vmatprep.mubr.bf16.mxu1 %v4654_v5 }
 0x2fd   : > { %5578 = vmatmul.mubr.bf16.gmra.mrb[244].mxu0 %v10654_v39  ;;  %v4622_v39 = vld [vmem:[#allocation3 + $0x28] sm:$0xff] }
 0x2fe   : > { %4982 = vmatmul.mubr.bf16.gmra.mrb[232].mxu1 %v10768_v19  ;;  %5585 = vmatprep.mubr.bf16.mxu0 %v4636_v52  ;;  %v5294_v52 = vld [vmem:[#allocation3 + $0xa0] sm:$0xff] }
 0x2ff   : > { %4989 = vmatprep.mubr.bf16.mxu1 %v4657_v62 }
 0x305   : > { %5586 = vmatmul.mubr.bf16.gmra.mrb[248].mxu0 %v10690_v56 }
 0x306   : > { %4990 = vmatmul.mubr.bf16.gmra.mrb[236].mxu1 %v10774_v17  ;;  %5593 = vmatprep.mubr.bf16.mxu0 %v10695_v20  ;;  %v8731_v20 = vld [vmem:[%s11527_s2 + $0x228] sm:$0xff]  }
 0x307   : > { %4997 = vmatprep.mubr.bf16.mxu1 %v10804_v51 }
 0x30d   : > { %5594 = vmatmul.mubr.bf16.gmra.mrb[252].mxu0 %v10702_v6 }
 0x30e   : > { %4998 = vmatmul.mubr.bf16.gmra.mrb[240].mxu1 %v10780_v27  ;;  %5601 = vmatprep.mubr.bf16.mxu0 %v4642_v1 }
 0x30f   : > { %5005 = vmatprep.mubr.bf16.mxu1 %v10809_v55 }
 0x315   : > { %5602 = vmatmul.mubr.bf16.gmra.mrb[0].mxu0 %v10709_v29  ;;  %v8732_v29 = vld [vmem:[%s11527_s2 + $0x230] sm:$0xff]  }
 0x316   : > { %5006 = vmatmul.mubr.bf16.gmra.mrb[244].mxu1 %v10785_v41  ;;  %5609 = vmatprep.mubr.bf16.mxu0 %v10715_v53 }
 0x317   : > { %5013 = vmatprep.mubr.bf16.mxu1 %v10531_v25  ;;  %v10828_v25 = vld [vmem:[#allocation3 + $0x58] sm:$0xff] }
 0x31d   : > { %5610 = vmatmul.mubr.bf16.gmra.mrb[4].mxu0 %v10726_v11 }
 0x31e   : > { %5014 = vmatmul.mubr.bf16.gmra.mrb[248].mxu1 %v10817_v42  ;;  %5617 = vmatprep.mubr.bf16.mxu0 %v4648_v2 }
 0x31f   : > { %8192 = vmatprep.mubr.bf16.mxu1 %v4622_v39 }
 0x325   : > { %5618 = vmatmul.mubr.bf16.gmra.mrb[8].mxu0 %v10737_v13 }
 0x326   : > { %8193 = vmatmul.mubr.bf16.vlgmr.msra.gmra.mrb[156].mxu1 %v10824_v43  ;;  %5625 = vmatprep.mubr.bf16.mxu0 %v10743_v3 }
 0x327   : > { %8196 = vmatprep.mubr.bf16.mxu1 %v10828_v25  ;;  %8225 = vmatpush3.bf16.msra.mxu1 %v10766_v15 }
 0x328   : > { %8226 = vmatprep.subr.bf16.mxu1 %v8727_v0 }
 0x329   : > { %v7586_v59 = vpop.f32.mrb[172].mxu0 }
 0x32a   : > { %v7587_v9 = vpop.f32.mrb[173].mxu0 }
 0x32b   : > { %8227 = vmatpush3.bf16.msra.mxu1 %v8727_v0  ;;  %v10845_v26 = vadd.f32 %v7587_v9, %v7586_v59  ;;  %v7589_v33 = vpop.f32.mrb[174].mxu0 }
 0x32c   : > { %8228 = vmatprep.subr.bf16.mxu1 %v8728_v58  ;;  %v7590_v7 = vpop.f32.mrb[175].mxu0 }
 0x32d   : > { %5626 = vmatmul.mubr.bf16.gmra.mrb[12].mxu0 %v10752_v34  ;;  %v10850_v56 = vadd.f32 %v7590_v7, %v7589_v33  ;;  %v5306_v7 = vld [vmem:[#allocation3 + $0x100] sm:$0xff] }
 0x32e   : > { %8197 = vmatmul.mubr.bf16.gmra.mrb[160].mxu1 %v10839_v57  ;;  %5633 = vmatprep.mubr.bf16.mxu0 %v4654_v5 }
 0x32f   : > { %8200 = vmatprep.mubr.bf16.mxu1 %v10842_v44  ;;  %8229 = vmatpush3.bf16.msra.mxu1 %v8728_v58 }
 0x330   : > { %8230 = vmatprep.subr.bf16.mxu1 %v8729_v23 }
 0x333   : > { %8231 = vmatpush3.bf16.msra.mxu1 %v8729_v23  ;;  %v7592_v6 = vpop.f32.mrb[176].mxu0 }
 0x334   : > { %8232 = vmatprep.subr.bf16.mxu1 %v8730_v48  ;;  %v7593_v61 = vpop.f32.mrb[177].mxu0 }
 0x335   : > { %5634 = vmatmul.mubr.bf16.gmra.mrb[16].mxu0 %v10768_v19  ;;  %v10861_v49 = vadd.f32 %v7593_v61, %v7592_v6  ;;  %v7595_v53 = vpop.f32.mrb[178].mxu0 }
 0x336   : > { %8201 = vmatmul.mubr.bf16.gmra.mrb[164].mxu1 %v10466_v8  ;;  %5641 = vmatprep.mubr.bf16.mxu0 %v4657_v62  ;;  %v7596_v36 = vpop.f32.mrb[179].mxu0  ;;  %v8733_v8 = vld [vmem:[%s11527_s2 + $0x238] sm:$0xff]  }
 0x337   : > { %8204 = vmatprep.mubr.bf16.mxu1 %v10512_v30  ;;  %8233 = vmatpush3.bf16.msra.mxu1 %v8730_v48  ;;  %v10863_v35 = vadd.f32 %v7596_v36, %v7595_v53  ;;  %v5297_v62 = vld [vmem:[#allocation3 + $0xb8] sm:$0xff]  ;;  %v5303_v48 = vld [vmem:[#allocation3 + $0xe8] sm:$0xff] }
 0x338   : > { %8234 = vmatprep.subr.bf16.mxu1 %v8731_v20 }
 0x33b   : > { %8235 = vmatpush3.bf16.msra.mxu1 %v8731_v20 }
 0x33c   : > { %8236 = vmatprep.subr.bf16.mxu1 %v8732_v29 }
 0x33d   : > { %5642 = vmatmul.mubr.bf16.gmra.mrb[20].mxu0 %v10774_v17 }
 0x33e   : > { %8205 = vmatmul.mubr.bf16.gmra.mrb[168].mxu1 %v10546_v14  ;;  %5649 = vmatprep.mubr.bf16.mxu0 %v10804_v51  ;;  %v5300_v51 = vld [vmem:[#allocation3 + $0xd0] sm:$0xff] }
 0x33f   : > { %8208 = vmatprep.mubr.bf16.mxu1 %v10606_v18  ;;  %8237 = vmatpush3.bf16.msra.mxu1 %v8732_v29  ;;  %v5323_v18 = vld [vmem:[#allocation3 + $0x188] sm:$0xff] }
 0x340   : > { %8238 = vmatprep.subr.bf16.mxu1 %v8733_v8 }
 0x343   : > { %8239 = vmatpush3.bf16.msra.mxu1 %v8733_v8 }
 0x345   : > { %5650 = vmatmul.mubr.bf16.gmra.mrb[24].mxu0 %v10780_v27  ;;  %v7598_v30 = vpop.f32.mrb[180].mxu0 }
 0x346   : > { %8209 = vmatmul.mubr.bf16.gmra.mrb[172].mxu1 %v10645_v60  ;;  %5657 = vmatprep.mubr.bf16.mxu0 %v10809_v55  ;;  %v7599_v11 = vpop.f32.mrb[181].mxu0 }
 0x347   : > { %8212 = vmatprep.mubr.bf16.mxu1 %v10663_v38  ;;  %v10876_v45 = vadd.f32 %v7599_v11, %v7598_v30  ;;  %v7601_v14 = vpop.f32.mrb[182].mxu0 }
 0x348   : > { %v7602_v50 = vpop.f32.mrb[183].mxu0 }
 0x349   : > { %v10879_v54 = vadd.f32 %v7602_v50, %v7601_v14 }
 0x34d   : > { %5658 = vmatmul.mubr.bf16.gmra.mrb[28].mxu0 %v10785_v41 }
 0x34e   : > { %8213 = vmatmul.mubr.bf16.gmra.mrb[176].mxu1 %v10665_v24  ;;  %5665 = vmatprep.mubr.bf16.mxu0 %v5323_v18  ;;  %v10892_v24 = vld [vmem:[#allocation3 + $0x190] sm:$0xff] }
 0x34f   : > { %8216 = vmatprep.mubr.bf16.mxu1 %v10697_v12 }
 0x353   : > { %v7604_v60 = vpop.f32.mrb[184].mxu0 }
 0x354   : > { %v7605_v38 = vpop.f32.mrb[185].mxu0 }
 0x355   : > { %5666 = vmatmul.mubr.bf16.gmra.mrb[32].mxu0 %v10817_v42  ;;  %v10887_v13 = vadd.f32 %v7605_v38, %v7604_v60  ;;  %v7607_v46 = vpop.f32.mrb[186].mxu0  ;;  %v5312_v38 = vld [vmem:[#allocation3 + $0x130] sm:$0xff] }
 0x356   : > { %8217 = vmatmul.mubr.bf16.gmra.mrb[180].mxu1 %v10692_v63  ;;  %5673 = vmatprep.mubr.bf16.mxu0 %v10671_v37  ;;  %v7608_v3 = vpop.f32.mrb[187].mxu0 }
 0x357   : > { %8220 = vmatprep.mubr.bf16.mxu1 %v10705_v4  ;;  %v10889_v22 = vadd.f32 %v7608_v3, %v7607_v46 }
 0x35d   : > { %5674 = vmatmul.mubr.bf16.gmra.mrb[36].mxu0 %v10671_v37 }
 0x35e   : > { %8221 = vmatmul.mubr.bf16.gmra.mrb[184].mxu1 %v10892_v24 }
 0x35f   : > { %8240 = vmatprep.mubr.bf16.mxu1 %v10824_v43 }
 0x360   : > { %v7610_v63 = vpop.f32.mrb[188].mxu0 }
 0x361   : > { %v7611_v12 = vpop.f32.mrb[189].mxu0 }
 0x362   : > { %v10896_v16 = vadd.f32 %v7611_v12, %v7610_v63  ;;  %v7613_v4 = vpop.f32.mrb[190].mxu0 }
 0x363   : > { %v7614_v28 = vpop.f32.mrb[191].mxu0 }
 0x364   : > { %v10898_v10 = vadd.f32 %v7614_v28, %v7613_v4 }
 0x366   : > { %8241 = vmatmul.mubr.bf16.vlgmr.msra.gmra.mrb[156].mxu1 %v10828_v25 }
 0x367   : > { %8244 = vmatprep.mubr.bf16.mxu1 %v10839_v57 }
 0x368   : > { %v7616_v34 = vpop.f32.mrb[192].mxu0 }
 0x369   : > { %v7617_v40 = vpop.f32.mrb[193].mxu0 }
 0x36a   : > { %v10902_v47 = vadd.f32 %v7617_v40, %v7616_v34  ;;  %v7619_v31 = vpop.f32.mrb[194].mxu0 }
 0x36b   : > { %v7620_v15 = vpop.f32.mrb[195].mxu0 }
 0x36c   : > { %v10904_v19 = vadd.f32 %v7620_v15, %v7619_v31 }
 0x36e   : > { %8245 = vmatmul.mubr.bf16.gmra.mrb[160].mxu1 %v10842_v44 }
 0x36f   : > { %8248 = vmatprep.mubr.bf16.mxu1 %v5294_v52 }
 0x370   : > { %v7622_v17 = vpop.f32.mrb[196].mxu0 }
 0x371   : > { %v7623_v27 = vpop.f32.mrb[197].mxu0 }
 0x372   : > { %v10907_v1 = vadd.f32 %v7623_v27, %v7622_v17  ;;  %v7625_v41 = vpop.f32.mrb[198].mxu0 }
 0x373   : > { %v7626_v2 = vpop.f32.mrb[199].mxu0 }
 0x374   : > { %v10909_v5 = vadd.f32 %v7626_v2, %v7625_v41  ;;  %v5318_v41 = vld [vmem:[#allocation3 + $0x160] sm:$0xff] }
 0x376   : > { %8249 = vmatmul.mubr.bf16.gmra.mrb[164].mxu1 %v5297_v62 }
 0x377   : > { %8252 = vmatprep.mubr.bf16.mxu1 %v5300_v51 }
 0x378   : > { %v7628_v55 = vpop.f32.mrb[200].mxu0 }
 0x379   : > { %v7629_v42 = vpop.f32.mrb[201].mxu0  ;;  %v7716_v39 = vpop.f32.mrb[188].mxu1 }
 0x37a   : > { %v10911_v0 = vadd.f32 %v7629_v42, %v7628_v55  ;;  %v7631_v43 = vpop.f32.mrb[202].mxu0  ;;  %v7717_v25 = vpop.f32.mrb[189].mxu1 }
 0x37b   : > { %v7718_v58 = vadd.f32 %v7717_v25, %v7716_v39  ;;  %v7632_v23 = vpop.f32.mrb[203].mxu0  ;;  %v7719_v57 = vpop.f32.mrb[190].mxu1 }
 0x37c   : > { %v10913_v44 = vadd.f32 %v7632_v23, %v7631_v43  ;;  %v7720_v59 = vpop.f32.mrb[191].mxu1 }
 0x37d   : > { %v10916_v9 = vadd.f32 %v7718_v58, %v10750_v21  ;;  %v7721_v33 = vadd.f32 %v7720_v59, %v7719_v57 }
 0x37e   : > { %8253 = vmatmul.mubr.bf16.gmra.mrb[168].mxu1 %v5303_v48 }
 0x37f   : > { %v10919_v20 = vadd.f32 %v7721_v33, %v10761_v32  ;;  %8256 = vmatprep.mubr.bf16.mxu1 %v5306_v7  ;;  %v5309_v32 = vld [vmem:[#allocation3 + $0x118] sm:$0xff] }
 0x380   : > { %v7634_v6 = vpop.f32.mrb[204].mxu0 }
 0x381   : > { %v7635_v61 = vpop.f32.mrb[205].mxu0  ;;  %v7722_v29 = vpop.f32.mrb[192].mxu1 }
 0x382   : > { %v10921_v53 = vadd.f32 %v7635_v61, %v7634_v6  ;;  %v7637_v36 = vpop.f32.mrb[206].mxu0  ;;  %v7723_v8 = vpop.f32.mrb[193].mxu1 }
 0x383   : > { %v7724_v30 = vadd.f32 %v7723_v8, %v7722_v29  ;;  %v7638_v11 = vpop.f32.mrb[207].mxu0  ;;  %v7725_v14 = vpop.f32.mrb[194].mxu1 }
 0x384   : > { %v10923_v21 = vadd.f32 %v7638_v11, %v7637_v36  ;;  %v7726_v50 = vpop.f32.mrb[195].mxu1 }
 0x385   : > { %v10926_v18 = vadd.f32 %v7724_v30, %v10845_v26  ;;  %v7727_v60 = vadd.f32 %v7726_v50, %v7725_v14 }
 0x386   : > { %8257 = vmatmul.mubr.bf16.gmra.mrb[172].mxu1 %v5309_v32 }
 0x387   : > { %v10929_v46 = vadd.f32 %v7727_v60, %v10850_v56  ;;  %8260 = vmatprep.mubr.bf16.mxu1 %v5312_v38  ;;  %v5315_v56 = vld [vmem:[#allocation3 + $0x148] sm:$0xff] }
 0x388   : > { %v7640_v3 = vpop.f32.mrb[208].mxu0 }
 0x389   : > { %v7641_v63 = vpop.f32.mrb[209].mxu0  ;;  %v7728_v12 = vpop.f32.mrb[196].mxu1 }
 0x38a   : > { %v10931_v4 = vadd.f32 %v7641_v63, %v7640_v3  ;;  %v7643_v28 = vpop.f32.mrb[210].mxu0  ;;  %v7729_v34 = vpop.f32.mrb[197].mxu1 }
 0x38b   : > { %v7730_v40 = vadd.f32 %v7729_v34, %v7728_v12  ;;  %v7644_v31 = vpop.f32.mrb[211].mxu0  ;;  %v7731_v15 = vpop.f32.mrb[198].mxu1 }
 0x38c   : > { %v10933_v26 = vadd.f32 %v7644_v31, %v7643_v28  ;;  %v7732_v52 = vpop.f32.mrb[199].mxu1 }
 0x38d   : > { %v10936_v17 = vadd.f32 %v7730_v40, %v10861_v49  ;;  %v7733_v27 = vadd.f32 %v7732_v52, %v7731_v15 }
 0x38e   : > { %8261 = vmatmul.mubr.bf16.gmra.mrb[176].mxu1 %v5315_v56 }
 0x38f   : > { %v10939_v2 = vadd.f32 %v7733_v27, %v10863_v35  ;;  %8264 = vmatprep.mubr.bf16.mxu1 %v5318_v41  ;;  %v5321_v35 = vld [vmem:[#allocation3 + $0x178] sm:$0xff] }
 0x390   : > { %v7646_v62 = vpop.f32.mrb[212].mxu0 }
 0x391   : > { %v7647_v51 = vpop.f32.mrb[213].mxu0  ;;  %v7734_v55 = vpop.f32.mrb[200].mxu1 }
 0x392   : > { %v10941_v42 = vadd.f32 %v7647_v51, %v7646_v62  ;;  %v7649_v39 = vpop.f32.mrb[214].mxu0  ;;  %v7735_v43 = vpop.f32.mrb[201].mxu1 }
 0x393   : > { %v7736_v25 = vadd.f32 %v7735_v43, %v7734_v55  ;;  %v7650_v58 = vpop.f32.mrb[215].mxu0  ;;  %v7737_v23 = vpop.f32.mrb[202].mxu1 }
 0x394   : > { %v10943_v49 = vadd.f32 %v7650_v58, %v7649_v39  ;;  %v7738_v57 = vpop.f32.mrb[203].mxu1 }
 0x395   : > { %v10946_v59 = vadd.f32 %v7736_v25, %v10876_v45  ;;  %v7739_v33 = vadd.f32 %v7738_v57, %v7737_v23 }
 0x396   : > { %8265 = vmatmul.mubr.bf16.gmra.mrb[180].mxu1 %v5321_v35 }
 0x397   : > { %v10949_v48 = vadd.f32 %v7739_v33, %v10879_v54  ;;  %8268 = vmatprep.mubr.bf16.mxu1 %v10892_v24 }
 0x398   : > { %v7652_v7 = vpop.f32.mrb[216].mxu0 }
 0x399   : > { %v7653_v6 = vpop.f32.mrb[217].mxu0  ;;  %v7740_v61 = vpop.f32.mrb[204].mxu1 }
 0x39a   : > { %v10952_v29 = vadd.f32 %v7653_v6, %v7652_v7  ;;  %v7655_v36 = vpop.f32.mrb[218].mxu0  ;;  %v7741_v8 = vpop.f32.mrb[205].mxu1 }
 0x39b   : > { %v7742_v30 = vadd.f32 %v7741_v8, %v7740_v61  ;;  %v7656_v11 = vpop.f32.mrb[219].mxu0  ;;  %v7743_v14 = vpop.f32.mrb[206].mxu1 }
 0x39c   : > { %v10954_v45 = vadd.f32 %v7656_v11, %v7655_v36  ;;  %v7744_v50 = vpop.f32.mrb[207].mxu1 }
 0x39d   : > { %v10957_v60 = vadd.f32 %v7742_v30, %v10887_v13  ;;  %v7745_v54 = vadd.f32 %v7744_v50, %v7743_v14 }
 0x39e   : > { %8269 = vmatmul.mubr.bf16.gmra.mrb[184].mxu1 %v10671_v37 }
 0x39f   : > { %v10961_v24 = vadd.f32 %v7745_v54, %v10889_v22 }
 0x3a0   : > { %v7658_v32 = vpop.f32.mrb[220].mxu0 }
 0x3a1   : > { %v7659_v38 = vpop.f32.mrb[221].mxu0  ;;  %v7746_v3 = vpop.f32.mrb[208].mxu1 }
 0x3a2   : > { %v10963_v63 = vadd.f32 %v7659_v38, %v7658_v32  ;;  %v7661_v12 = vpop.f32.mrb[222].mxu0  ;;  %v7747_v28 = vpop.f32.mrb[209].mxu1 }
 0x3a3   : > { %v7748_v34 = vadd.f32 %v7747_v28, %v7746_v3  ;;  %v7662_v40 = vpop.f32.mrb[223].mxu0  ;;  %v7749_v31 = vpop.f32.mrb[210].mxu1 }
 0x3a4   : > { %v10965_v15 = vadd.f32 %v7662_v40, %v7661_v12  ;;  %v7750_v13 = vpop.f32.mrb[211].mxu1 }
 0x3a5   : > { %v10968_v52 = vadd.f32 %v7748_v34, %v10896_v16  ;;  %v7751_v37 = vadd.f32 %v7750_v13, %v7749_v31 }
 0x3a7   : > { %v10971_v22 = vadd.f32 %v7751_v37, %v10898_v10 }
 0x3a8   : > { %v7664_v27 = vpop.f32.mrb[224].mxu0 }
 0x3a9   : > { %v7665_v56 = vpop.f32.mrb[225].mxu0  ;;  %v7752_v41 = vpop.f32.mrb[212].mxu1 }
 0x3aa   : > { %v10973_v62 = vadd.f32 %v7665_v56, %v7664_v27  ;;  %v7667_v51 = vpop.f32.mrb[226].mxu0  ;;  %v7753_v55 = vpop.f32.mrb[213].mxu1 }
 0x3ab   : > { %v7754_v39 = vadd.f32 %v7753_v55, %v7752_v41  ;;  %v7668_v43 = vpop.f32.mrb[227].mxu0  ;;  %v7755_v25 = vpop.f32.mrb[214].mxu1 }
 0x3ac   : > { %v10975_v58 = vadd.f32 %v7668_v43, %v7667_v51  ;;  %v7756_v23 = vpop.f32.mrb[215].mxu1 }
 0x3ad   : > { %v10978_v16 = vadd.f32 %v7754_v39, %v10902_v47  ;;  %v7757_v57 = vadd.f32 %v7756_v23, %v7755_v25 }
 0x3af   : > { %v10981_v10 = vadd.f32 %v7757_v57, %v10904_v19 }
 0x3b0   : > { %v7670_v33 = vpop.f32.mrb[228].mxu0 }
 0x3b1   : > { %v7671_v35 = vpop.f32.mrb[229].mxu0  ;;  %v7758_v7 = vpop.f32.mrb[216].mxu1 }
 0x3b2   : > { %v10983_v6 = vadd.f32 %v7671_v35, %v7670_v33  ;;  %v7673_v61 = vpop.f32.mrb[230].mxu0  ;;  %v7759_v36 = vpop.f32.mrb[217].mxu1 }
 0x3b3   : > { %v7760_v8 = vadd.f32 %v7759_v36, %v7758_v7  ;;  %v7674_v30 = vpop.f32.mrb[231].mxu0  ;;  %v7761_v11 = vpop.f32.mrb[218].mxu1 }
 0x3b4   : > { %v10985_v14 = vadd.f32 %v7674_v30, %v7673_v61  ;;  %v7762_v50 = vpop.f32.mrb[219].mxu1 }
 0x3b5   : > { %v10988_v47 = vadd.f32 %v7760_v8, %v10907_v1  ;;  %v7763_v54 = vadd.f32 %v7762_v50, %v7761_v11 }
 0x3b7   : > { %v10991_v19 = vadd.f32 %v7763_v54, %v10909_v5 }
 0x3b8   : > { %v7852_v32 = vpop.f32.mrb[232].mxu0 }
 0x3b9   : > { %v7764_v38 = vpop.f32.mrb[220].mxu1  ;;  %v7853_v3 = vpop.f32.mrb[233].mxu0 }
 0x3ba   : > { %v7854_v12 = vadd.f32 %v7853_v3, %v7852_v32  ;;  %v7765_v28 = vpop.f32.mrb[221].mxu1  ;;  %v7855_v34 = vpop.f32.mrb[234].mxu0 }
 0x3bb   : > { %v7766_v40 = vadd.f32 %v7765_v28, %v7764_v38  ;;  %v7767_v31 = vpop.f32.mrb[222].mxu1  ;;  %v7856_v13 = vpop.f32.mrb[235].mxu0 }
 0x3bc   : > { %v7857_v37 = vadd.f32 %v7856_v13, %v7855_v34  ;;  %v7768_v27 = vpop.f32.mrb[223].mxu1  ;;  %v10997_v41 = vadd.f32 %v10916_v9, %v7854_v12 }
 0x3bd   : > { %v10994_v56 = vadd.f32 %v7766_v40, %v10911_v0  ;;  %v7769_v1 = vadd.f32 %v7768_v27, %v7767_v31 }
 0x3be   : > { %v11000_v5 = vadd.f32 %v10919_v20, %v7857_v37 }
 0x3bf   : > { %v11003_v51 = vadd.f32 %v7769_v1, %v10913_v44 }
 0x3c0   : > { %v7858_v55 = vpop.f32.mrb[236].mxu0 }
 0x3c1   : > { %v7770_v39 = vpop.f32.mrb[224].mxu1  ;;  %v7859_v43 = vpop.f32.mrb[237].mxu0 }
 0x3c2   : > { %v7860_v25 = vadd.f32 %v7859_v43, %v7858_v55  ;;  %v7771_v23 = vpop.f32.mrb[225].mxu1  ;;  %v7861_v57 = vpop.f32.mrb[238].mxu0 }
 0x3c3   : > { %v7772_v33 = vadd.f32 %v7771_v23, %v7770_v39  ;;  %v7773_v35 = vpop.f32.mrb[226].mxu1  ;;  %v7862_v0 = vpop.f32.mrb[239].mxu0 }
 0x3c4   : > { %v7863_v7 = vadd.f32 %v7862_v0, %v7861_v57  ;;  %v7774_v61 = vpop.f32.mrb[227].mxu1  ;;  %v11006_v9 = vadd.f32 %v10926_v18, %v7860_v25 }
 0x3c5   : > { %v11009_v20 = vadd.f32 %v7772_v33, %v10921_v53  ;;  %v7775_v36 = vadd.f32 %v7774_v61, %v7773_v35 }
 0x3c6   : > { %v11012_v44 = vadd.f32 %v10929_v46, %v7863_v7 }
 0x3c7   : > { %v11015_v8 = vadd.f32 %v7775_v36, %v10923_v21 }
 0x3c8   : > { %v7864_v30 = vpop.f32.mrb[240].mxu0 }
 0x3c9   : > { %v7776_v11 = vpop.f32.mrb[228].mxu1  ;;  %v7865_v50 = vpop.f32.mrb[241].mxu0 }
 0x3ca   : > { %v7866_v54 = vadd.f32 %v7865_v50, %v7864_v30  ;;  %v7777_v32 = vpop.f32.mrb[229].mxu1  ;;  %v7867_v38 = vpop.f32.mrb[242].mxu0 }
 0x3cb   : > { %v7778_v3 = vadd.f32 %v7777_v32, %v7776_v11  ;;  %v7779_v12 = vpop.f32.mrb[230].mxu1  ;;  %v7868_v18 = vpop.f32.mrb[243].mxu0 }
 0x3cc   : > { %v7869_v28 = vadd.f32 %v7868_v18, %v7867_v38  ;;  %v7780_v34 = vpop.f32.mrb[231].mxu1  ;;  %v11018_v53 = vadd.f32 %v10936_v17, %v7866_v54 }
 0x3cd   : > { %v11021_v46 = vadd.f32 %v7778_v3, %v10931_v4  ;;  %v7781_v40 = vadd.f32 %v7780_v34, %v7779_v12 }
 0x3ce   : > { %v11027_v27 = vadd.f32 %v10939_v2, %v7869_v28 }
 0x3cf   : > { %v11024_v21 = vadd.f32 %v7781_v40, %v10933_v26 }
 0x3d0   : > { %v7870_v31 = vpop.f32.mrb[244].mxu0 }
 0x3d1   : > { %v7782_v13 = vpop.f32.mrb[232].mxu1  ;;  %v7871_v37 = vpop.f32.mrb[245].mxu0 }
 0x3d2   : > { %v7872_v1 = vadd.f32 %v7871_v37, %v7870_v31  ;;  %v7783_v55 = vpop.f32.mrb[233].mxu1  ;;  %v7873_v39 = vpop.f32.mrb[246].mxu0 }
 0x3d3   : > { %v7784_v43 = vadd.f32 %v7783_v55, %v7782_v13  ;;  %v7785_v25 = vpop.f32.mrb[234].mxu1  ;;  %v7874_v17 = vpop.f32.mrb[247].mxu0 }
 0x3d4   : > { %v7875_v23 = vadd.f32 %v7874_v17, %v7873_v39  ;;  %v7786_v57 = vpop.f32.mrb[235].mxu1  ;;  %v11030_v4 = vadd.f32 %v10946_v59, %v7872_v1 }
 0x3d5   : > { %v11033_v26 = vadd.f32 %v7784_v43, %v10941_v42  ;;  %v7787_v33 = vadd.f32 %v7786_v57, %v7785_v25 }
 0x3d6   : > { %v11036_v35 = vadd.f32 %v10949_v48, %v7875_v23 }
 0x3d7   : > { %v11039_v2 = vadd.f32 %v7787_v33, %v10943_v49 }
 0x3d8   : > { %v7876_v0 = vpop.f32.mrb[248].mxu0 }
 0x3d9   : > { %v7788_v7 = vpop.f32.mrb[236].mxu1  ;;  %v7877_v61 = vpop.f32.mrb[249].mxu0 }
 0x3da   : > { %v7878_v36 = vadd.f32 %v7877_v61, %v7876_v0  ;;  %v7789_v30 = vpop.f32.mrb[237].mxu1  ;;  %v7879_v11 = vpop.f32.mrb[250].mxu0 }
 0x3db   : > { %v7790_v50 = vadd.f32 %v7789_v30, %v7788_v7  ;;  %v7791_v54 = vpop.f32.mrb[238].mxu1  ;;  %v7880_v59 = vpop.f32.mrb[251].mxu0 }
 0x3dc   : > { %v7881_v32 = vadd.f32 %v7880_v59, %v7879_v11  ;;  %v7792_v38 = vpop.f32.mrb[239].mxu1  ;;  %v11042_v42 = vadd.f32 %v10957_v60, %v7878_v36 }
 0x3dd   : > { %v11045_v48 = vadd.f32 %v7790_v50, %v10952_v29  ;;  %v7793_v3 = vadd.f32 %v7792_v38, %v7791_v54 }
 0x3de   : > { %v11048_v49 = vadd.f32 %v10961_v24, %v7881_v32 }
 0x3df   : > { %v11051_v12 = vadd.f32 %v7793_v3, %v10954_v45 }
 0x3e0   : > { %11653 = vst [vmem:[#allocation26_spill] sm:$0xff] %v11048_v49  ;;  %v7882_v18 = vpop.f32.mrb[252].mxu0 }
 0x3e1   : > { %v7794_v28 = vpop.f32.mrb[240].mxu1  ;;  %v7883_v34 = vpop.f32.mrb[253].mxu0 }
 0x3e2   : > { %v7884_v40 = vadd.f32 %v7883_v34, %v7882_v18  ;;  %v7795_v31 = vpop.f32.mrb[241].mxu1  ;;  %v7885_v13 = vpop.f32.mrb[254].mxu0 }
 0x3e3   : > { %v7796_v37 = vadd.f32 %v7795_v31, %v7794_v28  ;;  %v7797_v1 = vpop.f32.mrb[242].mxu1  ;;  %v7886_v60 = vpop.f32.mrb[255].mxu0 }
 0x3e4   : > { %v7887_v55 = vadd.f32 %v7886_v60, %v7885_v13  ;;  %v7798_v39 = vpop.f32.mrb[243].mxu1  ;;  %v11054_v29 = vadd.f32 %v10968_v52, %v7884_v40 }
 0x3e5   : > { %v11057_v24 = vadd.f32 %v7796_v37, %v10963_v63  ;;  %v7799_v43 = vadd.f32 %v7798_v39, %v7797_v1 }
 0x3e6   : > { %v11060_v45 = vadd.f32 %v10971_v22, %v7887_v55 }
 0x3e7   : > { %v11063_v25 = vadd.f32 %v7799_v43, %v10965_v15 }
 0x3e8   : > { %v7888_v17 = vpop.f32.mrb[0].mxu0 }
 0x3e9   : > { %v7800_v23 = vpop.f32.mrb[244].mxu1  ;;  %v7889_v57 = vpop.f32.mrb[1].mxu0 }
 0x3ea   : > { %v7890_v33 = vadd.f32 %v7889_v57, %v7888_v17  ;;  %v7801_v0 = vpop.f32.mrb[245].mxu1  ;;  %v7891_v7 = vpop.f32.mrb[2].mxu0  ;;  %v7278_v17 = vld [vmem:[%s8870_s28 + $0x24] sm:$0xf] }
 0x3eb   : > { %v7802_v61 = vadd.f32 %v7801_v0, %v7800_v23  ;;  %v7803_v36 = vpop.f32.mrb[246].mxu1  ;;  %v7892_v52 = vpop.f32.mrb[3].mxu0  ;;  %v7275_v0 = vld [vmem:[%s8870_s28 + $0x18] sm:$0xf] }
 0x3ec   : > { %v7893_v30 = vadd.f32 %v7892_v52, %v7891_v7  ;;  %v7804_v11 = vpop.f32.mrb[247].mxu1  ;;  %v11066_v63 = vadd.f32 %v10978_v16, %v7890_v33  ;;  %v6093_v33 = vshll.u32 %v7278_v17, 16 }
 0x3ed   : > { %v11069_v22 = vadd.f32 %v7802_v61, %v10973_v62  ;;  %v7805_v50 = vadd.f32 %v7804_v11, %v7803_v36  ;;  %v6069_v11 = vshll.u32 %v7275_v0, 16 }
 0x3ee   : > { %11654 = vst [vmem:[#allocation24_spill] sm:$0xff] %v11066_v63  ;;  %v11072_v15 = vadd.f32 %v10981_v10, %v7893_v30  ;;  %v6095_v52 = vrot.slane %v6093_v33, 5  ;;  %v6066_v30 = vshrl.u32 %v7275_v0, 16 }
 0x3ef   : > { %v11075_v54 = vadd.f32 %v7805_v50, %v10975_v58 }
 0x3f0   : > { %11655 = vst [vmem:[#allocation20_spill] sm:$0xff] %v11072_v15  ;;  %v7894_v59 = vpop.f32.mrb[4].mxu0 }
 0x3f1   : > { %v7806_v32 = vpop.f32.mrb[248].mxu1  ;;  %v7895_v38 = vpop.f32.mrb[5].mxu0 }
 0x3f2   : > { %v7896_v3 = vadd.f32 %v7895_v38, %v7894_v59  ;;  %v7807_v18 = vpop.f32.mrb[249].mxu1  ;;  %v7897_v28 = vpop.f32.mrb[6].mxu0 }
 0x3f3   : > { %v7808_v34 = vadd.f32 %v7807_v18, %v7806_v32  ;;  %v7809_v16 = vpop.f32.mrb[250].mxu1  ;;  %v7898_v40 = vpop.f32.mrb[7].mxu0  ;;  %v7276_v18 = vld [vmem:[%s8870_s28 + $0x1c] sm:$0xf] }
 0x3f4   : > { %v7899_v31 = vadd.f32 %v7898_v40, %v7897_v28  ;;  %v7810_v62 = vpop.f32.mrb[251].mxu1  ;;  %v11078_v13 = vadd.f32 %v10988_v47, %v7896_v3  ;;  %v7284_v40 = vld [vmem:[%s8870_s28 + $0x3c] sm:$0xf] }
 0x3f5   : > { %v11081_v10 = vadd.f32 %v7808_v34, %v10983_v6  ;;  %v7811_v58 = vadd.f32 %v7810_v62, %v7809_v16  ;;  %v6090_v6 = vshrl.u32 %v7278_v17, 16  ;;  %v6068_v34 = vrot.slane %v6066_v30, 4  ;;  %v7282_v17 = vld [vmem:[%s8870_s28 + $0x34] sm:$0xf] }
 0x3f6   : > { %11656 = vst [vmem:[#allocation31_spill] sm:$0xff] %v11078_v13  ;;  %v11084_v37 = vadd.f32 %v10991_v19, %v7899_v31  ;;  %v6071_v16 = vrot.slane %v6069_v11, 5  ;;  %v6138_v33 = vshrl.u32 %v7284_v40, 16 }
 0x3f7   : > { %v11087_v1 = vadd.f32 %v7811_v58, %v10985_v14  ;;  %v7279_v14 = vld [vmem:[%s8870_s28 + $0x28] sm:$0xf]  ;;  %v6092_v36 = vrot.slane %v6090_v6, 4  ;;  %v6075_v58 = vshll.u32 %v7276_v18, 16  ;;  %v6079_v6 = vshrl.u32 %v7276_v18, 16 }
 0x3f8   : > { %11657 = vst [vmem:[#allocation29_spill] sm:$0xff] %v11084_v37  ;;  %v7900_v60 = vpop.f32.mrb[8].mxu0  ;;  %v6099_v32 = vshll.u32 %v7279_v14, 16  ;;  %v6103_v3 = vshrl.u32 %v7279_v14, 16  ;;  %v6141_v14 = vshll.u32 %v7284_v40, 16 }
 0x3f9   : > { %v7901_v55 = vpop.f32.mrb[9].mxu0  ;;  %v6096_v28 = vor.u32 %v6095_v52, %v6092_v36  ;;  %v6081_v40 = vrot.slane %v6079_v6, 4  ;;  %v7303_v37 = vld [vmem:[%s8870_s28 + $0x88] sm:$0xf] }
 0x3fa   : > { %v7902_v39 = vadd.f32 %v7901_v55, %v7900_v60  ;;  %v7903_v43 = vpop.f32.mrb[10].mxu0  ;;  %v11106_v62 = vrot.slane %v6099_v32, 5  ;;  %v7285_v60 = vld [vmem:[%s8870_s28 + $0x40] sm:$0xf]  ;;  %v6077_v32 = vrot.slane %v6075_v58, 5 }
 0x3fb   : > { %v7904_v23 = vpop.f32.mrb[11].mxu0  ;;  %v6151_v36 = vshrl.u32 %v7285_v60, 16 }
 0x3fc   : > { %v7905_v57 = vadd.f32 %v7904_v23, %v7903_v43  ;;  %v11091_v47 = vadd.f32 %v10994_v56, %v7902_v39  ;;  %v6105_v39 = vrot.slane %v6103_v3, 4  ;;  %v7281_v43 = vld [vmem:[%s8870_s28 + $0x30] sm:$0xf]  ;;  %v11111_v23 = vrot.slane %v6096_v28, 4 }
 0x3fd   : > { %v6114_v30 = vshrl.u32 %v7281_v43, 16  ;;  %v6117_v11 = vshll.u32 %v7281_v43, 16  ;;  %v7290_v43 = vld [vmem:[%s8870_s28 + $0x54] sm:$0xf] }
 0x3fe   : > { %11658 = vst [vmem:[#allocation32_spill] sm:$0xff] %v11091_v47  ;;  %v11095_v19 = vadd.f32 %v11003_v51, %v7905_v57  ;;  %v6072_v57 = vor.u32 %v6071_v16, %v6068_v34  ;;  %v7277_v16 = vld [vmem:[%s8870_s28 + $0x20] sm:$0x1]  ;;  %v6102_v6 = vsel %vm11120_vm14, %v11111_v23, %v11106_v62 }
 0x400   : > { %11659 = vst [vmem:[#allocation30_spill] sm:$0xff] %v11095_v19  ;;  %v7906_v7 = vpop.f32.mrb[12].mxu0  ;;  %v6073_v28 = vrot.slane %v6072_v57, 4 }
 0x401   : > { %v7907_v61 = vpop.f32.mrb[13].mxu0 }
 0x402   : > { %v7908_v50 = vadd.f32 %v7907_v61, %v7906_v7  ;;  %v7909_v59 = vpop.f32.mrb[14].mxu0  ;;  %v6147_v61 = vshll.u32 %v7285_v60, 16  ;;  %v6140_v60 = vrot.slane %v6138_v33, 4 }
 0x403   : > { %v7910_v56 = vpop.f32.mrb[15].mxu0 }
 0x404   : > { %v7911_v38 = vadd.f32 %v7910_v56, %v7909_v59  ;;  %v11100_v51 = vadd.f32 %v11009_v20, %v7908_v50  ;;  %v6123_v50 = vshll.u32 %v7282_v17, 16  ;;  %v6127_v59 = vshrl.u32 %v7282_v17, 16 }
 0x405   : > { %v11125_v58 = vrot.slane %v6147_v61, 5  ;;  %v6116_v17 = vrot.slane %v6114_v30, 4  ;;  %v7283_v61 = vld [vmem:[%s8870_s28 + $0x38] sm:$0x1]  ;;  %v6186_v30 = vshrl.u32 %v7290_v43, 16 }
 0x406   : > { %11660 = vst [vmem:[#allocation33_spill] sm:$0xff] %v11100_v51  ;;  %v11104_v31 = vadd.f32 %v11015_v8, %v7911_v38  ;;  %v7280_v8 = vld [vmem:[%s8870_s28 + $0x2c] sm:$0x1]  ;;  %v6106_v38 = vor.u32 %v6105_v39, %v11106_v62  ;;  %v6153_v39 = vrot.slane %v6151_v36, 4  ;;  %v6129_v57 = vrot.slane %v6127_v59, 4 }
 0x407   : > { %v6109_v34 = vshll.u32 %v7280_v8, 16  ;;  %v6078_v36 = vsel %vm11120_vm14, %v6073_v28, %v6077_v32 }
 0x408   : > { %11661 = vst [vmem:[#allocation35_spill] sm:$0xff] %v11104_v31  ;;  %v7912_v55 = vpop.f32.mrb[16].mxu0  ;;  %v11138_v33 = vrot.slane %v6106_v38, 4  ;;  %v7291_v31 = vld [vmem:[%s8870_s28 + $0x58] sm:$0xf]  ;;  %v6154_v23 = vor.u32 %v6153_v39, %v11125_v58 }
 0x409   : > { %v7913_v20 = vpop.f32.mrb[17].mxu0 }
 0x40a   : > { %v7914_v0 = vadd.f32 %v7913_v20, %v7912_v55  ;;  %v7915_v7 = vpop.f32.mrb[18].mxu0  ;;  %v6143_v55 = vrot.slane %v6141_v14, 5  ;;  %v6119_v20 = vrot.slane %v6117_v11, 5  ;;  %v6085_v14 = vshll.u32 %v7277_v16, 16 }
 0x40b   : > { %v7916_v52 = vpop.f32.mrb[19].mxu0  ;;  %v6189_v11 = vshll.u32 %v7290_v43, 16  ;;  %v6133_v16 = vshll.u32 %v7283_v61, 16  ;;  %v6188_v43 = vrot.slane %v6186_v30, 4  ;;  %v7288_v30 = vld [vmem:[%s8870_s28 + $0x4c] sm:$0xf] }
 0x40c   : > { %v7917_v56 = vadd.f32 %v7916_v52, %v7915_v7  ;;  %v11116_v3 = vadd.f32 %v11021_v46, %v7914_v0  ;;  %v11131_v0 = vrot.slane %v6123_v50, 5  ;;  %v7286_v7 = vld [vmem:[%s8870_s28 + $0x44] sm:$0x1]  ;;  %v6111_v52 = vrot.slane %v6109_v34, 5  ;;  %v7287_v50 = vld [vmem:[%s8870_s28 + $0x48] sm:$0xf] }
 0x40d   : > { %v6157_v19 = vshll.u32 %v7286_v7, 16  ;;  %v6120_v62 = vor.u32 %v6119_v20, %v6116_v17  ;;  %v6162_v15 = vshrl.u32 %v7287_v50, 16  ;;  %v6165_v28 = vshll.u32 %v7287_v50, 16 }
 0x40e   : > { %11662 = vst [vmem:[#allocation34_spill] sm:$0xff] %v11116_v3  ;;  %v11129_v46 = vadd.f32 %v11024_v21, %v7917_v56  ;;  %v6144_v3 = vor.u32 %v6143_v55, %v6140_v60  ;;  %v6130_v38 = vor.u32 %v6129_v57, %v11131_v0  ;;  %v6087_v55 = vrot.slane %v6085_v14, 5 }
 0x40f   : > { %v11153_v17 = vunpack.c.l.bf16 %v6102_v6  ;;  %v6155_v20 = vrot.slane %v6154_v23, 4  ;;  %v6159_v57 = vrot.slane %v6157_v19, 5  ;;  %v6167_v50 = vrot.slane %v6165_v28, 5 }
 0x410   : > { %11665 = vst [vmem:[#allocation36_spill] sm:$0xff] %v11129_v46  ;;  %v7918_v8 = vpop.f32.mrb[20].mxu0  ;;  %v6082_v46 = vor.u32 %v6081_v40, %v6077_v32  ;;  %v6195_v32 = vshll.u32 %v7291_v31, 16  ;;  %v6199_v40 = vshrl.u32 %v7291_v31, 16  ;;  %v6145_v7 = vrot.slane %v6144_v3, 4 }
 0x411   : > { %v7919_v21 = vpop.f32.mrb[21].mxu0  ;;  %v6112_v19 = vsel %vm11120_vm14, %v11138_v33, %v6111_v52  ;;  %v6160_v23 = vsel %vm11120_vm14, %v6155_v20, %v6159_v57  ;;  %v7297_v20 = vld [vmem:[%s8870_s28 + $0x70] sm:$0xf] }
 0x412   : > { %v7920_v59 = vadd.f32 %v7919_v21, %v7918_v8  ;;  %v7921_v56 = vpop.f32.mrb[22].mxu0  ;;  %v6191_v8 = vrot.slane %v6189_v11, 5  ;;  %v6083_v60 = vrot.slane %v6082_v46, 4  ;;  %v6131_v21 = vrot.slane %v6130_v38, 4 }
 0x413   : > { %v7922_v47 = vpop.f32.mrb[23].mxu0  ;;  %v6164_v11 = vrot.slane %v6162_v15, 4  ;;  %v6135_v46 = vrot.slane %v6133_v16, 5  ;;  %v11158_v3 = vrot.slane %v6195_v32, 5  ;;  %v6150_v15 = vsel %vm11120_vm14, %v6145_v7, %v11125_v58 }
 0x414   : > { %v7923_v51 = vadd.f32 %v7922_v47, %v7921_v56  ;;  %v11148_v34 = vadd.f32 %v11033_v26, %v7920_v59  ;;  %v6121_v47 = vrot.slane %v6120_v62, 4  ;;  %v11155_v26 = vunpack.c.l.bf16 %v6078_v36 }
 0x415   : > { %v6192_v14 = vor.u32 %v6191_v8, %v6188_v43  ;;  %v6088_v36 = vsel %vm11120_vm14, %v6083_v60, %v6087_v55  ;;  %v6171_v38 = vshll.u32 %v7288_v30, 16  ;;  %v6175_v16 = vshrl.u32 %v7288_v30, 16  ;;  %v7296_v43 = vld [vmem:[%s8870_s28 + $0x6c] sm:$0xf] }
 0x416   : > { %11666 = vst [vmem:[#allocation10_spill] sm:$0xff] %v11148_v34  ;;  %v11151_v39 = vadd.f32 %v11039_v2, %v7923_v51  ;;  %v7292_v2 = vld [vmem:[%s8870_s28 + $0x5c] sm:$0x1]  ;;  %v6201_v51 = vrot.slane %v6199_v40, 4  ;;  %v6126_v62 = vsel %vm11120_vm14, %v6121_v47, %v11131_v0  ;;  %v6168_v52 = vor.u32 %v6167_v50, %v6164_v11  ;;  %v7289_v47 = vld [vmem:[%s8870_s28 + $0x50] sm:$0x1] }
 0x417   : > { %v6205_v28 = vshll.u32 %v7292_v2, 16  ;;  %v11178_v58 = vunpack.c.l.bf16 %v6112_v19  ;;  %v6136_v0 = vsel %vm11120_vm14, %v6131_v21, %v6135_v46  ;;  %v11182_v32 = vrot.slane %v6192_v14, 4  ;;  %v7293_v11 = vld [vmem:[%s8870_s28 + $0x60] sm:$0xf] }
 0x418   : > { %11667 = vst [vmem:[#allocation27_spill] sm:$0xff] %v11151_v39  ;;  %v7924_v61 = vpop.f32.mrb[24].mxu0  ;;  %v6202_v40 = vor.u32 %v6201_v51, %v11158_v3  ;;  %v11185_v60 = vunpack.c.l.bf16 %v6088_v36  ;;  %v11187_v55 = vunpack.c.l.bf16 %v6150_v15  ;;  %v11189_v7 = vunpack.c.l.bf16 %v6160_v23  ;;  %v7294_v51 = vld [vmem:[%s8870_s28 + $0x64] sm:$0xf] }
 0x419   : > { %v7925_v31 = vpop.f32.mrb[25].mxu0  ;;  %v11196_v57 = vunpack.c.l.bf16 %v6126_v62  ;;  %v6234_v21 = vshrl.u32 %v7296_v43, 16  ;;  %v6237_v30 = vshll.u32 %v7296_v43, 16  ;;  %v11203_v46 = vrot.slane %v6168_v52, 4  ;;  %v7302_v15 = vld [vmem:[%s8870_s28 + $0x84] sm:$0xf] }
 0x41a   : > { %v7926_v6 = vadd.f32 %v7925_v31, %v7924_v61  ;;  %v7927_v59 = vpop.f32.mrb[26].mxu0  ;;  %v11198_v61 = vrot.slane %v6171_v38, 5  ;;  %v11201_v31 = vunpack.c.l.bf16 %v6136_v0  ;;  %v11205_v14 = vrot.slane %v6205_v28, 5  ;;  %v7299_v52 = vld [vmem:[%s8870_s28 + $0x78] sm:$0xf] }
 0x41b   : > { %v7928_v56 = vpop.f32.mrb[27].mxu0  ;;  %v6177_v2 = vrot.slane %v6175_v16, 4  ;;  %v6181_v19 = vshll.u32 %v7289_v47, 16  ;;  %v6243_v36 = vshll.u32 %v7297_v20, 16  ;;  %v6247_v23 = vshrl.u32 %v7297_v20, 16 }
 0x41c   : > { %v7929_v33 = vadd.f32 %v7928_v56, %v7927_v59  ;;  %v11176_v8 = vadd.f32 %v11045_v48, %v7926_v6  ;;  %v11212_v59 = vrot.slane %v6202_v40, 4  ;;  %v6210_v38 = vshrl.u32 %v7293_v11, 16 }
 0x41d   : > { %v6236_v28 = vrot.slane %v6234_v21, 4  ;;  %v6239_v43 = vrot.slane %v6237_v30, 5  ;;  %v6219_v0 = vshll.u32 %v7294_v51, 16  ;;  %v6282_v6 = vshrl.u32 %v7302_v15, 16 }
 0x41e   : > { %11668 = vst [vmem:[#allocation15_spill] sm:$0xff] %v11176_v8  ;;  %v11194_v48 = vadd.f32 %v11051_v12, %v7929_v33  ;;  %v6213_v33 = vshll.u32 %v7293_v11, 16  ;;  %v6285_v40 = vshll.u32 %v7302_v15, 16  ;;  %v11220_v20 = vrot.slane %v6243_v36, 5  ;;  %v7298_v11 = vld [vmem:[%s8870_s28 + $0x74] sm:$0x1] }
 0x41f   : > { %v6261_v39 = vshll.u32 %v7299_v52, 16  ;;  %v6212_v21 = vrot.slane %v6210_v38, 4  ;;  %v6249_v30 = vrot.slane %v6247_v23, 4  ;;  %v11235_v36 = vrot.slane %v6181_v19, 5 }
 0x420   : > { %11669 = vst [vmem:[#allocation25_spill] sm:$0xff] %v11194_v48  ;;  %v7930_v50 = vpop.f32.mrb[28].mxu0  ;;  %v6223_v48 = vshrl.u32 %v7294_v51, 16  ;;  %v6215_v34 = vrot.slane %v6213_v33, 5  ;;  %v6240_v15 = vor.u32 %v6239_v43, %v6236_v28  ;;  %v11239_v38 = vrot.slane %v6219_v0, 5 }
 0x421   : > { %v7931_v12 = vpop.f32.mrb[29].mxu0  ;;  %v6287_v33 = vrot.slane %v6285_v40, 5 }
 0x422   : > { %v7932_v56 = vadd.f32 %v7931_v12, %v7930_v50  ;;  %v7933_v62 = vpop.f32.mrb[30].mxu0  ;;  %v6178_v50 = vor.u32 %v6177_v2, %v11198_v61  ;;  %v6258_v12 = vshrl.u32 %v7299_v52, 16  ;;  %v6208_v2 = vsel %vm11120_vm14, %v11212_v59, %v11205_v14 }
 0x423   : > { %v7934_v16 = vpop.f32.mrb[31].mxu0  ;;  %v6216_v13 = vor.u32 %v6215_v34, %v6212_v21  ;;  %v6250_v14 = vor.u32 %v6249_v30, %v11220_v20  ;;  %v6253_v59 = vshll.u32 %v7298_v11, 16 }
 0x424   : > { %v7935_v8 = vadd.f32 %v7934_v16, %v7933_v62  ;;  %v11217_v47 = vadd.f32 %v11057_v24, %v7932_v56  ;;  %v6174_v24 = vsel %vm11120_vm14, %v11203_v46, %v11198_v61  ;;  %v7295_v56 = vld [vmem:[%s8870_s28 + $0x68] sm:$0x1]  ;;  %v7300_v62 = vld [vmem:[%s8870_s28 + $0x7c] sm:$0xf]  ;;  %v6291_v16 = vshll.u32 %v7303_v37, 16 }
 0x425   : > { %v6260_v61 = vrot.slane %v6258_v12, 4  ;;  %v6263_v46 = vrot.slane %v6261_v39, 5  ;;  %v6179_v28 = vrot.slane %v6178_v50, 4  ;;  %v6229_v43 = vshll.u32 %v7295_v56, 16  ;;  %v7304_v50 = vld [vmem:[%s8870_s28 + $0x8c] sm:$0x1] }
 0x426   : > { %11670 = vst [vmem:[#allocation8_spill] sm:$0xff] %v11217_v47  ;;  %v11225_v51 = vadd.f32 %v11063_v25, %v7935_v8  ;;  %v6225_v25 = vrot.slane %v6223_v48, 4  ;;  %v6284_v8 = vrot.slane %v6282_v6, 4  ;;  %v6267_v0 = vshll.u32 %v7300_v62, 16 }
 0x427   : > { %v6271_v49 = vshrl.u32 %v7300_v62, 16  ;;  %v6241_v39 = vrot.slane %v6240_v15, 4  ;;  %v6293_v12 = vrot.slane %v6291_v16, 5  ;;  %v6264_v34 = vor.u32 %v6263_v46, %v6260_v61  ;;  %v7301_v15 = vld [vmem:[%s8870_s28 + $0x80] sm:$0x1] }
 0x428   : > { %11671 = vst [vmem:[#allocation6_spill] sm:$0xff] %v11225_v51  ;;  %v7936_v23 = vpop.f32.mrb[32].mxu0  ;;  %v6295_v51 = vshrl.u32 %v7303_v37, 16  ;;  %v6226_v6 = vor.u32 %v6225_v25, %v11239_v38  ;;  %v6288_v40 = vor.u32 %v6287_v33, %v6284_v8  ;;  %v6217_v11 = vrot.slane %v6216_v13, 4 }
 0x429   : > { %v7937_v52 = vpop.f32.mrb[33].mxu0  ;;  %v6251_v30 = vrot.slane %v6250_v14, 4  ;;  %v11260_v13 = vunpack.c.l.bf16 %v6208_v2  ;;  %v6231_v33 = vrot.slane %v6229_v43, 5  ;;  %v6301_v61 = vshll.u32 %v7304_v50, 16 }
 0x42a   : > { %v7938_v47 = vadd.f32 %v7937_v52, %v7936_v23  ;;  %v7939_v63 = vpop.f32.mrb[34].mxu0  ;;  %v6297_v21 = vrot.slane %v6295_v51, 4  ;;  %v6255_v23 = vrot.slane %v6253_v59, 5  ;;  %v6273_v51 = vrot.slane %v6271_v49, 4  ;;  %v7308_v52 = vld [vmem:[%s8870_s28 + $0x9c] sm:$0xf] }
 0x42b   : > { %v7940_v19 = vpop.f32.mrb[35].mxu0  ;;  %v6227_v8 = vrot.slane %v6226_v6, 4  ;;  %v6246_v49 = vsel %vm11120_vm14, %v6241_v39, %v11220_v20  ;;  %v6222_v2 = vsel %vm11120_vm14, %v6217_v11, %v11239_v38  ;;  %v7305_v6 = vld [vmem:[%s8870_s28 + $0x90] sm:$0xf]  ;;  %v6303_v11 = vrot.slane %v6301_v61, 5 }
 0x42c   : > { %v7941_v48 = vadd.f32 %v7940_v19, %v7939_v63  ;;  %v11244_v37 = vadd.f32 %v11069_v22, %v7938_v47  ;;  %v11672_v63 = vsel %vm11120_vm14, %v11182_v32, %v11158_v3  ;;  %v11257_v22 = vunpack.c.l.bf16 %v6174_v24  ;;  %v7309_v19 = vld [vmem:[%s8870_s28 + $0xa0] sm:$0xf]  ;;  %v7306_v61 = vld [vmem:[%s8870_s28 + $0x94] sm:$0xf] }
 0x42d   : > { %v11255_v62 = vunpack.c.l.bf16 %v11672_v63  ;;  %v6269_v47 = vrot.slane %v6267_v0, 5  ;;  %v6184_v3 = vsel %vm11120_vm14, %v6179_v28, %v11235_v36  ;;  %v6265_v32 = vrot.slane %v6264_v34, 4 }
 0x42e   : > { %v11248_v56 = vadd.f32 %v11075_v54, %v7941_v48  ;;  %v6289_v54 = vrot.slane %v6288_v40, 4  ;;  %v6298_v24 = vor.u32 %v6297_v21, %v6293_v12  ;;  %v6256_v59 = vsel %vm11120_vm14, %v6251_v30, %v6255_v23 }
 0x42f   : > { %v6274_v0 = vor.u32 %v6273_v51, %v6269_v47  ;;  %v6277_v36 = vshll.u32 %v7301_v15, 16  ;;  %v6330_v28 = vshrl.u32 %v7308_v52, 16  ;;  %v6333_v48 = vshll.u32 %v7308_v52, 16 }
 0x430   : > { %v7942_v25 = vpop.f32.mrb[36].mxu0  ;;  %v6232_v34 = vsel %vm11120_vm14, %v6227_v8, %v6231_v33  ;;  %v6294_v20 = vsel %vm11120_vm14, %v6289_v54, %v6293_v12  ;;  %v6270_v38 = vsel %vm11120_vm14, %v6265_v32, %v6269_v47  ;;  %v6299_v21 = vrot.slane %v6298_v24, 4 }
 0x431   : > { %v7943_v16 = vpop.f32.mrb[37].mxu0  ;;  %v6339_v30 = vshll.u32 %v7309_v19, 16  ;;  %v6343_v23 = vshrl.u32 %v7309_v19, 16  ;;  %v6306_v50 = vshrl.u32 %v7305_v6, 16  ;;  %v6309_v63 = vshll.u32 %v7305_v6, 16 }
 0x432   : > { %v7944_v46 = vadd.f32 %v7943_v16, %v7942_v25  ;;  %v7945_v14 = vpop.f32.mrb[38].mxu0  ;;  %v6275_v51 = vrot.slane %v6274_v0, 4  ;;  %v6279_v25 = vrot.slane %v6277_v36, 5  ;;  %v6332_v8 = vrot.slane %v6330_v28, 4  ;;  %v11299_v16 = vld [vmem:[%s11529_s4] ss:$0 sm:$0xff] }
 0x433   : > { %v7946_v43 = vpop.f32.mrb[39].mxu0  ;;  %v6335_v12 = vrot.slane %v6333_v48, 5  ;;  %v11288_v33 = vunpack.c.l.bf16 %v6184_v3  ;;  %v11292_v47 = vunpack.c.l.bf16 %v6222_v2  ;;  %v11294_v54 = vunpack.c.l.bf16 %v6256_v59  ;;  %v7310_v19 = vld [vmem:[%s8870_s28 + $0xa4] sm:$0x1] }
 0x434   : > { %v7947_v40 = vadd.f32 %v7946_v43, %v7945_v14  ;;  %v11281_v39 = vadd.f32 %v11081_v10, %v7944_v46  ;;  %v11290_v10 = vunpack.c.l.bf16 %v6246_v49  ;;  %v11303_v32 = vunpack.c.l.bf16 %v6294_v20 }
 0x435   : > { %v11305_v24 = vunpack.c.l.bf16 %v6270_v38  ;;  %v6304_v3 = vsel %vm11120_vm14, %v6299_v21, %v6303_v11  ;;  %v11311_v49 = vrot.slane %v6339_v30, 5  ;;  %v6308_v2 = vrot.slane %v6306_v50, 4  ;;  %v7307_v30 = vld [vmem:[%s8870_s28 + $0x98] sm:$0x1] }
 0x436   : > { %v11286_v15 = vadd.f32 %v11087_v1, %v7947_v40  ;;  %v11301_v1 = vunpack.c.l.bf16 %v6232_v34  ;;  %v6311_v59 = vrot.slane %v6309_v63, 5  ;;  %v6280_v36 = vsel %vm11120_vm14, %v6275_v51, %v6279_v25 }
 0x437   : > { %v6336_v28 = vor.u32 %v6335_v12, %v6332_v8  ;;  %v6345_v48 = vrot.slane %v6343_v23, 4  ;;  %v6315_v34 = vshll.u32 %v7306_v61, 16  ;;  %v6319_v20 = vshrl.u32 %v7306_v61, 16 }
 0x438   : > { %v6349_v11 = vshll.u32 %v7310_v19, 16  ;;  %v11326_v63 = vunpack.c.l.bf16 %v6280_v36  ;;  %v6312_v51 = vor.u32 %v6311_v59, %v6308_v2 }
 0x439   : > { %v8242_v52 = vpop.f32.mrb[156].mxu1  ;;  %v6337_v12 = vrot.slane %v6336_v28, 4  ;;  %v6321_v61 = vrot.slane %v6319_v20, 4 }
 0x43a   : > { %v8306_v46 = vadd.f32 %v11006_v9, %v8242_v52  ;;  %v5716_v14 = vpop.f32.mrb[157].mxu1  ;;  %v6346_v52 = vor.u32 %v6345_v48, %v11311_v49  ;;  %v6351_v19 = vrot.slane %v6349_v11, 5  ;;  %v6313_v28 = vrot.slane %v6312_v51, 4 }
 0x43b   : > { %v8309_v43 = vadd.f32 %v10997_v41, %v5716_v14  ;;  %v8243_v0 = vpop.f32.mrb[158].mxu1  ;;  %v11321_v41 = vunpack.c.l.bf16 %v6304_v3  ;;  %v6317_v3 = vrot.slane %v6315_v34, 5 }
 0x43c   : > { %v6032_v6 = vadd.f32 %v8306_v46, %v11299_v16  ;;  %v8312_v9 = vadd.f32 %v11012_v44, %v8243_v0  ;;  %v5719_v40 = vpop.f32.mrb[159].mxu1  ;;  %v7314_v44 = vld [vmem:[%s8870_s28 + $0xb4] sm:$0xf]  ;;  %v6325_v46 = vshll.u32 %v7307_v30, 16 }
 0x43d   : > { %v6030_v38 = vadd.f32 %v8309_v43, %v11299_v16  ;;  %v8315_v21 = vadd.f32 %v11000_v5, %v5719_v40  ;;  %v6378_v43 = vshrl.u32 %v7314_v44, 16  ;;  %v6381_v2 = vshll.u32 %v7314_v44, 16 }
 0x43e   : > { %v6515_v50 = vadd.f32 %v11153_v17, %v6032_v6  ;;  %v6033_v23 = vadd.f32 %v8312_v9, %v11299_v16  ;;  %v6347_v9 = vrot.slane %v6346_v52, 4  ;;  %v6318_v51 = vsel %vm11120_vm14, %v6313_v28, %v6317_v3 }
 0x43f   : > { %v6513_v25 = vadd.f32 %v11155_v26, %v6030_v38  ;;  %v6031_v8 = vadd.f32 %v8315_v21, %v11299_v16  ;;  %v6322_v38 = vor.u32 %v6321_v61, %v6317_v3  ;;  %v6380_v44 = vrot.slane %v6378_v43, 4  ;;  %v7311_v43 = vld [vmem:[%s8870_s28 + $0xa8] sm:$0xf] }
 0x440   : > { %v6516_v5 = vadd.f32 %v11178_v58, %v6033_v23  ;;  %v6547_v59 = vmax.f32 %v6515_v50, 0.0 }
 0x441   : > { %v6514_v17 = vadd.f32 %v11185_v60, %v6031_v8  ;;  %v8246_v14 = vpop.f32.mrb[160].mxu1  ;;  %v6545_v6 = vmax.f32 %v6513_v25, 0.0  ;;  %v6352_v8 = vsel %vm11120_vm14, %v6347_v9, %v6351_v19  ;;  %v11363_v52 = vrot.slane %v6322_v38, 4 }
 0x442   : > { %v6548_v0 = vmax.f32 %v6516_v5, 0.0  ;;  %v8318_v26 = vadd.f32 %v11030_v4, %v8246_v14  ;;  %v5732_v36 = vpop.f32.mrb[161].mxu1  ;;  %v11365_v5 = vrot.slane %v6325_v46, 5  ;;  %v6354_v9 = vshrl.u32 %v7311_v43, 16 }
 0x443   : > { %v6546_v58 = vmax.f32 %v6514_v17, 0.0  ;;  %v8321_v60 = vadd.f32 %v11018_v53, %v5732_v36  ;;  %v8247_v48 = vpop.f32.mrb[162].mxu1  ;;  %v6342_v53 = vsel %vm11120_vm14, %v6337_v12, %v11311_v49  ;;  %v6383_v49 = vrot.slane %v6381_v2, 5 }
 0x444   : > { %v7399_v40 = vpack.c.bf16 %v6548_v0, %v6547_v59  ;;  %v6036_v34 = vadd.f32 %v8318_v26, %v11299_v16  ;;  %v8324_v4 = vadd.f32 %v11036_v35, %v8247_v48  ;;  %v5735_v20 = vpop.f32.mrb[163].mxu1  ;;  %v7315_v35 = vld [vmem:[%s8870_s28 + $0xb8] sm:$0xf]  ;;  %v11368_v17 = vunpack.c.l.bf16 %v6318_v51 }
 0x445   : > { %v7394_v21 = vpack.c.bf16 %v6546_v58, %v6545_v6  ;;  %v6034_v11 = vadd.f32 %v8321_v60, %v11299_v16  ;;  %v8327_v30 = vadd.f32 %v11027_v27, %v5735_v20  ;;  %v6391_v14 = vshrl.u32 %v7315_v35, 16  ;;  %v7312_v6 = vld [vmem:[%s8870_s28 + $0xac] sm:$0xf] }
 0x446   : > { %7471 = vst [vmem:[%s11339_s14 + $0x8] sm:$0xff] %v7399_v40   ;;  %v6519_v50 = vadd.f32 %v11187_v55, %v6036_v34  ;;  %v6037_v23 = vadd.f32 %v8324_v4, %v11299_v16  ;;  %v11361_v55 = vunpack.c.l.bf16 %v6342_v53  ;;  %v11372_v0 = vunpack.c.l.bf16 %v6352_v8  ;;  %v11673_v4 = vld [vmem:[#allocation26_spill] sm:$0xff] }
 0x447   : > { %7395 = vst [vmem:[%s11339_s14] sm:$0xff] %v7394_v21   ;;  %v6517_v25 = vadd.f32 %v11196_v57, %v6034_v11  ;;  %v6035_v27 = vadd.f32 %v8327_v30, %v11299_v16  ;;  %v6387_v57 = vshll.u32 %v7315_v35, 16  ;;  %v6384_v28 = vor.u32 %v6383_v49, %v6380_v44  ;;  %v7313_v53 = vld [vmem:[%s8870_s28 + $0xb0] sm:$0x1] }
 0x448   : > { %v6520_v12 = vadd.f32 %v11189_v7, %v6037_v23  ;;  %v6551_v59 = vmax.f32 %v6519_v50, 0.0  ;;  %v6357_v38 = vshll.u32 %v7311_v43, 16  ;;  %v6328_v11 = vsel %vm11120_vm14, %v11363_v52, %v11365_v5 }
 0x449   : > { %v6518_v3 = vadd.f32 %v11201_v31, %v6035_v27  ;;  %v8250_v61 = vpop.f32.mrb[164].mxu1  ;;  %v6549_v26 = vmax.f32 %v6517_v25, 0.0  ;;  %v6363_v30 = vshll.u32 %v7312_v6, 16  ;;  %v11392_v51 = vrot.slane %v6387_v57, 5 }
 0x44a   : > { %v6552_v19 = vmax.f32 %v6520_v12, 0.0  ;;  %v8330_v2 = vadd.f32 %v11054_v29, %v8250_v61  ;;  %v5748_v7 = vpop.f32.mrb[165].mxu1  ;;  %v6393_v35 = vrot.slane %v6391_v14, 4  ;;  %v11395_v44 = vrot.slane %v6384_v28, 4  ;;  %v11674_v61 = vld [vmem:[#allocation31_spill] sm:$0xff] }
 0x44b   : > { %v6550_v46 = vmax.f32 %v6518_v3, 0.0  ;;  %v8333_v36 = vadd.f32 %v11042_v42, %v5748_v7  ;;  %v8251_v31 = vpop.f32.mrb[166].mxu1  ;;  %v6356_v25 = vrot.slane %v6354_v9, 4  ;;  %v6367_v27 = vshrl.u32 %v7312_v6, 16 }
 0x44c   : > { %v7409_v58 = vpack.c.bf16 %v6552_v19, %v6551_v59  ;;  %v6040_v60 = vadd.f32 %v8330_v2, %v11299_v16  ;;  %v8336_v48 = vadd.f32 %v11060_v45, %v8251_v31  ;;  %v5751_v29 = vpop.f32.mrb[167].mxu1  ;;  %v7316_v45 = vld [vmem:[%s8870_s28 + $0xbc] sm:$0x1]  ;;  %v6359_v12 = vrot.slane %v6357_v38, 5  ;;  %v11675_v19 = vld [vmem:[#allocation24_spill] sm:$0xff]  ;;  %v11676_v31 = vld [vmem:[#allocation29_spill] sm:$0xff] }
 0x44d   : > { %v7404_v40 = vpack.c.bf16 %v6550_v46, %v6549_v26  ;;  %v6038_v34 = vadd.f32 %v8333_v36, %v11299_v16  ;;  %v8339_v20 = vadd.f32 %v11673_v4, %v5751_v29  ;;  %v6397_v52 = vshll.u32 %v7316_v45, 16  ;;  %v7320_v26 = vld [vmem:[%s8870_s28 + $0xcc] sm:$0xf]  ;;  %v11677_v29 = vld [vmem:[#allocation20_spill] sm:$0xff]  ;;  %v11414_v38 = vld [vmem:[%s8870_s28 + $0xd0] sm:$0xf] }
 0x44e   : > { %7473 = vst [vmem:[%s11339_s14 + $0x18] sm:$0xff] %v7409_v58   ;;  %v6523_v42 = vadd.f32 %v11255_v62, %v6040_v60  ;;  %v6041_v21 = vadd.f32 %v8336_v48, %v11299_v16  ;;  %v6373_v5 = vshll.u32 %v7313_v53, 16  ;;  %v11399_v59 = vrot.slane %v6363_v30, 5 }
 0x44f   : > { %7472 = vst [vmem:[%s11339_s14 + $0x10] sm:$0xff] %v7404_v40   ;;  %v6521_v50 = vadd.f32 %v11257_v22, %v6038_v34  ;;  %v6039_v23 = vadd.f32 %v8339_v20, %v11299_v16  ;;  %v6369_v58 = vrot.slane %v6367_v27, 4  ;;  %v6360_v40 = vor.u32 %v6359_v12, %v6356_v25 }
 0x450   : > { %v6524_v62 = vadd.f32 %v11260_v13, %v6041_v21  ;;  %v6555_v3 = vmax.f32 %v6523_v42, 0.0  ;;  %v11411_v20 = vunpack.c.l.bf16 %v6328_v11  ;;  %v6426_v42 = vshrl.u32 %v7320_v26, 16 }
 0x451   : > { %v6522_v8 = vadd.f32 %v11288_v33, %v6039_v23  ;;  %v8254_v49 = vpop.f32.mrb[168].mxu1  ;;  %v6553_v13 = vmax.f32 %v6521_v50, 0.0  ;;  %v6394_v33 = vor.u32 %v6393_v35, %v11392_v51  ;;  %v6390_v45 = vsel %vm11120_vm14, %v11395_v44, %v11392_v51 }
 0x452   : > { %v6556_v22 = vmax.f32 %v6524_v62, 0.0  ;;  %v8342_v43 = vadd.f32 %v11674_v61, %v8254_v49  ;;  %v5764_v57 = vpop.f32.mrb[169].mxu1  ;;  %v6429_v53 = vshll.u32 %v7320_v26, 16  ;;  %v11424_v50 = vrot.slane %v6397_v52, 5  ;;  %v7317_v52 = vld [vmem:[%s8870_s28 + $0xc0] sm:$0xf] }
 0x453   : > { %v6554_v14 = vmax.f32 %v6522_v8, 0.0  ;;  %v8345_v2 = vadd.f32 %v11675_v19, %v5764_v57  ;;  %v8255_v7 = vpop.f32.mrb[170].mxu1  ;;  %v6370_v11 = vor.u32 %v6369_v58, %v11399_v59  ;;  %v11427_v23 = vrot.slane %v6373_v5, 5  ;;  %v11678_v8 = vld [vmem:[#allocation33_spill] sm:$0xff] }
 0x454   : > { %v7419_v46 = vpack.c.bf16 %v6556_v22, %v6555_v3  ;;  %v6044_v36 = vadd.f32 %v8342_v43, %v11299_v16  ;;  %v8348_v28 = vadd.f32 %v11676_v31, %v8255_v7  ;;  %v5767_v6 = vpop.f32.mrb[171].mxu1  ;;  %v11430_v62 = vrot.slane %v6360_v40, 4  ;;  %v11679_v22 = vld [vmem:[#allocation32_spill] sm:$0xff] }
 0x455   : > { %v7414_v60 = vpack.c.bf16 %v6554_v14, %v6553_v13  ;;  %v6042_v48 = vadd.f32 %v8345_v2, %v11299_v16  ;;  %v8351_v9 = vadd.f32 %v11677_v29, %v5767_v6  ;;  %v11432_v25 = vrot.slane %v6394_v33, 4  ;;  %v11680_v14 = vld [vmem:[#allocation35_spill] sm:$0xff] }
 0x456   : > { %7475 = vst [vmem:[%s11339_s14 + $0x28] sm:$0xff] %v7419_v46   ;;  %v6527_v34 = vadd.f32 %v11290_v10, %v6044_v36  ;;  %v6045_v4 = vadd.f32 %v8348_v28, %v11299_v16  ;;  %v6435_v27 = vshll.u32 %v11414_v38, 16  ;;  %v6428_v12 = vrot.slane %v6426_v42, 4  ;;  %v11681_v46 = vld [vmem:[#allocation30_spill] sm:$0xff] }
 0x457   : > { %7474 = vst [vmem:[%s11339_s14 + $0x20] sm:$0xff] %v7414_v60   ;;  %v6525_v21 = vadd.f32 %v11292_v47, %v6042_v48  ;;  %v6043_v30 = vadd.f32 %v8351_v9, %v11299_v16  ;;  %v6431_v43 = vrot.slane %v6429_v53, 5  ;;  %v6371_v7 = vrot.slane %v6370_v11, 4  ;;  %v7318_v48 = vld [vmem:[%s8870_s28 + $0xc4] sm:$0xf] }
 0x458   : > { %v6528_v10 = vadd.f32 %v11294_v54, %v6045_v4  ;;  %v6559_v51 = vmax.f32 %v6527_v34, 0.0  ;;  %v6402_v31 = vshrl.u32 %v7317_v52, 16  ;;  %v11445_v58 = vunpack.c.l.bf16 %v6390_v45 }
 0x459   : > { %v6526_v35 = vadd.f32 %v11301_v1, %v6043_v30  ;;  %v8258_v47 = vpop.f32.mrb[172].mxu1  ;;  %v6557_v3 = vmax.f32 %v6525_v21, 0.0  ;;  %v6439_v60 = vshrl.u32 %v11414_v38, 16  ;;  %v6400_v40 = vsel %vm11120_vm14, %v11432_v25, %v11424_v50  ;;  %v11682_v50 = vld [vmem:[#allocation10_spill] sm:$0xff] }
 0x45a   : > { %v6560_v44 = vmax.f32 %v6528_v10, 0.0  ;;  %v8354_v49 = vadd.f32 %v11678_v8, %v8258_v47  ;;  %v5780_v54 = vpop.f32.mrb[173].mxu1  ;;  %v6432_v34 = vor.u32 %v6431_v43, %v6428_v12  ;;  %v6366_v4 = vsel %vm11120_vm14, %v11430_v62, %v11399_v59  ;;  %v11683_v25 = vld [vmem:[#allocation34_spill] sm:$0xff]  ;;  %v11684_v8 = vld [vmem:[#allocation27_spill] sm:$0xff] }
 0x45b   : > { %v6558_v5 = vmax.f32 %v6526_v35, 0.0  ;;  %v8357_v61 = vadd.f32 %v11679_v22, %v5780_v54  ;;  %v8259_v1 = vpop.f32.mrb[174].mxu1  ;;  %v11461_v38 = vrot.slane %v6435_v27, 5  ;;  %v6405_v42 = vshll.u32 %v7317_v52, 16  ;;  %v7322_v52 = vld [vmem:[%s8870_s28 + $0xd4] sm:$0x1] }
 0x45c   : > { %v7429_v57 = vpack.c.bf16 %v6560_v44, %v6559_v51  ;;  %v6048_v13 = vadd.f32 %v8354_v49, %v11299_v16  ;;  %v8360_v19 = vadd.f32 %v11680_v14, %v8259_v1  ;;  %v5783_v2 = vpop.f32.mrb[175].mxu1  ;;  %v6376_v30 = vsel %vm11120_vm14, %v6371_v7, %v11427_v23  ;;  %v11685_v22 = vld [vmem:[#allocation36_spill] sm:$0xff]  ;;  %v7319_v14 = vld [vmem:[%s8870_s28 + $0xc8] sm:$0x1] }
 0x45d   : > { %v7424_v33 = vpack.c.bf16 %v6558_v5, %v6557_v3  ;;  %v6046_v26 = vadd.f32 %v8357_v61, %v11299_v16  ;;  %v8363_v36 = vadd.f32 %v11681_v46, %v5783_v2  ;;  %v6404_v45 = vrot.slane %v6402_v31, 4 }
 0x45e   : > { %7477 = vst [vmem:[%s11339_s14 + $0x38] sm:$0xff] %v7429_v57   ;;  %v6531_v28 = vadd.f32 %v11303_v32, %v6048_v13  ;;  %v6049_v6 = vadd.f32 %v8360_v19, %v11299_v16  ;;  %v6411_v53 = vshll.u32 %v7318_v48, 16  ;;  %v6415_v47 = vshrl.u32 %v7318_v48, 16 }
 0x45f   : > { %7476 = vst [vmem:[%s11339_s14 + $0x30] sm:$0xff] %v7424_v33   ;;  %v6529_v29 = vadd.f32 %v11305_v24, %v6046_v26  ;;  %v6047_v9 = vadd.f32 %v8363_v36, %v11299_v16  ;;  %v6433_v51 = vrot.slane %v6432_v34, 4  ;;  %v6407_v12 = vrot.slane %v6405_v42, 5  ;;  %v11686_v34 = vld [vmem:[#allocation8_spill] sm:$0xff] }
 0x460   : > { %v6532_v32 = vadd.f32 %v11321_v41, %v6049_v6  ;;  %v6563_v10 = vmax.f32 %v6531_v28, 0.0  ;;  %v6441_v1 = vrot.slane %v6439_v60, 4  ;;  %v6413_v13 = vrot.slane %v6411_v53, 5 }
 0x461   : > { %v6530_v24 = vadd.f32 %v11326_v63, %v6047_v9  ;;  %v8262_v21 = vpop.f32.mrb[176].mxu1  ;;  %v6561_v59 = vmax.f32 %v6529_v29, 0.0  ;;  %v6417_v19 = vrot.slane %v6415_v47, 4  ;;  %v6508_v33 = vunpack.c.l.bf16 %v6400_v40  ;;  %v11689_v47 = vld [vmem:[#allocation25_spill] sm:$0xff] }
 0x462   : > { %v6564_v41 = vmax.f32 %v6532_v32, 0.0  ;;  %v8366_v11 = vadd.f32 %v11682_v50, %v8262_v21  ;;  %v5796_v35 = vpop.f32.mrb[177].mxu1  ;;  %v6445_v26 = vshll.u32 %v7322_v52, 16  ;;  %v6505_v36 = vunpack.c.l.bf16 %v6366_v4 }
 0x463   : > { %v6562_v62 = vmax.f32 %v6530_v24, 0.0  ;;  %v8369_v27 = vadd.f32 %v11683_v25, %v5796_v35  ;;  %v8263_v63 = vpop.f32.mrb[178].mxu1  ;;  %v6506_v31 = vunpack.c.l.bf16 %v6376_v30  ;;  %v6408_v28 = vor.u32 %v6407_v12, %v6404_v45  ;;  %v11687_v24 = vld [vmem:[#allocation15_spill] sm:$0xff] }
 0x464   : > { %v7439_v44 = vpack.c.bf16 %v6564_v41, %v6563_v10  ;;  %v6052_v23 = vadd.f32 %v8366_v11, %v11299_v16  ;;  %v8372_v49 = vadd.f32 %v11684_v8, %v8263_v63  ;;  %v5799_v54 = vpop.f32.mrb[179].mxu1  ;;  %v6438_v60 = vsel %vm11120_vm14, %v6433_v51, %v11461_v38  ;;  %v11688_v10 = vld [vmem:[#allocation6_spill] sm:$0xff] }
 0x465   : > { %v7434_v3 = vpack.c.bf16 %v6562_v62, %v6561_v59  ;;  %v6050_v5 = vadd.f32 %v8369_v27, %v11299_v16  ;;  %v8375_v61 = vadd.f32 %v11685_v22, %v5799_v54  ;;  %v6442_v48 = vor.u32 %v6441_v1, %v11461_v38 }
 0x466   : > { %7479 = vst [vmem:[%s11339_s14 + $0x48] sm:$0xff] %v7439_v44   ;;  %v6535_v43 = vadd.f32 %v11361_v55, %v6052_v23  ;;  %v6053_v57 = vadd.f32 %v8372_v49, %v11299_v16  ;;  %v6421_v29 = vshll.u32 %v7319_v14, 16  ;;  %v6447_v30 = vrot.slane %v6445_v26, 5 }
 0x467   : > { %7478 = vst [vmem:[%s11339_s14 + $0x40] sm:$0xff] %v7434_v3   ;;  %v6533_v2 = vadd.f32 %v11368_v17, %v6050_v5  ;;  %v6051_v7 = vadd.f32 %v8375_v61, %v11299_v16  ;;  %v6409_v50 = vrot.slane %v6408_v28, 4  ;;  %v6443_v62 = vrot.slane %v6442_v48, 4 }
 0x468   : > { %v6536_v46 = vadd.f32 %v11372_v0, %v6053_v57  ;;  %v6567_v17 = vmax.f32 %v6535_v43, 0.0  ;;  %v6418_v0 = vor.u32 %v6417_v19, %v6413_v13  ;;  %v6423_v51 = vrot.slane %v6421_v29, 5 }
 0x469   : > { %v6534_v6 = vadd.f32 %v11411_v20, %v6051_v7  ;;  %v8266_v55 = vpop.f32.mrb[180].mxu1  ;;  %v6565_v4 = vmax.f32 %v6533_v2, 0.0  ;;  %v6414_v49 = vsel %vm11120_vm14, %v6409_v50, %v6413_v13  ;;  %v6511_v52 = vunpack.c.l.bf16 %v6438_v60 }
 0x46a   : > { %v6568_v9 = vmax.f32 %v6536_v46, 0.0  ;;  %v8378_v40 = vadd.f32 %v11686_v34, %v8266_v55  ;;  %v5812_v32 = vpop.f32.mrb[181].mxu1  ;;  %v6419_v63 = vrot.slane %v6418_v0, 4  ;;  %v6448_v3 = vsel %vm11120_vm14, %v6443_v62, %v6447_v30 }
 0x46b   : > { %v6566_v42 = vmax.f32 %v6534_v6, 0.0  ;;  %v8381_v21 = vadd.f32 %v11687_v24, %v5812_v32  ;;  %v8267_v20 = vpop.f32.mrb[182].mxu1  ;;  %v6509_v14 = vunpack.c.l.bf16 %v6414_v49  ;;  %v6512_v26 = vunpack.c.l.bf16 %v6448_v3 }
 0x46c   : > { %v7449_v45 = vpack.c.bf16 %v6568_v9, %v6567_v17  ;;  %v6056_v53 = vadd.f32 %v8378_v40, %v11299_v16  ;;  %v8384_v38 = vadd.f32 %v11688_v10, %v8267_v20  ;;  %v5815_v41 = vpop.f32.mrb[183].mxu1  ;;  %v6424_v1 = vsel %vm11120_vm14, %v6419_v63, %v6423_v51 }
 0x46d   : > { %v7444_v11 = vpack.c.bf16 %v6566_v42, %v6565_v4  ;;  %v6054_v35 = vadd.f32 %v8381_v21, %v11299_v16  ;;  %v8387_v59 = vadd.f32 %v11689_v47, %v5815_v41 }
 0x46e   : > { %7481 = vst [vmem:[%s11339_s14 + $0x58] sm:$0xff] %v7449_v45   ;;  %v6539_v25 = vadd.f32 %v11445_v58, %v6056_v53  ;;  %v6057_v27 = vadd.f32 %v8384_v38, %v11299_v16 }
 0x46f   : > { %7480 = vst [vmem:[%s11339_s14 + $0x50] sm:$0xff] %v7444_v11   ;;  %v6537_v44 = vadd.f32 %v6505_v36, %v6054_v35  ;;  %v6055_v23 = vadd.f32 %v8387_v59, %v11299_v16 }
 0x470   : > { %v6540_v8 = vadd.f32 %v6508_v33, %v6057_v27  ;;  %v6571_v5 = vmax.f32 %v6539_v25, 0.0 }
 0x471   : > { %v6538_v54 = vadd.f32 %v6506_v31, %v6055_v23  ;;  %v8270_v12 = vpop.f32.mrb[184].mxu1  ;;  %v6569_v43 = vmax.f32 %v6537_v44, 0.0  ;;  %v6510_v31 = vunpack.c.l.bf16 %v6424_v1 }
 0x472   : > { %v6572_v58 = vmax.f32 %v6540_v8, 0.0  ;;  %v8390_v22 = vadd.f32 %v11281_v39, %v8270_v12  ;;  %v5828_v61 = vpop.f32.mrb[185].mxu1 }
 0x473   : > { %v6570_v57 = vmax.f32 %v6538_v54, 0.0  ;;  %v8393_v13 = vadd.f32 %v11244_v37, %v5828_v61  ;;  %v8271_v19 = vpop.f32.mrb[186].mxu1 }
 0x474   : > { %v7459_v2 = vpack.c.bf16 %v6572_v58, %v6571_v5  ;;  %v6060_v7 = vadd.f32 %v8390_v22, %v11299_v16  ;;  %v8396_v33 = vadd.f32 %v11286_v15, %v8271_v19  ;;  %v5831_v46 = vpop.f32.mrb[187].mxu1 }
 0x475   : > { %v7454_v39 = vpack.c.bf16 %v6570_v57, %v6569_v43  ;;  %v6058_v36 = vadd.f32 %v8393_v13, %v11299_v16  ;;  %v8399_v18 = vadd.f32 %v11248_v56, %v5831_v46 }
 0x476   : > { %7483 = vst [vmem:[%s11339_s14 + $0x68] sm:$0xff] %v7459_v2   ;;  %v6543_v28 = vadd.f32 %v6511_v52, %v6060_v7  ;;  %v6061_v37 = vadd.f32 %v8396_v33, %v11299_v16 }
 0x477   : > { %7482 = vst [vmem:[%s11339_s14 + $0x60] sm:$0xff] %v7454_v39   ;;  %v6541_v6 = vadd.f32 %v6509_v14, %v6058_v36  ;;  %v6059_v55 = vadd.f32 %v8399_v18, %v11299_v16 }
 0x478   : > { %v6544_v60 = vadd.f32 %v6512_v26, %v6061_v37  ;;  %v6575_v48 = vmax.f32 %v6543_v28, 0.0 }
 0x479   : > { %v6542_v15 = vadd.f32 %v6510_v31, %v6059_v55  ;;  %v6573_v17 = vmax.f32 %v6541_v6, 0.0 }
 0x47a   : > { %v6576_v29 = vmax.f32 %v6544_v60, 0.0 }
 0x47b   : > { %v6574_v9 = vmax.f32 %v6542_v15, 0.0 }
 0x47c   : > { %v7469_v34 = vpack.c.bf16 %v6576_v29, %v6575_v48 }
 0x47d   : > { %v7464_v40 = vpack.c.bf16 %v6574_v9, %v6573_v17 }
 0x47e   : > { %7485 = vst [vmem:[%s11339_s14 + $0x78] sm:$0xff] %v7469_v34  }
 0x47f   : > { %7484 = vst [vmem:[%s11339_s14 + $0x70] sm:$0xff] %v7464_v40  }
 0x480 PF: > { %s15_s20 = sadd.s32 1, %s8766_s20   ;;  %s11690_s18 = smov %s8762_s19 }
 0x481   : > { %p12_p5 = scmp.ge.s32.totalorder %s15_s20, 4   ;;  %s11691_s19 = smov %s11693_s21 }
 0x483   :  { %14 = sbr.rel (!%p12_p5) target bundleno = 2 (0x2), region = 85 }

</bundles_post_ra>
